<compile_context>
chip_gen: v6e
topology: v6e:2x2x1
jax: 0.10.0
libtpu: 0.0.40
codegen_flags: <defaults>
</compile_context>

<pallas_src>
import numpy as np
import jax
import jax.numpy as jnp
from jax import lax
from jax.experimental import pallas as pl
from jax.experimental.pallas import tpu as pltpu

IMG_RES = 30                        # Config.img_res
BN_EPS = 1e-5
X_LANES = 128                       # input row width 30*3 = 90, zero-padded to 128
CONV_OUT_PAD = (128, 256, 256)      # per-layer W*Cout (120, 240, 240) padded lane-dense
FC_HIDDEN = 500
FC_HIDDEN_PAD = 512                 # 500 -> 512
FC_OUT = 5
FC_OUT_PAD = 128                    # 5 -> 128
H_CHUNK = 6                         # image rows of w1 streamed per grid step (30 = 5 * 6)
VMEM_LIMIT = 32 * 1024 * 1024


# ---------------------------------------------------------------------------
# Offline weight folding (done once at load time; free at inference time)
# ---------------------------------------------------------------------------
def _reflect(p, n):
    if p < 0:
        return -p
    if p >= n:
        return 2 * n - 2 - p
    return p


def fold_conv_weights(w_hwio, width):
    """Fold a 3x3 HWIO conv weight + reflection *column* padding into three
    (W*Cin, W*Cout) matrices, one per kernel row dy."""
    kh, kw, cin, cout = w_hwio.shape
    mats = np.zeros((kh, width * cin, width * cout), np.float32)
    for dy in range(kh):
        for w in range(width):
            for dx in range(kw):
                src = _reflect(w - 1 + dx, width)
                mats[dy, src * cin:(src + 1) * cin, w * cout:(w + 1) * cout] += (
                    np.asarray(w_hwio[dy, dx], np.float32))
    return mats


# ---------------------------------------------------------------------------
# Fused kernel: conv stack (step 0) + streamed fc1 accumulation + fc2/fc3 tail
# ---------------------------------------------------------------------------
def _fused_kernel(x_ref, m1_ref, a1_ref, m2_ref, a2_ref, m3_ref, a3_ref,
                  w1_ref, b1_ref, w2_ref, b2_ref, w3_ref, b3_ref,
                  o_ref, feats_ref, acc_ref):
    # x_ref:     (2B*H, 128)  all images, rows ordered (h, image), f32
    # m*_ref:    (3, K_pad, N_pad) bf16 folded conv matrices (taps dy = 0, 1, 2)
    # a*_ref:    (3, N_pad)   rows = [conv bias, BN scale, BN shift] tiled over W
    # w1_ref:    (H_CHUNK, 256, 512) bf16  -- streamed chunk of fc1 weight
    # feats_ref: (2B*H, 256) f32 scratch (conv output, persistent across steps)
    # acc_ref:   (2B, 512)   f32 scratch (fc1 accumulator)
    # o_ref:     (2B, 128)   f32 logits (lane-padded), written at the last step
    k = pl.program_id(0)
    n_rows = feats_ref.shape[0]
    n_img = acc_ref.shape[0]
    hc = w1_ref.shape[0]

    # ---- step 0: whole conv stack, all images batched into the matmul M dim ----
    @pl.when(k == 0)
    def _():
        acc_ref[...] = jnp.zeros_like(acc_ref)

        row = lax.broadcasted_iota(jnp.int32, (n_rows, 1), 0)
        top = row < n_img                    # image row h == 0
        bot = row >= n_rows - n_img          # image row h == H-1

        def layer(x, m_ref, a_ref):
            # row reflection: rows are (h, image)-ordered, so +/- n_img moves one
            # image row; boundary rows use the reflected neighbour instead.
            x_p = pltpu.roll(x, n_img, axis=0)            # row h-1 (wraps)
            x_m = pltpu.roll(x, n_rows - n_img, axis=0)   # row h+1 (wraps)
            x_up = jnp.where(top, x_m, x_p)               # reflect at h = 0
            x_dn = jnp.where(bot, x_p, x_m)               # reflect at h = H-1
            y = (jnp.dot(x_up.astype(jnp.bfloat16), m_ref[0],
                         preferred_element_type=jnp.float32)
                 + jnp.dot(x.astype(jnp.bfloat16), m_ref[1],
                           preferred_element_type=jnp.float32)
                 + jnp.dot(x_dn.astype(jnp.bfloat16), m_ref[2],
                           preferred_element_type=jnp.float32))
            y = jnp.maximum(y + a_ref[0:1, :], 0.0)       # conv bias + ReLU
            return y * a_ref[1:2, :] + a_ref[2:3, :]      # eval-mode BatchNorm

        h = layer(x_ref[...], m1_ref, a1_ref)
        h = layer(h, m2_ref, a2_ref)
        h = layer(h, m3_ref, a3_ref)
        feats_ref[...] = h

    # ---- every step: accumulate this chunk of fc1 while the next chunk DMAs ----
    rows_per_step = hc * n_img
    align = rows_per_step & -rows_per_step                # largest pow-2 divisor
    row0 = pl.multiple_of(k * rows_per_step, align)
    fchunk = feats_ref[pl.ds(row0, rows_per_step), :]     # (hc*n_img, 256) f32
    acc = acc_ref[...]
    for hh in range(hc):                                  # static unroll (hc = 6)
        lhs = fchunk[hh * n_img:(hh + 1) * n_img, :].astype(jnp.bfloat16)
        acc = acc + jnp.dot(lhs, w1_ref[hh], preferred_element_type=jnp.float32)
    acc_ref[...] = acc

    # ---- last step: fc2 / fc3 tail and output ----
    @pl.when(k == pl.num_programs(0) - 1)
    def _():
        z = jnp.maximum(acc_ref[...] + b1_ref[...], 0.0)
        z = jnp.dot(z.astype(jnp.bfloat16), w2_ref[...],
                    preferred_element_type=jnp.float32) + b2_ref[...]
        z = jnp.maximum(z, 0.0)
        o_ref[...] = jnp.dot(z.astype(jnp.bfloat16), w3_ref[...],
                             preferred_element_type=jnp.float32) + b3_ref[...]


def _fused_call(x_rows, prepped):
    n_rows = x_rows.shape[0]
    assert n_rows % IMG_RES == 0
    n_img = n_rows // IMG_RES
    assert IMG_RES % H_CHUNK == 0
    n_steps = IMG_RES // H_CHUNK

    (m1, a1), (m2, a2), (m3, a3) = prepped["conv"]
    w1r, b1, w2, b2, w3, b3 = prepped["fc"]

    def const_spec(a):
        nd = a.ndim
        return pl.BlockSpec(a.shape, lambda k, nd=nd: (0,) * nd)

    grid_spec = pltpu.PrefetchScalarGridSpec(
        num_scalar_prefetch=0,
        grid=(n_steps,),
        in_specs=[
            const_spec(x_rows),
            const_spec(m1), const_spec(a1),
            const_spec(m2), const_spec(a2),
            const_spec(m3), const_spec(a3),
            pl.BlockSpec((H_CHUNK,) + w1r.shape[1:], lambda k: (k, 0, 0)),
            const_spec(b1), const_spec(w2), const_spec(b2),
            const_spec(w3), const_spec(b3),
        ],
        out_specs=pl.BlockSpec((n_img, FC_OUT_PAD), lambda k: (0, 0)),
        scratch_shapes=[
            pltpu.VMEM((n_rows, CONV_OUT_PAD[2]), jnp.float32),   # conv features
            pltpu.VMEM((n_img, FC_HIDDEN_PAD), jnp.float32),      # fc1 accumulator
        ],
    )
    return pl.pallas_call(
        _fused_kernel,
        out_shape=jax.ShapeDtypeStruct((n_img, FC_OUT_PAD), jnp.float32),
        grid_spec=grid_spec,
        compiler_params=pltpu.CompilerParams(
            dimension_semantics=("arbitrary",),        # reduction axis (accumulator)
            vmem_limit_bytes=VMEM_LIMIT),
    )(x_rows, m1, a1, m2, a2, m3, a3, w1r, b1, w2, b2, w3, b3)


# ---------------------------------------------------------------------------
# Parameters (deterministic synthetic init in PyTorch-like layouts)
# ---------------------------------------------------------------------------
def init_params(key):
    """conv weights HWIO (3,3,Cin,Cout); fc weights (in_features, out_features)
    with fc1 input rows in PyTorch's NCHW-flatten (C, H, W) order."""
    params = {"conv": [], "fc": []}
    conv_specs = [(3, 4), (4, 8), (8, 8)]
    for i, (cin, cout) in enumerate(conv_specs):
        kw_, kb, kg, kbe, km, kv = jax.random.split(jax.random.fold_in(key, i), 6)
        w = 0.1 * jax.random.normal(kw_, (3, 3, cin, cout), jnp.float32)
        b = 0.1 * jax.random.normal(kb, (1, cout), jnp.float32)
        gamma = 1.0 + 0.1 * jax.random.normal(kg, (1, cout), jnp.float32)
        beta = 0.1 * jax.random.normal(kbe, (1, cout), jnp.float32)
        rmean = 0.1 * jax.random.normal(km, (1, cout), jnp.float32)
        rvar = 1.0 + 0.1 * jnp.abs(jax.random.normal(kv, (1, cout), jnp.float32))
        scale = gamma / jnp.sqrt(rvar + BN_EPS)
        shift = beta - rmean * scale
        params["conv"].append((w, b, scale, shift))

    feat = 8 * IMG_RES * IMG_RES
    fc_specs = [(feat, FC_HIDDEN), (FC_HIDDEN, FC_HIDDEN), (FC_HIDDEN, FC_OUT)]
    for i, (din, dout) in enumerate(fc_specs):
        kw_, kb = jax.random.split(jax.random.fold_in(key, 100 + i))
        w = jax.random.normal(kw_, (din, dout), jnp.float32) / jnp.sqrt(jnp.float32(din))
        b = 0.1 * jax.random.normal(kb, (1, dout), jnp.float32)
        params["fc"].append((w, b))
    return params


def prepare_params(params):
    """Offline folding into TPU-friendly layouts: matmul-form bf16 conv matrices
    (lane-padded), tiled f32 affines, and permuted/padded/bf16 fc weights."""
    H = W = IMG_RES
    prepped = {"conv": [], "fc": None}

    k_pads = [X_LANES, CONV_OUT_PAD[0], CONV_OUT_PAD[1]]
    n_pads = list(CONV_OUT_PAD)
    for li, (w, b, scale, shift) in enumerate(params["conv"]):
        cout = w.shape[-1]
        mats = fold_conv_weights(np.asarray(w, np.float32), W)      # (3, W*Cin, W*Cout)
        mats = np.pad(mats, ((0, 0),
                             (0, k_pads[li] - mats.shape[1]),
                             (0, n_pads[li] - mats.shape[2])))
        aff = np.zeros((3, n_pads[li]), np.float32)
        aff[0, :W * cout] = np.tile(np.asarray(b, np.float32).reshape(cout), W)
        aff[1, :W * cout] = np.tile(np.asarray(scale, np.float32).reshape(cout), W)
        aff[2, :W * cout] = np.tile(np.asarray(shift, np.float32).reshape(cout), W)
        prepped["conv"].append((jnp.asarray(mats, dtype=jnp.bfloat16),
                                jnp.asarray(aff)))

    # fc1: PyTorch flattens NCHW as (C, H, W); the conv kernel emits per-row
    # features with lane index j = w*8 + c, so reorder w1 to (h, j, n) and pad.
    (w1, b1), (w2, b2), (w3, b3) = params["fc"]
    w1r = np.asarray(w1, np.float32).reshape(8, H, W, FC_HIDDEN)     # (c, h, w, n)
    w1r = w1r.transpose(1, 2, 0, 3).reshape(H, W * 8, FC_HIDDEN)     # (h, j, n)
    w1r = np.pad(w1r, ((0, 0),
                       (0, CONV_OUT_PAD[2] - W * 8),
                       (0, FC_HIDDEN_PAD - FC_HIDDEN)))              # (30, 256, 512)

    def pad2(a, rows, cols):
        a = np.asarray(a, np.float32)
        return np.pad(a, ((0, rows - a.shape[0]), (0, cols - a.shape[1])))

    prepped["fc"] = (
        jnp.asarray(w1r, dtype=jnp.bfloat16),
        jnp.asarray(pad2(b1, 1, FC_HIDDEN_PAD)),
        jnp.asarray(pad2(w2, FC_HIDDEN_PAD, FC_HIDDEN_PAD), dtype=jnp.bfloat16),
        jnp.asarray(pad2(b2, 1, FC_HIDDEN_PAD)),
        jnp.asarray(pad2(w3, FC_HIDDEN_PAD, FC_OUT_PAD), dtype=jnp.bfloat16),
        jnp.asarray(pad2(b3, 1, FC_OUT_PAD)),
    )
    return prepped


# ---------------------------------------------------------------------------
# Forward pass (both siamese branches share weights -> one fused call)
# ---------------------------------------------------------------------------
def siamese_forward(input1, input2, prepped):
    b = input1.shape[0]
    x = jnp.stack([input1, input2]).astype(jnp.float32)        # (2, B, C, H, W)
    x = jnp.transpose(x, (3, 0, 1, 4, 2))                      # (H, 2, B, W, C)
    x_rows = x.reshape(IMG_RES * 2 * b, IMG_RES * 3)           # rows ordered (h, image)
    x_rows = jnp.pad(x_rows, ((0, 0), (0, X_LANES - IMG_RES * 3)))
    logits = _fused_call(x_rows, prepped)[:, :FC_OUT]          # drop lane padding
    return logits[:b], logits[b:]


# ---------------------------------------------------------------------------
# Pure-JAX reference (original PyTorch layouts) for a numerical self-check.
# It mimics the kernel's bf16 weight/activation storage so the check is tight.
# ---------------------------------------------------------------------------
def reference_forward(x_nchw, params):
    hp = lax.Precision.HIGHEST
    bf = lambda a: a.astype(jnp.bfloat16).astype(jnp.float32)
    x = jnp.transpose(x_nchw, (0, 2, 3, 1)).astype(jnp.float32)        # NHWC
    for (w, b, scale, shift) in params["conv"]:
        xp = jnp.pad(bf(x), ((0, 0), (1, 1), (1, 1), (0, 0)), mode="reflect")
        y = lax.conv_general_dilated(xp, bf(w), (1, 1), "VALID",
                                     dimension_numbers=("NHWC", "HWIO", "NHWC"),
                                     precision=hp)
        y = jnp.maximum(y + b.reshape(1, 1, 1, -1), 0.0)
        x = y * scale.reshape(1, 1, 1, -1) + shift.reshape(1, 1, 1, -1)
    feat = jnp.transpose(x, (0, 3, 1, 2)).reshape(x.shape[0], -1)      # (C,H,W) flatten
    (w1, b1), (w2, b2), (w3, b3) = params["fc"]
    h = jnp.maximum(jnp.dot(bf(feat), bf(w1), precision=hp) + b1, 0.0)
    h = jnp.maximum(jnp.dot(bf(h), bf(w2), precision=hp) + b2, 0.0)
    return jnp.dot(bf(h), bf(w3), precision=hp) + b3


if __name__ == "__main__":
    key = jax.random.PRNGKey(0)
    pkey, k1, k2 = jax.random.split(key, 3)
    params = init_params(pkey)
    prepped = prepare_params(params)

    # Shapes implied by the module: (B, 3, img_res, img_res) with img_res = 30.
    input1 = jax.random.normal(k1, (2, 3, IMG_RES, IMG_RES), jnp.float32)
    input2 = jax.random.normal(k2, (2, 3, IMG_RES, IMG_RES), jnp.float32)

    fwd = jax.jit(siamese_forward)
    out1, out2 = fwd(input1, input2, prepped)
    jax.block_until_ready((out1, out2))
    assert out1.shape == (2, 5) and out2.shape == (2, 5)
    assert out1.dtype == jnp.float32 and out2.dtype == jnp.float32

    # Numerical self-check against a pure-JAX reference of the original module.
    ref1 = reference_forward(input1, params)
    ref2 = reference_forward(input2, params)
    assert jnp.allclose(out1, ref1, atol=3e-2, rtol=3e-2), "branch-1 mismatch vs reference"
    assert jnp.allclose(out2, ref2, atol=3e-2, rtol=3e-2), "branch-2 mismatch vs reference"

    print("KERNEL_OK")
</pallas_src>

<mosaic_0001>
module attributes {stable_mosaic.version = 11 : i64} {
  func.func @_fused_kernel(%arg0: i32, %arg1: memref<120x128xf32, #tpu.memory_space<vmem>>, %arg2: memref<3x128x128xbf16, #tpu.memory_space<vmem>>, %arg3: memref<3x128xf32, #tpu.memory_space<vmem>>, %arg4: memref<3x128x256xbf16, #tpu.memory_space<vmem>>, %arg5: memref<3x256xf32, #tpu.memory_space<vmem>>, %arg6: memref<3x256x256xbf16, #tpu.memory_space<vmem>>, %arg7: memref<3x256xf32, #tpu.memory_space<vmem>>, %arg8: memref<6x256x512xbf16, #tpu.memory_space<vmem>>, %arg9: memref<1x512xf32, #tpu.memory_space<vmem>>, %arg10: memref<512x512xbf16, #tpu.memory_space<vmem>>, %arg11: memref<1x512xf32, #tpu.memory_space<vmem>>, %arg12: memref<512x128xbf16, #tpu.memory_space<vmem>>, %arg13: memref<1x128xf32, #tpu.memory_space<vmem>>, %arg14: memref<4x128xf32, #tpu.memory_space<vmem>>, %arg15: memref<120x256xf32, #tpu.memory_space<vmem>>, %arg16: memref<4x512xf32, #tpu.memory_space<vmem>>) attributes {dimension_semantics = [#tpu.dimension_semantics<arbitrary>], iteration_bounds = array<i64: 5>, scalar_prefetch = 0 : i64, scratch_operands = 2 : i64, tpu.core_type = #tpu.core_type<tc>, window_params = [{pipeline_mode = #tpu.pipeline_mode<synchronous>, transform_indices = @transform_0, window_bounds = array<i64: 120, 128>}, {pipeline_mode = #tpu.pipeline_mode<synchronous>, transform_indices = @transform_1, window_bounds = array<i64: 3, 128, 128>}, {pipeline_mode = #tpu.pipeline_mode<synchronous>, transform_indices = @transform_2, window_bounds = array<i64: 3, 128>}, {pipeline_mode = #tpu.pipeline_mode<synchronous>, transform_indices = @transform_3, window_bounds = array<i64: 3, 128, 256>}, {pipeline_mode = #tpu.pipeline_mode<synchronous>, transform_indices = @transform_4, window_bounds = array<i64: 3, 256>}, {pipeline_mode = #tpu.pipeline_mode<synchronous>, transform_indices = @transform_5, window_bounds = array<i64: 3, 256, 256>}, {pipeline_mode = #tpu.pipeline_mode<synchronous>, transform_indices = @transform_6, window_bounds = array<i64: 3, 256>}, {transform_indices = @transform_7, window_bounds = array<i64: 6, 256, 512>}, {pipeline_mode = #tpu.pipeline_mode<synchronous>, transform_indices = @transform_8, window_bounds = array<i64: 1, 512>}, {pipeline_mode = #tpu.pipeline_mode<synchronous>, transform_indices = @transform_9, window_bounds = array<i64: 512, 512>}, {pipeline_mode = #tpu.pipeline_mode<synchronous>, transform_indices = @transform_10, window_bounds = array<i64: 1, 512>}, {pipeline_mode = #tpu.pipeline_mode<synchronous>, transform_indices = @transform_11, window_bounds = array<i64: 512, 128>}, {pipeline_mode = #tpu.pipeline_mode<synchronous>, transform_indices = @transform_12, window_bounds = array<i64: 1, 128>}, {pipeline_mode = #tpu.pipeline_mode<synchronous>, transform_indices = @transform_13, window_bounds = array<i64: 4, 128>}]} {
    %c0_i32 = arith.constant 0 : i32
    %0 = arith.cmpi eq, %arg0, %c0_i32 : i32
    %1 = arith.extui %0 : i1 to i32
    %c0_i32_0 = arith.constant 0 : i32
    %2 = arith.cmpi ne, %1, %c0_i32_0 : i32
    scf.if %2 {
      %cst_24 = arith.constant 0.000000e+00 : f32
      %48 = vector.broadcast %cst_24 : f32 to vector<4x512xf32>
      %c0_25 = arith.constant 0 : index
      %c0_26 = arith.constant 0 : index
      %49 = vector.load %arg16[%c0_25, %c0_26] : memref<4x512xf32, #tpu.memory_space<vmem>>, vector<4x512xf32>
      tpu.vector_store %arg16[%c0_25, %c0_26], %48 {strides = array<i32>} : memref<4x512xf32, #tpu.memory_space<vmem>>, vector<4x512xf32>,
      %50 = tpu.iota {dimensions = array<i32: 0>} : vector<120x1xi32>
      %c4_i32_27 = arith.constant 4 : i32
      %51 = vector.broadcast %c4_i32_27 : i32 to vector<120x1xi32>
      %52 = arith.cmpi slt, %50, %51 : vector<120x1xi32>
      %c116_i32 = arith.constant 116 : i32
      %53 = vector.broadcast %c116_i32 : i32 to vector<120x1xi32>
      %54 = arith.cmpi sge, %50, %53 : vector<120x1xi32>
      %c0_28 = arith.constant 0 : index
      %c0_29 = arith.constant 0 : index
      %55 = vector.load %arg1[%c0_28, %c0_29] : memref<120x128xf32, #tpu.memory_space<vmem>>, vector<120x128xf32>
      %c4_i32_30 = arith.constant 4 : i32
      %56 = tpu.dynamic_rotate %55 by %c4_i32_30 dim 0 : vector<120x128xf32>, i32 -> vector<120x128xf32>
      %c116_i32_31 = arith.constant 116 : i32
      %57 = tpu.dynamic_rotate %55 by %c116_i32_31 dim 0 : vector<120x128xf32>, i32 -> vector<120x128xf32>
      %58 = vector.shape_cast %52 : vector<120x1xi1> to vector<120x1xi1>
      %59 = vector.broadcast %58 : vector<120x1xi1> to vector<120x128xi1>
      %60 = arith.select %59, %57, %56 : vector<120x128xi1>, vector<120x128xf32>
      %61 = vector.shape_cast %54 : vector<120x1xi1> to vector<120x1xi1>
      %62 = vector.broadcast %61 : vector<120x1xi1> to vector<120x128xi1>
      %63 = arith.select %62, %56, %57 : vector<120x128xi1>, vector<120x128xf32>
      %64 = arith.truncf %60 : vector<120x128xf32> to vector<120x128xbf16>
      %c0_32 = arith.constant 0 : index
      %c0_33 = arith.constant 0 : index
      %c0_34 = arith.constant 0 : index
      %65 = vector.load %arg2[%c0_32, %c0_33, %c0_34] : memref<3x128x128xbf16, #tpu.memory_space<vmem>>, vector<1x128x128xbf16>
      %66 = vector.shape_cast %65 : vector<1x128x128xbf16> to vector<128x128xbf16>
      %cst_35 = arith.constant dense<0.000000e+00> : vector<120x128xf32>
      %67 = tpu.matmul %64, %66, %cst_35 {dimension_numbers = #tpu.dot_dimension_numbers<[1], [0], [0], [1], [0, 0, 1, 1], [], []>} : vector<120x128xbf16>, vector<128x128xbf16>, vector<120x128xf32> -> vector<120x128xf32>
      %68 = arith.truncf %55 : vector<120x128xf32> to vector<120x128xbf16>
      %c1_36 = arith.constant 1 : index
      %c0_37 = arith.constant 0 : index
      %c0_38 = arith.constant 0 : index
      %69 = vector.load %arg2[%c1_36, %c0_37, %c0_38] : memref<3x128x128xbf16, #tpu.memory_space<vmem>>, vector<1x128x128xbf16>
      %70 = vector.shape_cast %69 : vector<1x128x128xbf16> to vector<128x128xbf16>
      %cst_39 = arith.constant dense<0.000000e+00> : vector<120x128xf32>
      %71 = tpu.matmul %68, %70, %cst_39 {dimension_numbers = #tpu.dot_dimension_numbers<[1], [0], [0], [1], [0, 0, 1, 1], [], []>} : vector<120x128xbf16>, vector<128x128xbf16>, vector<120x128xf32> -> vector<120x128xf32>
      %72 = arith.addf %67, %71 : vector<120x128xf32>
      %73 = arith.truncf %63 : vector<120x128xf32> to vector<120x128xbf16>
      %c2_40 = arith.constant 2 : index
      %c0_41 = arith.constant 0 : index
      %c0_42 = arith.constant 0 : index
      %74 = vector.load %arg2[%c2_40, %c0_41, %c0_42] : memref<3x128x128xbf16, #tpu.memory_space<vmem>>, vector<1x128x128xbf16>
      %75 = vector.shape_cast %74 : vector<1x128x128xbf16> to vector<128x128xbf16>
      %cst_43 = arith.constant dense<0.000000e+00> : vector<120x128xf32>
      %76 = tpu.matmul %73, %75, %cst_43 {dimension_numbers = #tpu.dot_dimension_numbers<[1], [0], [0], [1], [0, 0, 1, 1], [], []>} : vector<120x128xbf16>, vector<128x128xbf16>, vector<120x128xf32> -> vector<120x128xf32>
      %77 = arith.addf %72, %76 : vector<120x128xf32>
      %c0_44 = arith.constant 0 : index
      %c0_45 = arith.constant 0 : index
      %78 = vector.load %arg3[%c0_44, %c0_45] : memref<3x128xf32, #tpu.memory_space<vmem>>, vector<1x128xf32>
      %79 = vector.broadcast %78 : vector<1x128xf32> to vector<120x128xf32>
      %80 = arith.addf %77, %79 : vector<120x128xf32>
      %cst_46 = arith.constant 0.000000e+00 : f32
      %81 = vector.broadcast %cst_46 : f32 to vector<120x128xf32>
      %82 = arith.maximumf %80, %81 : vector<120x128xf32>
      %c1_47 = arith.constant 1 : index
      %c0_48 = arith.constant 0 : index
      %83 = vector.load %arg3[%c1_47, %c0_48] : memref<3x128xf32, #tpu.memory_space<vmem>>, vector<1x128xf32>
      %84 = vector.broadcast %83 : vector<1x128xf32> to vector<120x128xf32>
      %85 = arith.mulf %82, %84 : vector<120x128xf32>
      %c2_49 = arith.constant 2 : index
      %c0_50 = arith.constant 0 : index
      %86 = vector.load %arg3[%c2_49, %c0_50] : memref<3x128xf32, #tpu.memory_space<vmem>>, vector<1x128xf32>
      %87 = vector.broadcast %86 : vector<1x128xf32> to vector<120x128xf32>
      %88 = arith.addf %85, %87 : vector<120x128xf32>
      %c4_i32_51 = arith.constant 4 : i32
      %89 = tpu.dynamic_rotate %88 by %c4_i32_51 dim 0 : vector<120x128xf32>, i32 -> vector<120x128xf32>
      %c116_i32_52 = arith.constant 116 : i32
      %90 = tpu.dynamic_rotate %88 by %c116_i32_52 dim 0 : vector<120x128xf32>, i32 -> vector<120x128xf32>
      %91 = vector.shape_cast %52 : vector<120x1xi1> to vector<120x1xi1>
      %92 = vector.broadcast %91 : vector<120x1xi1> to vector<120x128xi1>
      %93 = arith.select %92, %90, %89 : vector<120x128xi1>, vector<120x128xf32>
      %94 = vector.shape_cast %54 : vector<120x1xi1> to vector<120x1xi1>
      %95 = vector.broadcast %94 : vector<120x1xi1> to vector<120x128xi1>
      %96 = arith.select %95, %89, %90 : vector<120x128xi1>, vector<120x128xf32>
      %97 = arith.truncf %93 : vector<120x128xf32> to vector<120x128xbf16>
      %c0_53 = arith.constant 0 : index
      %c0_54 = arith.constant 0 : index
      %c0_55 = arith.constant 0 : index
      %98 = vector.load %arg4[%c0_53, %c0_54, %c0_55] : memref<3x128x256xbf16, #tpu.memory_space<vmem>>, vector<1x128x256xbf16>
      %99 = vector.shape_cast %98 : vector<1x128x256xbf16> to vector<128x256xbf16>
      %cst_56 = arith.constant dense<0.000000e+00> : vector<120x256xf32>
      %100 = tpu.matmul %97, %99, %cst_56 {dimension_numbers = #tpu.dot_dimension_numbers<[1], [0], [0], [1], [0, 0, 1, 1], [], []>} : vector<120x128xbf16>, vector<128x256xbf16>, vector<120x256xf32> -> vector<120x256xf32>
      %101 = arith.truncf %88 : vector<120x128xf32> to vector<120x128xbf16>
      %c1_57 = arith.constant 1 : index
      %c0_58 = arith.constant 0 : index
      %c0_59 = arith.constant 0 : index
      %102 = vector.load %arg4[%c1_57, %c0_58, %c0_59] : memref<3x128x256xbf16, #tpu.memory_space<vmem>>, vector<1x128x256xbf16>
      %103 = vector.shape_cast %102 : vector<1x128x256xbf16> to vector<128x256xbf16>
      %cst_60 = arith.constant dense<0.000000e+00> : vector<120x256xf32>
      %104 = tpu.matmul %101, %103, %cst_60 {dimension_numbers = #tpu.dot_dimension_numbers<[1], [0], [0], [1], [0, 0, 1, 1], [], []>} : vector<120x128xbf16>, vector<128x256xbf16>, vector<120x256xf32> -> vector<120x256xf32>
      %105 = arith.addf %100, %104 : vector<120x256xf32>
      %106 = arith.truncf %96 : vector<120x128xf32> to vector<120x128xbf16>
      %c2_61 = arith.constant 2 : index
      %c0_62 = arith.constant 0 : index
      %c0_63 = arith.constant 0 : index
      %107 = vector.load %arg4[%c2_61, %c0_62, %c0_63] : memref<3x128x256xbf16, #tpu.memory_space<vmem>>, vector<1x128x256xbf16>
      %108 = vector.shape_cast %107 : vector<1x128x256xbf16> to vector<128x256xbf16>
      %cst_64 = arith.constant dense<0.000000e+00> : vector<120x256xf32>
      %109 = tpu.matmul %106, %108, %cst_64 {dimension_numbers = #tpu.dot_dimension_numbers<[1], [0], [0], [1], [0, 0, 1, 1], [], []>} : vector<120x128xbf16>, vector<128x256xbf16>, vector<120x256xf32> -> vector<120x256xf32>
      %110 = arith.addf %105, %109 : vector<120x256xf32>
      %c0_65 = arith.constant 0 : index
      %c0_66 = arith.constant 0 : index
      %111 = vector.load %arg5[%c0_65, %c0_66] : memref<3x256xf32, #tpu.memory_space<vmem>>, vector<1x256xf32>
      %112 = vector.broadcast %111 : vector<1x256xf32> to vector<120x256xf32>
      %113 = arith.addf %110, %112 : vector<120x256xf32>
      %cst_67 = arith.constant 0.000000e+00 : f32
      %114 = vector.broadcast %cst_67 : f32 to vector<120x256xf32>
      %115 = arith.maximumf %113, %114 : vector<120x256xf32>
      %c1_68 = arith.constant 1 : index
      %c0_69 = arith.constant 0 : index
      %116 = vector.load %arg5[%c1_68, %c0_69] : memref<3x256xf32, #tpu.memory_space<vmem>>, vector<1x256xf32>
      %117 = vector.broadcast %116 : vector<1x256xf32> to vector<120x256xf32>
      %118 = arith.mulf %115, %117 : vector<120x256xf32>
      %c2_70 = arith.constant 2 : index
      %c0_71 = arith.constant 0 : index
      %119 = vector.load %arg5[%c2_70, %c0_71] : memref<3x256xf32, #tpu.memory_space<vmem>>, vector<1x256xf32>
      %120 = vector.broadcast %119 : vector<1x256xf32> to vector<120x256xf32>
      %121 = arith.addf %118, %120 : vector<120x256xf32>
      %c4_i32_72 = arith.constant 4 : i32
      %122 = tpu.dynamic_rotate %121 by %c4_i32_72 dim 0 : vector<120x256xf32>, i32 -> vector<120x256xf32>
      %c116_i32_73 = arith.constant 116 : i32
      %123 = tpu.dynamic_rotate %121 by %c116_i32_73 dim 0 : vector<120x256xf32>, i32 -> vector<120x256xf32>
      %124 = vector.shape_cast %52 : vector<120x1xi1> to vector<120x1xi1>
      %125 = vector.broadcast %124 : vector<120x1xi1> to vector<120x256xi1>
      %126 = arith.select %125, %123, %122 : vector<120x256xi1>, vector<120x256xf32>
      %127 = vector.shape_cast %54 : vector<120x1xi1> to vector<120x1xi1>
      %128 = vector.broadcast %127 : vector<120x1xi1> to vector<120x256xi1>
      %129 = arith.select %128, %122, %123 : vector<120x256xi1>, vector<120x256xf32>
      %130 = arith.truncf %126 : vector<120x256xf32> to vector<120x256xbf16>
      %c0_74 = arith.constant 0 : index
      %c0_75 = arith.constant 0 : index
      %c0_76 = arith.constant 0 : index
      %131 = vector.load %arg6[%c0_74, %c0_75, %c0_76] : memref<3x256x256xbf16, #tpu.memory_space<vmem>>, vector<1x256x256xbf16>
      %132 = vector.shape_cast %131 : vector<1x256x256xbf16> to vector<256x256xbf16>
      %cst_77 = arith.constant dense<0.000000e+00> : vector<120x256xf32>
      %133 = tpu.matmul %130, %132, %cst_77 {dimension_numbers = #tpu.dot_dimension_numbers<[1], [0], [0], [1], [0, 0, 1, 1], [], []>} : vector<120x256xbf16>, vector<256x256xbf16>, vector<120x256xf32> -> vector<120x256xf32>
      %134 = arith.truncf %121 : vector<120x256xf32> to vector<120x256xbf16>
      %c1_78 = arith.constant 1 : index
      %c0_79 = arith.constant 0 : index
      %c0_80 = arith.constant 0 : index
      %135 = vector.load %arg6[%c1_78, %c0_79, %c0_80] : memref<3x256x256xbf16, #tpu.memory_space<vmem>>, vector<1x256x256xbf16>
      %136 = vector.shape_cast %135 : vector<1x256x256xbf16> to vector<256x256xbf16>
      %cst_81 = arith.constant dense<0.000000e+00> : vector<120x256xf32>
      %137 = tpu.matmul %134, %136, %cst_81 {dimension_numbers = #tpu.dot_dimension_numbers<[1], [0], [0], [1], [0, 0, 1, 1], [], []>} : vector<120x256xbf16>, vector<256x256xbf16>, vector<120x256xf32> -> vector<120x256xf32>
      %138 = arith.addf %133, %137 : vector<120x256xf32>
      %139 = arith.truncf %129 : vector<120x256xf32> to vector<120x256xbf16>
      %c2_82 = arith.constant 2 : index
      %c0_83 = arith.constant 0 : index
      %c0_84 = arith.constant 0 : index
      %140 = vector.load %arg6[%c2_82, %c0_83, %c0_84] : memref<3x256x256xbf16, #tpu.memory_space<vmem>>, vector<1x256x256xbf16>
      %141 = vector.shape_cast %140 : vector<1x256x256xbf16> to vector<256x256xbf16>
      %cst_85 = arith.constant dense<0.000000e+00> : vector<120x256xf32>
      %142 = tpu.matmul %139, %141, %cst_85 {dimension_numbers = #tpu.dot_dimension_numbers<[1], [0], [0], [1], [0, 0, 1, 1], [], []>} : vector<120x256xbf16>, vector<256x256xbf16>, vector<120x256xf32> -> vector<120x256xf32>
      %143 = arith.addf %138, %142 : vector<120x256xf32>
      %c0_86 = arith.constant 0 : index
      %c0_87 = arith.constant 0 : index
      %144 = vector.load %arg7[%c0_86, %c0_87] : memref<3x256xf32, #tpu.memory_space<vmem>>, vector<1x256xf32>
      %145 = vector.broadcast %144 : vector<1x256xf32> to vector<120x256xf32>
      %146 = arith.addf %143, %145 : vector<120x256xf32>
      %cst_88 = arith.constant 0.000000e+00 : f32
      %147 = vector.broadcast %cst_88 : f32 to vector<120x256xf32>
      %148 = arith.maximumf %146, %147 : vector<120x256xf32>
      %c1_89 = arith.constant 1 : index
      %c0_90 = arith.constant 0 : index
      %149 = vector.load %arg7[%c1_89, %c0_90] : memref<3x256xf32, #tpu.memory_space<vmem>>, vector<1x256xf32>
      %150 = vector.broadcast %149 : vector<1x256xf32> to vector<120x256xf32>
      %151 = arith.mulf %148, %150 : vector<120x256xf32>
      %c2_91 = arith.constant 2 : index
      %c0_92 = arith.constant 0 : index
      %152 = vector.load %arg7[%c2_91, %c0_92] : memref<3x256xf32, #tpu.memory_space<vmem>>, vector<1x256xf32>
      %153 = vector.broadcast %152 : vector<1x256xf32> to vector<120x256xf32>
      %154 = arith.addf %151, %153 : vector<120x256xf32>
      %c0_93 = arith.constant 0 : index
      %c0_94 = arith.constant 0 : index
      %155 = vector.load %arg15[%c0_93, %c0_94] : memref<120x256xf32, #tpu.memory_space<vmem>>, vector<120x256xf32>
      tpu.vector_store %arg15[%c0_93, %c0_94], %154 {strides = array<i32>} : memref<120x256xf32, #tpu.memory_space<vmem>>, vector<120x256xf32>,
    } else {
    }
    %c24_i32 = arith.constant 24 : i32
    %3 = arith.muli %arg0, %c24_i32 : i32
    %4 = tpu.assume_multiple %3, 8 : i32
    %5 = arith.index_cast %4 : i32 to index
    %c0 = arith.constant 0 : index
    %6 = vector.load %arg15[%5, %c0] : memref<120x256xf32, #tpu.memory_space<vmem>>, vector<24x256xf32>
    %c0_1 = arith.constant 0 : index
    %c0_2 = arith.constant 0 : index
    %7 = vector.load %arg16[%c0_1, %c0_2] : memref<4x512xf32, #tpu.memory_space<vmem>>, vector<4x512xf32>
    %8 = vector.extract_strided_slice %6 {offsets = [0, 0], sizes = [4, 256], strides = [1, 1]} : vector<24x256xf32> to vector<4x256xf32>
    %9 = arith.truncf %8 : vector<4x256xf32> to vector<4x256xbf16>
    %c0_3 = arith.constant 0 : index
    %c0_4 = arith.constant 0 : index
    %c0_5 = arith.constant 0 : index
    %10 = vector.load %arg8[%c0_3, %c0_4, %c0_5] : memref<6x256x512xbf16, #tpu.memory_space<vmem>>, vector<1x256x512xbf16>
    %11 = vector.shape_cast %10 : vector<1x256x512xbf16> to vector<256x512xbf16>
    %cst = arith.constant dense<0.000000e+00> : vector<4x512xf32>
    %12 = tpu.matmul %9, %11, %cst {dimension_numbers = #tpu.dot_dimension_numbers<[1], [0], [0], [1], [0, 0, 1, 1], [], []>} : vector<4x256xbf16>, vector<256x512xbf16>, vector<4x512xf32> -> vector<4x512xf32>
    %13 = arith.addf %7, %12 : vector<4x512xf32>
    %14 = vector.extract_strided_slice %6 {offsets = [4, 0], sizes = [4, 256], strides = [1, 1]} : vector<24x256xf32> to vector<4x256xf32>
    %15 = arith.truncf %14 : vector<4x256xf32> to vector<4x256xbf16>
    %c1 = arith.constant 1 : index
    %c0_6 = arith.constant 0 : index
    %c0_7 = arith.constant 0 : index
    %16 = vector.load %arg8[%c1, %c0_6, %c0_7] : memref<6x256x512xbf16, #tpu.memory_space<vmem>>, vector<1x256x512xbf16>
    %17 = vector.shape_cast %16 : vector<1x256x512xbf16> to vector<256x512xbf16>
    %cst_8 = arith.constant dense<0.000000e+00> : vector<4x512xf32>
    %18 = tpu.matmul %15, %17, %cst_8 {dimension_numbers = #tpu.dot_dimension_numbers<[1], [0], [0], [1], [0, 0, 1, 1], [], []>} : vector<4x256xbf16>, vector<256x512xbf16>, vector<4x512xf32> -> vector<4x512xf32>
    %19 = arith.addf %13, %18 : vector<4x512xf32>
    %20 = vector.extract_strided_slice %6 {offsets = [8, 0], sizes = [4, 256], strides = [1, 1]} : vector<24x256xf32> to vector<4x256xf32>
    %21 = arith.truncf %20 : vector<4x256xf32> to vector<4x256xbf16>
    %c2 = arith.constant 2 : index
    %c0_9 = arith.constant 0 : index
    %c0_10 = arith.constant 0 : index
    %22 = vector.load %arg8[%c2, %c0_9, %c0_10] : memref<6x256x512xbf16, #tpu.memory_space<vmem>>, vector<1x256x512xbf16>
    %23 = vector.shape_cast %22 : vector<1x256x512xbf16> to vector<256x512xbf16>
    %cst_11 = arith.constant dense<0.000000e+00> : vector<4x512xf32>
    %24 = tpu.matmul %21, %23, %cst_11 {dimension_numbers = #tpu.dot_dimension_numbers<[1], [0], [0], [1], [0, 0, 1, 1], [], []>} : vector<4x256xbf16>, vector<256x512xbf16>, vector<4x512xf32> -> vector<4x512xf32>
    %25 = arith.addf %19, %24 : vector<4x512xf32>
    %26 = vector.extract_strided_slice %6 {offsets = [12, 0], sizes = [4, 256], strides = [1, 1]} : vector<24x256xf32> to vector<4x256xf32>
    %27 = arith.truncf %26 : vector<4x256xf32> to vector<4x256xbf16>
    %c3 = arith.constant 3 : index
    %c0_12 = arith.constant 0 : index
    %c0_13 = arith.constant 0 : index
    %28 = vector.load %arg8[%c3, %c0_12, %c0_13] : memref<6x256x512xbf16, #tpu.memory_space<vmem>>, vector<1x256x512xbf16>
    %29 = vector.shape_cast %28 : vector<1x256x512xbf16> to vector<256x512xbf16>
    %cst_14 = arith.constant dense<0.000000e+00> : vector<4x512xf32>
    %30 = tpu.matmul %27, %29, %cst_14 {dimension_numbers = #tpu.dot_dimension_numbers<[1], [0], [0], [1], [0, 0, 1, 1], [], []>} : vector<4x256xbf16>, vector<256x512xbf16>, vector<4x512xf32> -> vector<4x512xf32>
    %31 = arith.addf %25, %30 : vector<4x512xf32>
    %32 = vector.extract_strided_slice %6 {offsets = [16, 0], sizes = [4, 256], strides = [1, 1]} : vector<24x256xf32> to vector<4x256xf32>
    %33 = arith.truncf %32 : vector<4x256xf32> to vector<4x256xbf16>
    %c4 = arith.constant 4 : index
    %c0_15 = arith.constant 0 : index
    %c0_16 = arith.constant 0 : index
    %34 = vector.load %arg8[%c4, %c0_15, %c0_16] : memref<6x256x512xbf16, #tpu.memory_space<vmem>>, vector<1x256x512xbf16>
    %35 = vector.shape_cast %34 : vector<1x256x512xbf16> to vector<256x512xbf16>
    %cst_17 = arith.constant dense<0.000000e+00> : vector<4x512xf32>
    %36 = tpu.matmul %33, %35, %cst_17 {dimension_numbers = #tpu.dot_dimension_numbers<[1], [0], [0], [1], [0, 0, 1, 1], [], []>} : vector<4x256xbf16>, vector<256x512xbf16>, vector<4x512xf32> -> vector<4x512xf32>
    %37 = arith.addf %31, %36 : vector<4x512xf32>
    %38 = vector.extract_strided_slice %6 {offsets = [20, 0], sizes = [4, 256], strides = [1, 1]} : vector<24x256xf32> to vector<4x256xf32>
    %39 = arith.truncf %38 : vector<4x256xf32> to vector<4x256xbf16>
    %c5 = arith.constant 5 : index
    %c0_18 = arith.constant 0 : index
    %c0_19 = arith.constant 0 : index
    %40 = vector.load %arg8[%c5, %c0_18, %c0_19] : memref<6x256x512xbf16, #tpu.memory_space<vmem>>, vector<1x256x512xbf16>
    %41 = vector.shape_cast %40 : vector<1x256x512xbf16> to vector<256x512xbf16>
    %cst_20 = arith.constant dense<0.000000e+00> : vector<4x512xf32>
    %42 = tpu.matmul %39, %41, %cst_20 {dimension_numbers = #tpu.dot_dimension_numbers<[1], [0], [0], [1], [0, 0, 1, 1], [], []>} : vector<4x256xbf16>, vector<256x512xbf16>, vector<4x512xf32> -> vector<4x512xf32>
    %43 = arith.addf %37, %42 : vector<4x512xf32>
    %c0_21 = arith.constant 0 : index
    %c0_22 = arith.constant 0 : index
    %44 = vector.load %arg16[%c0_21, %c0_22] : memref<4x512xf32, #tpu.memory_space<vmem>>, vector<4x512xf32>
    tpu.vector_store %arg16[%c0_21, %c0_22], %43 {strides = array<i32>} : memref<4x512xf32, #tpu.memory_space<vmem>>, vector<4x512xf32>,
    %c4_i32 = arith.constant 4 : i32
    %45 = arith.cmpi eq, %arg0, %c4_i32 : i32
    %46 = arith.extui %45 : i1 to i32
    %c0_i32_23 = arith.constant 0 : i32
    %47 = arith.cmpi ne, %46, %c0_i32_23 : i32
    scf.if %47 {
      %c0_24 = arith.constant 0 : index
      %c0_25 = arith.constant 0 : index
      %48 = vector.load %arg16[%c0_24, %c0_25] : memref<4x512xf32, #tpu.memory_space<vmem>>, vector<4x512xf32>
      %c0_26 = arith.constant 0 : index
      %c0_27 = arith.constant 0 : index
      %49 = vector.load %arg9[%c0_26, %c0_27] : memref<1x512xf32, #tpu.memory_space<vmem>>, vector<1x512xf32>
      %50 = vector.broadcast %49 : vector<1x512xf32> to vector<4x512xf32>
      %51 = arith.addf %48, %50 : vector<4x512xf32>
      %cst_28 = arith.constant 0.000000e+00 : f32
      %52 = vector.broadcast %cst_28 : f32 to vector<4x512xf32>
      %53 = arith.maximumf %51, %52 : vector<4x512xf32>
      %54 = arith.truncf %53 : vector<4x512xf32> to vector<4x512xbf16>
      %c0_29 = arith.constant 0 : index
      %c0_30 = arith.constant 0 : index
      %55 = vector.load %arg10[%c0_29, %c0_30] : memref<512x512xbf16, #tpu.memory_space<vmem>>, vector<512x512xbf16>
      %cst_31 = arith.constant dense<0.000000e+00> : vector<4x512xf32>
      %56 = tpu.matmul %54, %55, %cst_31 {dimension_numbers = #tpu.dot_dimension_numbers<[1], [0], [0], [1], [0, 0, 1, 1], [], []>} : vector<4x512xbf16>, vector<512x512xbf16>, vector<4x512xf32> -> vector<4x512xf32>
      %c0_32 = arith.constant 0 : index
      %c0_33 = arith.constant 0 : index
      %57 = vector.load %arg11[%c0_32, %c0_33] : memref<1x512xf32, #tpu.memory_space<vmem>>, vector<1x512xf32>
      %58 = vector.broadcast %57 : vector<1x512xf32> to vector<4x512xf32>
      %59 = arith.addf %56, %58 : vector<4x512xf32>
      %cst_34 = arith.constant 0.000000e+00 : f32
      %60 = vector.broadcast %cst_34 : f32 to vector<4x512xf32>
      %61 = arith.maximumf %59, %60 : vector<4x512xf32>
      %62 = arith.truncf %61 : vector<4x512xf32> to vector<4x512xbf16>
      %c0_35 = arith.constant 0 : index
      %c0_36 = arith.constant 0 : index
      %63 = vector.load %arg12[%c0_35, %c0_36] : memref<512x128xbf16, #tpu.memory_space<vmem>>, vector<512x128xbf16>
      %cst_37 = arith.constant dense<0.000000e+00> : vector<4x128xf32>
      %64 = tpu.matmul %62, %63, %cst_37 {dimension_numbers = #tpu.dot_dimension_numbers<[1], [0], [0], [1], [0, 0, 1, 1], [], []>} : vector<4x512xbf16>, vector<512x128xbf16>, vector<4x128xf32> -> vector<4x128xf32>
      %c0_38 = arith.constant 0 : index
      %c0_39 = arith.constant 0 : index
      %65 = vector.load %arg13[%c0_38, %c0_39] : memref<1x128xf32, #tpu.memory_space<vmem>>, vector<1x128xf32>
      %66 = vector.broadcast %65 : vector<1x128xf32> to vector<4x128xf32>
      %67 = arith.addf %64, %66 : vector<4x128xf32>
      %c0_40 = arith.constant 0 : index
      %c0_41 = arith.constant 0 : index
      %68 = vector.load %arg14[%c0_40, %c0_41] : memref<4x128xf32, #tpu.memory_space<vmem>>, vector<4x128xf32>
      tpu.vector_store %arg14[%c0_40, %c0_41], %67 {strides = array<i32>} : memref<4x128xf32, #tpu.memory_space<vmem>>, vector<4x128xf32>,
    } else {
    }
    return
  }
  func.func @transform_0(%arg0: i32) -> (i32, i32) {
    %c0_i32 = arith.constant 0 : i32
    %c0_i32_0 = arith.constant 0 : i32
    %c0_i32_1 = arith.constant 0 : i32
    return %c0_i32, %c0_i32_0 : i32, i32
  }
  func.func @transform_1(%arg0: i32) -> (i32, i32, i32) {
    %c0_i32 = arith.constant 0 : i32
    %c0_i32_0 = arith.constant 0 : i32
    %c0_i32_1 = arith.constant 0 : i32
    %c0_i32_2 = arith.constant 0 : i32
    return %c0_i32, %c0_i32_0, %c0_i32_1 : i32, i32, i32
  }
  func.func @transform_2(%arg0: i32) -> (i32, i32) {
    %c0_i32 = arith.constant 0 : i32
    %c0_i32_0 = arith.constant 0 : i32
    %c0_i32_1 = arith.constant 0 : i32
    return %c0_i32, %c0_i32_0 : i32, i32
  }
  func.func @transform_3(%arg0: i32) -> (i32, i32, i32) {
    %c0_i32 = arith.constant 0 : i32
    %c0_i32_0 = arith.constant 0 : i32
    %c0_i32_1 = arith.constant 0 : i32
    %c0_i32_2 = arith.constant 0 : i32
    return %c0_i32, %c0_i32_0, %c0_i32_1 : i32, i32, i32
  }
  func.func @transform_4(%arg0: i32) -> (i32, i32) {
    %c0_i32 = arith.constant 0 : i32
    %c0_i32_0 = arith.constant 0 : i32
    %c0_i32_1 = arith.constant 0 : i32
    return %c0_i32, %c0_i32_0 : i32, i32
  }
  func.func @transform_5(%arg0: i32) -> (i32, i32, i32) {
    %c0_i32 = arith.constant 0 : i32
    %c0_i32_0 = arith.constant 0 : i32
    %c0_i32_1 = arith.constant 0 : i32
    %c0_i32_2 = arith.constant 0 : i32
    return %c0_i32, %c0_i32_0, %c0_i32_1 : i32, i32, i32
  }
  func.func @transform_6(%arg0: i32) -> (i32, i32) {
    %c0_i32 = arith.constant 0 : i32
    %c0_i32_0 = arith.constant 0 : i32
    %c0_i32_1 = arith.constant 0 : i32
    return %c0_i32, %c0_i32_0 : i32, i32
  }
  func.func @transform_7(%arg0: i32) -> (i32, i32, i32) {
    %c0_i32 = arith.constant 0 : i32
    %c0_i32_0 = arith.constant 0 : i32
    %c0_i32_1 = arith.constant 0 : i32
    return %arg0, %c0_i32, %c0_i32_0 : i32, i32, i32
  }
  func.func @transform_8(%arg0: i32) -> (i32, i32) {
    %c0_i32 = arith.constant 0 : i32
    %c0_i32_0 = arith.constant 0 : i32
    %c0_i32_1 = arith.constant 0 : i32
    return %c0_i32, %c0_i32_0 : i32, i32
  }
  func.func @transform_9(%arg0: i32) -> (i32, i32) {
    %c0_i32 = arith.constant 0 : i32
    %c0_i32_0 = arith.constant 0 : i32
    %c0_i32_1 = arith.constant 0 : i32
    return %c0_i32, %c0_i32_0 : i32, i32
  }
  func.func @transform_10(%arg0: i32) -> (i32, i32) {
    %c0_i32 = arith.constant 0 : i32
    %c0_i32_0 = arith.constant 0 : i32
    %c0_i32_1 = arith.constant 0 : i32
    return %c0_i32, %c0_i32_0 : i32, i32
  }
  func.func @transform_11(%arg0: i32) -> (i32, i32) {
    %c0_i32 = arith.constant 0 : i32
    %c0_i32_0 = arith.constant 0 : i32
    %c0_i32_1 = arith.constant 0 : i32
    return %c0_i32, %c0_i32_0 : i32, i32
  }
  func.func @transform_12(%arg0: i32) -> (i32, i32) {
    %c0_i32 = arith.constant 0 : i32
    %c0_i32_0 = arith.constant 0 : i32
    %c0_i32_1 = arith.constant 0 : i32
    return %c0_i32, %c0_i32_0 : i32, i32
  }
  func.func @transform_13(%arg0: i32) -> (i32, i32) {
    %c0_i32 = arith.constant 0 : i32
    %c0_i32_0 = arith.constant 0 : i32
    %c0_i32_1 = arith.constant 0 : i32
    return %c0_i32, %c0_i32_0 : i32, i32
  }
}

</mosaic_0001>

<bundles_post_ra>
// kernel: siamese_forward.1
= control target key start
LH: loop header
LB: loop body
LE: loop exit
PB: predicated region body
PF: predicated region fallthrough
CT: control target
= control target key end

     0   :  { %s13008_s0 = inlined_call_operand.vmem [shape: f32[120,128], index: 0, kind: input, shape index: {}]   ;;  %s13009_s1 = inlined_call_operand.hbm [shape: bf16[3,128,128], index: 1, kind: input, shape index: {}]   ;;  %s13010_s2 = inlined_call_operand.hbm [shape: f32[3,128], index: 2, kind: input, shape index: {}]   ;;  %s13011_s3 = inlined_call_operand.hbm [shape: bf16[3,128,256], index: 3, kind: input, shape index: {}]   ;;  %s13012_s4 = inlined_call_operand.hbm [shape: f32[3,256], index: 4, kind: input, shape index: {}]   ;;  %s13013_s5 = inlined_call_operand.hbm [shape: bf16[3,256,256], index: 5, kind: input, shape index: {}]   ;;  %s13014_s6 = inlined_call_operand.hbm [shape: f32[3,256], index: 6, kind: input, shape index: {}]   ;;  %s13015_s7 = inlined_call_operand.hbm [shape: bf16[30,256,512], index: 7, kind: input, shape index: {}]   ;;  %s13016_s8 = inlined_call_operand.hbm [shape: f32[1,512], index: 8, kind: input, shape index: {}]   ;;  %s13017_s9 = inlined_call_operand.hbm [shape: bf16[512,512], index: 9, kind: input, shape index: {}]   ;;  %s13018_s10 = inlined_call_operand.hbm [shape: f32[1,512], index: 10, kind: input, shape index: {}]   ;;  %s13019_s11 = inlined_call_operand.hbm [shape: bf16[512,128], index: 11, kind: input, shape index: {}]   ;;  %s13020_s12 = inlined_call_operand.hbm [shape: f32[1,128], index: 12, kind: input, shape index: {}]   ;;  %s13021_s13 = inlined_call_operand.vmem [shape: f32[4,128], index: 13, kind: output, shape index: {}]  }
   0x1   :  { %13049 = sst [smem:[#allocation41_spill]] %s13009_s1 }
   0x2   :  { %13050 = sst [smem:[#allocation42_spill]] %s13010_s2 }
   0x3   :  { %13051 = sst [smem:[#allocation43_spill]] %s13011_s3 }
   0x4   :  { %18 = vsyncpa [#allocation5], 0 }
   0x5   :  { %19 = vsyncpa [#allocation7], 0 }
   0x6   :  { %20 = vsyncpa [#allocation10], 0 }
   0x7   :  { %21 = vsyncpa [#allocation13], 0 }
   0x8   :  { %22 = vsyncpa [#allocation19], 0  ;;  %s10927_s25 = smov 0   ;;  %s10929_s26 = smov 0  }
   0x9   :  { %s10931_s27 = smov 0   ;;  %s10933_s28 = smov 0  }
   0xa LB: > { %s10837_s29 = smov [#allocation6]   ;;  %s10948_s14 = sadd.s32 4294967295, %s10835_s28   ;;  %s10835_s28 = sphi %s10933_s28, %s13155_s28   ;;  %s10831_s27 = sphi %s10931_s27, %s13154_s27   ;;  %s10827_s26 = sphi %s10929_s26, %s13153_s26   ;;  %s10823_s25 = sphi %s10927_s25, %s13152_s25  }
   0xb   : > { %s361_s30 = sshll.u32 %s10837_s29, 4  ;;  %p7962_p0 = scmp.ge.s32.totalorder %s10835_s28, 1  ;;  %s362_s30 = int_to_ptr.vmem [resolvable:$true] %s361_s30 }
   0xc   : > { %p13022_p1 = scmp.eq.s32.totalorder %s10948_s14, 0  ;;  %p332_p2 = scmp.lt.s32.totalorder %s10835_s28, 6 }
   0xd   : > { %s10838_s16 = smov [#allocation9]   ;;  %s10839_s18 = smov [#allocation4]  }
   0xe   : > { %p10954_p4 = pnand %p7962_p0, %p332_p2  ;;  %s385_s17 = sshll.u32 %s10838_s16, 4  ;;  %s386_s17 = int_to_ptr.vmem [resolvable:$true] %s385_s17 }
   0xf   : > { %s347_s19 = sshll.u32 %s10839_s18, 4  ;;  %s10466_s22 = scalar_lea.vmem %s362_s30, 64  ;;  %s10966_s19 = int_to_ptr.vmem [resolvable:$true] %s347_s19 }
  0x10   : > { %s13052_s15 = scalar_select %p10954_p4, 1, 0 }
  0x11   : > { %p9303_p5 = pneg %p10954_p4  ;;  %p10467_p8 = scmp.ne.s32.totalorder %s362_s30, %s10466_s22 }
  0x12   : > { %p10474_p11 = scmp.lt.s32.totalorder %s362_s30, %s362_s30  ;;  %p10475_p12 = scmp.lt.s32.totalorder %s10466_s22, %s10466_s22 }
  0x13   : > { %p10962_p6 = pnand %p9303_p5, %p13022_p1 }
  0x14   : > { %p10476_p13 = por %p10475_p12, %p10474_p11 }
  0x15   : > { %p10970_p7 = pneg %p10962_p6 }
  0x17   : > { %p10469_p9 = pnand %p10467_p8, %p10970_p7 }
  0x19   : > { %p10470_p10 = pneg %p10469_p9 }
  0x1b   : > { %p10477_p0 = pnand %p10476_p13, %p10470_p10 }
  0x1d   : > { %10480 = shalt.err (!%p10477_p0)
}
  0x1e   : > { %s13055_s2 = sld [smem:[#allocation42_spill]]  ;;  %s10492_s29 = scalar_lea.vmem %s386_s17, 128 }
  0x1f   : > { %p10493_p2 = scmp.ne.s32.totalorder %s386_s17, %s10492_s29  ;;  %p10500_p1 = scmp.lt.s32.totalorder %s386_s17, %s386_s17 }
  0x20   : > { %p10501_p8 = scmp.lt.s32.totalorder %s10492_s29, %s10492_s29 }
  0x21   : > { %p10495_p5 = pnand %p10493_p2, %p10970_p7 }
  0x22   : > { %p10502_p9 = por %p10501_p8, %p10500_p1 }
  0x23   : > { %p10496_p3 = pneg %p10495_p5 }
  0x24   : > { %9309 = dma.hbm_to_vmem [thread:$0]  (!%p10962_p6), %s13055_s2, 64, %s362_s30, [#allocation7]  }
  0x25   : > { %p10503_p4 = pnand %p10502_p9, %p10496_p3 }
  0x27   : > { %10506 = shalt.err (!%p10503_p4)
}
  0x28   : > { %9315 = dma.hbm_to_vmem [thread:$0]  (!%p10962_p6), %s13012_s4, 128, %s386_s17, [#allocation10]  }
  0x29   : > { %s10518_s30 = scalar_lea.vmem %s10966_s19, 3072  ;;  %p10526_p13 = scmp.lt.s32.totalorder %s10966_s19, %s10966_s19 }
  0x2a   : > { %p10519_p10 = scmp.ne.s32.totalorder %s10966_s19, %s10518_s30  ;;  %p10527_p1 = scmp.lt.s32.totalorder %s10518_s30, %s10518_s30 }
  0x2c   : > { %p10521_p11 = pnand %p10519_p10, %p10970_p7  ;;  %p10528_p3 = por %p10527_p1, %p10526_p13 }
  0x2e   : > { %p10522_p12 = pneg %p10521_p11 }
  0x30   : > { %p10529_p4 = pnand %p10528_p3, %p10522_p12 }
  0x32   : > { %10532 = shalt.err (!%p10529_p4)
}
  0x33   : > { %s13024_s22 = smov 64   ;;  %s13025_s23 = smov 4  }
  0x34   : > { %s13056_s1 = sld [smem:[#allocation41_spill]]  ;;  %s10842_s29 = smov [#allocation8]  }
  0x35   : > { %s371_s16 = sshll.u32 %s10842_s29, 4  ;;  %s372_s16 = int_to_ptr.vmem [resolvable:$true] %s371_s16 }
  0x36   : > { %s10544_s18 = scalar_lea.vmem %s372_s16, 6144  ;;  %p10552_p8 = scmp.lt.s32.totalorder %s372_s16, %s372_s16 }
  0x37   : > { %p10545_p0 = scmp.ne.s32.totalorder %s372_s16, %s10544_s18  ;;  %p10553_p9 = scmp.lt.s32.totalorder %s10544_s18, %s10544_s18 }
  0x39   : > { %p10547_p2 = pnand %p10545_p0, %p10970_p7  ;;  %p10554_p10 = por %p10553_p9, %p10552_p8 }
  0x3a   : > { %9306 = dma.hbm_to_vmem [thread:$0]  (!%p10962_p6), %s13056_s1, 3072, %s10966_s19, [#allocation5], %s13024_s22, %s13024_s22, %s13025_s23  }
  0x3b   : > { %p10548_p5 = pneg %p10547_p2 }
  0x3d   : > { %p10555_p11 = pnand %p10554_p10, %p10548_p5 }
  0x3f   : > { %10558 = shalt.err (!%p10555_p11)
}
  0x40   : > { %s10843_s30 = smov 128   ;;  %s10844_s2 = smov 8  }
  0x41   : > { %s13057_s3 = sld [smem:[#allocation43_spill]]  ;;  %s10845_s24 = smov [#allocation11]  }
  0x42   : > { %s395_s29 = sshll.u32 %s10845_s24, 4  ;;  %s10846_s22 = smov [#allocation12]   ;;  %s396_s29 = int_to_ptr.vmem [resolvable:$true] %s395_s29 }
  0x43   : > { %s409_s23 = sshll.u32 %s10846_s22, 4  ;;  %s10570_s1 = scalar_lea.vmem %s396_s29, 12288  ;;  %s410_s23 = int_to_ptr.vmem [resolvable:$true] %s409_s23 }
  0x44   : > { %p10571_p12 = scmp.ne.s32.totalorder %s396_s29, %s10570_s1  ;;  %p10578_p3 = scmp.lt.s32.totalorder %s396_s29, %s396_s29 }
  0x45   : > { %p10579_p4 = scmp.lt.s32.totalorder %s10570_s1, %s10570_s1 }
  0x46   : > { %p10573_p13 = pnand %p10571_p12, %p10970_p7 }
  0x47   : > { %9312 = dma.hbm_to_vmem [thread:$0]  (!%p10962_p6), %s13057_s3, 6144, %s372_s16, [#allocation7], %s10843_s30, %s10843_s30, %s10844_s2  }
  0x48   : > { %p10574_p1 = pneg %p10573_p13  ;;  %p10580_p0 = por %p10579_p4, %p10578_p3 }
  0x4a   : > { %p10581_p2 = pnand %p10580_p0, %p10574_p1 }
  0x4c   : > { %10584 = shalt.err (!%p10581_p2)
}
  0x4d   : > { %9318 = dma.hbm_to_vmem [thread:$0]  (!%p10962_p6), %s13013_s5, 12288, %s396_s29, [#allocation10], %s10843_s30, %s10843_s30, %s10844_s2  }
  0x4e   : > { %s10596_s22 = scalar_lea.vmem %s410_s23, 128  ;;  %p10604_p10 = scmp.lt.s32.totalorder %s410_s23, %s410_s23 }
  0x4f   : > { %p10597_p5 = scmp.ne.s32.totalorder %s410_s23, %s10596_s22  ;;  %p10605_p11 = scmp.lt.s32.totalorder %s10596_s22, %s10596_s22 }
  0x51   : > { %p10599_p8 = pnand %p10597_p5, %p10970_p7  ;;  %p10606_p12 = por %p10605_p11, %p10604_p10 }
  0x53   : > { %p10600_p9 = pneg %p10599_p8 }
  0x55   : > { %p10607_p13 = pnand %p10606_p12, %p10600_p9 }
  0x57   : > { %10610 = shalt.err (!%p10607_p13)
}
  0x58   : > { %9321 = dma.hbm_to_vmem [thread:$0]  (!%p10962_p6), %s13014_s6, 128, %s410_s23, [#allocation13]  }
  0x59   : > { %s10847_s19 = smov [#allocation18]   ;;  %s10848_s2 = smov [#allocation15]  }
  0x5a   : > { %s454_s24 = sshll.u32 %s10847_s19, 4  ;;  %s420_s30 = sshll.u32 %s10848_s2, 4  ;;  %s455_s24 = int_to_ptr.vmem [resolvable:$true] %s454_s24  ;;  %s421_s30 = int_to_ptr.vmem [resolvable:$true] %s420_s30 }
  0x5b   : > { %s10622_s29 = scalar_lea.vmem %s455_s24, 4096  ;;  %p10630_p0 = scmp.lt.s32.totalorder %s455_s24, %s455_s24 }
  0x5c   : > { %p10623_p1 = scmp.ne.s32.totalorder %s455_s24, %s10622_s29  ;;  %p10631_p2 = scmp.lt.s32.totalorder %s10622_s29, %s10622_s29 }
  0x5e   : > { %p10625_p3 = pnand %p10623_p1, %p10970_p7  ;;  %p10632_p5 = por %p10631_p2, %p10630_p0 }
  0x60   : > { %p10626_p4 = pneg %p10625_p3 }
  0x62   : > { %p10633_p8 = pnand %p10632_p5, %p10626_p4 }
  0x64   : > { %10636 = shalt.err (!%p10633_p8)
}
  0x65   : > { %s13058_s18 = smov 4   ;;  %s13059_s23 = smov 64  }
  0x66   : > { %9333 = dma.hbm_to_vmem [thread:$0]  (!%p10962_p6), %s13019_s11, 4096, %s455_s24, [#allocation19], %s13059_s23, %s13059_s23, %s13058_s18  }
  0x67   : > { %s10648_s1 = scalar_lea.vmem %s421_s30, 64  ;;  %p10656_p12 = scmp.lt.s32.totalorder %s421_s30, %s421_s30 }
  0x68   : > { %p10649_p9 = scmp.ne.s32.totalorder %s421_s30, %s10648_s1  ;;  %p10657_p13 = scmp.lt.s32.totalorder %s10648_s1, %s10648_s1 }
  0x6a   : > { %p10651_p10 = pnand %p10649_p9, %p10970_p7  ;;  %p10658_p1 = por %p10657_p13, %p10656_p12 }
  0x6c   : > { %p10652_p11 = pneg %p10651_p10 }
  0x6e   : > { %p10659_p3 = pnand %p10658_p1, %p10652_p11 }
  0x70   : > { %10662 = shalt.err (!%p10659_p3)
}
  0x71   : > { %9324 = dma.hbm_to_vmem [thread:$0]  (!%p10962_p6), %s13016_s8, 64, %s421_s30, [#allocation7]  }
  0x72   : > { %s10849_s2 = smov [#allocation16]  }
  0x73   : > { %s430_s29 = sshll.u32 %s10849_s2, 4  ;;  %s431_s29 = int_to_ptr.vmem [resolvable:$true] %s430_s29 }
  0x74   : > { %s10674_s24 = scalar_lea.vmem %s431_s29, 16384  ;;  %p10682_p5 = scmp.lt.s32.totalorder %s431_s29, %s431_s29 }
  0x75   : > { %p10675_p4 = scmp.ne.s32.totalorder %s431_s29, %s10674_s24  ;;  %p10683_p8 = scmp.lt.s32.totalorder %s10674_s24, %s10674_s24 }
  0x77   : > { %p10677_p0 = pnand %p10675_p4, %p10970_p7  ;;  %p10684_p9 = por %p10683_p8, %p10682_p5 }
  0x79   : > { %p10678_p2 = pneg %p10677_p0 }
  0x7b   : > { %p10685_p10 = pnand %p10684_p9, %p10678_p2 }
  0x7d   : > { %10688 = shalt.err (!%p10685_p10)
}
  0x7e   : > { %s13026_s18 = smov 256   ;;  %s13027_s23 = smov 16  }
  0x7f   : > { %9327 = dma.hbm_to_vmem [thread:$0]  (!%p10962_p6), %s13017_s9, 16384, %s431_s29, [#allocation10], %s13026_s18, %s13026_s18, %s13027_s23  }
  0x80   : > { %s10852_s22 = smov [#allocation17]   ;;  %s10853_s17 = smov [#allocation20]  }
  0x81   : > { %s444_s1 = sshll.u32 %s10852_s22, 4  ;;  %s468_s19 = sshll.u32 %s10853_s17, 4  ;;  %s445_s1 = int_to_ptr.vmem [resolvable:$true] %s444_s1  ;;  %s469_s19 = int_to_ptr.vmem [resolvable:$true] %s468_s19 }
  0x82   : > { %s10700_s2 = scalar_lea.vmem %s445_s1, 64  ;;  %p10708_p1 = scmp.lt.s32.totalorder %s445_s1, %s445_s1 }
  0x83   : > { %p10701_p11 = scmp.ne.s32.totalorder %s445_s1, %s10700_s2  ;;  %p10709_p3 = scmp.lt.s32.totalorder %s10700_s2, %s10700_s2 }
  0x85   : > { %p10703_p12 = pnand %p10701_p11, %p10970_p7  ;;  %p10710_p4 = por %p10709_p3, %p10708_p1 }
  0x87   : > { %p10704_p13 = pneg %p10703_p12 }
  0x89   : > { %p10711_p0 = pnand %p10710_p4, %p10704_p13 }
  0x8b   : > { %10714 = shalt.err (!%p10711_p0)
}
  0x8c   : > { %9330 = dma.hbm_to_vmem [thread:$0]  (!%p10962_p6), %s13018_s10, 64, %s445_s1, [#allocation13]  }
  0x8d   : > { %s10726_s29 = scalar_lea.vmem %s469_s19, 16  ;;  %s10733_s16 = scalar_lea.vmem %s469_s19, 32 }
  0x8e   : > { %p10727_p2 = scmp.ne.s32.totalorder %s469_s19, %s10726_s29  ;;  %p10734_p9 = scmp.lt.s32.totalorder %s469_s19, %s469_s19 }
  0x8f   : > { %p10735_p10 = scmp.lt.s32.totalorder %s10733_s16, %s10726_s29 }
  0x90   : > { %p10729_p5 = pnand %p10727_p2, %p10970_p7 }
  0x91   : > { %p10736_p11 = por %p10735_p10, %p10734_p9 }
  0x92   : > { %p10730_p8 = pneg %p10729_p5 }
  0x94   : > { %p10737_p12 = pnand %p10736_p11, %p10730_p8 }
  0x96   : > { %10740 = shalt.err (!%p10737_p12)
}
  0x97   : > { %9336 = dma.hbm_to_vmem [thread:$0]  (!%p10962_p6), %s13020_s12, 16, %s469_s19, [#allocation19]  }
  0x98   : > { %s11066_s21 = sadd.s32 1, %s10835_s28   ;;  %s182_s1 = sadd.s32 1, %s10831_s27 }
  0x99   : > { %s179_s20 = ssub.s32 %s10835_s28, %s11066_s21  ;;  %p189_p13 = scmp.ne.s32.totalorder %s10831_s27, %s10827_s26 }
  0x9a   : > { %p180_p7 = scmp.eq.s32.totalorder %s179_s20, 0  ;;  %p190_p1 = scmp.eq.s32.totalorder %s10835_s28, 0 }
  0x9b   : > { %p195_p3 = scmp.ne.s32.totalorder %s10827_s26, %s10823_s25  ;;  %p13060_p0 = scmp.eq.s32.totalorder %s10948_s14, 0 }
  0x9c   : > { %s11077_s2 = scalar_select %p180_p7, %s10831_s27, %s182_s1  }
  0x9d   : > { %p191_p4 = por %p190_p1, %p189_p13  ;;  %p11081_p2 = por %p13060_p0, %p195_p3 }
  0x9e   : > { %p9352_p5 = scmp.lt.s32.totalorder %s10835_s28, 5  ;;  %s479_s19 = sand.u32 1, %s10835_s28  }
  0x9f   : > { %s13061_s24 = scalar_select %p11081_p2, 1, 0 }
  0xa0   : > { %s481_s30 = sand.u32 1, %s10831_s27   ;;  %p11088_p6 = pnand %p9352_p5, %p191_p4 }
  0xa1   : > { %s9255_s29 = smul.u32 3072, %s481_s30  ;;  %s11100_s23 = scalar_lea.sflag [#allocation5], %s479_s19 }
  0xa2   : > { %s9034_s22 = smul.u32 49152, %s10835_s28  ;;  %p10743_p9 = pneg %p11088_p6 }
  0xa3   : > { %s483_s1 = scalar_lea.vmem [#allocation14], %s9255_s29 }
  0xa4   : > { %s11096_s20 = scalar_lea.hbm %s13015_s7, %s9034_s22  ;;  %s491_s18 = sshll.u32 %s483_s1, 4  ;;  %s11098_s18 = int_to_ptr.vmem [resolvable:$true] %s491_s18 }
  0xa5   : > { %s10741_s30 = scalar_lea.hbm %s11096_s20, 49152  ;;  %s10746_s22 = scalar_lea.hbm %s13015_s7, 245760 }
  0xa6   : > { %p10742_p8 = scmp.ne.s32.totalorder %s11096_s20, %s10741_s30  ;;  %p10747_p12 = scmp.lt.s32.totalorder %s11096_s20, %s13015_s7 }
  0xa7   : > { %p10748_p7 = scmp.lt.s32.totalorder %s10746_s22, %s10741_s30 }
  0xa8   : > { %p10744_p10 = pnand %p10743_p9, %p10742_p8 }
  0xa9   : > { %p10749_p13 = por %p10748_p7, %p10747_p12 }
  0xaa   : > { %p10745_p11 = pneg %p10744_p10 }
  0xac   : > { %p10750_p1 = pnand %p10749_p13, %p10745_p11 }
  0xae   : > { %10753 = shalt.err (!%p10750_p1)
}
  0xaf   : > { %s10754_s19 = scalar_lea.vmem %s11098_s18, 49152  ;;  %s10854_s29 = smov [#allocation14]  }
  0xb0   : > { %p10755_p3 = scmp.ne.s32.totalorder %s11098_s18, %s10754_s19  ;;  %s10759_s1 = sshll.u32 %s10854_s29, 4  ;;  %s10760_s1 = int_to_ptr.vmem [resolvable:$false] %s10759_s1 }
  0xb1   : > { %s10761_s3 = scalar_lea.vmem %s10760_s1, 98304  ;;  %p10762_p5 = scmp.lt.s32.totalorder %s11098_s18, %s10760_s1 }
  0xb2   : > { %p10757_p4 = pnand %p10755_p3, %p10743_p9  ;;  %p10763_p8 = scmp.lt.s32.totalorder %s10761_s3, %s10754_s19 }
  0xb4   : > { %p10758_p0 = pneg %p10757_p4  ;;  %p10764_p10 = por %p10763_p8, %p10762_p5 }
  0xb6   : > { %p10765_p2 = pnand %p10764_p10, %p10758_p0 }
  0xb8   : > { %10768 = shalt.err (!%p10765_p2)
}
  0xb9   : > { %s13063_s30 = smov 16   ;;  %s13064_s28 = smov 256  }
  0xba   : > { %9340 = dma.hbm_to_vmem [thread:$0]  (!%p11088_p6), %s11096_s20, 49152, %s11098_s18, %s11100_s23, %s13064_s28, %s13064_s28, %s13063_s30  }
  0xbb   : > { %p13065_p9 = scmp.ne.s32.totalorder %s13052_s15, 0 }
  0xbc   : > { %p13066_p11 = scmp.eq.s32.totalorder (!%p13065_p9), %s10948_s14, 0 }
  0xbd   : > { %503 = sbr.rel (%p13065_p9) target bundleno = 2233 (0x8b9), region = 72 }
  0xc2   : > { %10786 = dma.done.wait (%p13066_p11), [#allocation5], 3072   ;;  %p13067_p12 = pmov %p13066_p11 }
  0xc3   : > { %p13068_p2 = pmov %p13066_p11 }
  0xc4   : > { %10788 = vsyncadd (%p13067_p12), [#allocation5], 4294964224 }
  0xc5   : > { %10790 = dma.done.wait (%p13068_p2), [#allocation7], 6208   ;;  %p13069_p7 = pmov %p13068_p2 }
  0xc6   : > { %p13070_p13 = pmov %p13068_p2 }
  0xc7   : > { %10792 = vsyncadd (%p13069_p7), [#allocation7], 4294961088 }
  0xc8   : > { %10794 = dma.done.wait (%p13070_p13), [#allocation10], 12416   ;;  %p13071_p6 = pmov %p13068_p2 }
  0xc9   : > { %p13072_p1 = pmov %p13068_p2 }
  0xca   : > { %10796 = vsyncadd (%p13071_p6), [#allocation10], 4294954880 }
  0xcb   : > { %10798 = dma.done.wait (%p13072_p1), [#allocation13], 128   ;;  %p13073_p3 = pmov %p13072_p1 }
  0xcc   : > { %s529_s15 = sand.u32 1, %s10948_s14   ;;  %s531_s18 = sand.u32 1, %s10827_s26  }
  0xcd   : > { %10800 = vsyncadd (%p13073_p3), [#allocation13], 4294967168  ;;  %s9256_s23 = smul.u32 3072, %s531_s18  ;;  %s530_s16 = scalar_lea.sflag [#allocation5], %s529_s15 }
  0xce   : > { %p13074_p4 = scmp.ne.s32.totalorder %s13061_s24, 0 }
  0xcf   : > { %s11144_s20 = scalar_lea.vmem [#allocation14], %s9256_s23 }
  0xd0   : > { %10802 = dma.done.wait (%p13074_p4), %s530_s16, 49152  }
  0xd1   : > { %10804 = vsyncadd (%p13074_p4), %s530_s16, 4294918144  ;;  %p13075_p0 = pmov %p13072_p1 }
  0xd3   : > { %10806 = dma.done.wait (%p13075_p0), [#allocation7], 64   ;;  %p13076_p5 = pmov %p13075_p0 }
  0xd4   : > { %p13077_p8 = pmov %p13075_p0 }
  0xd5   : > { %10808 = vsyncadd (%p13076_p5), [#allocation7], 4294967232 }
  0xd6   : > { %10810 = dma.done.wait (%p13077_p8), [#allocation10], 16384   ;;  %p13078_p10 = pmov %p13075_p0 }
  0xd7   : > { %p13079_p9 = pmov %p13075_p0 }
  0xd8   : > { %10812 = vsyncadd (%p13078_p10), [#allocation10], 4294950912 }
  0xd9   : > { %10814 = dma.done.wait (%p13079_p9), [#allocation13], 64   ;;  %p13080_p11 = pmov %p13075_p0 }
  0xda   : > { %p13081_p12 = pmov %p13075_p0 }
  0xdb   : > { %10816 = vsyncadd (%p13080_p11), [#allocation13], 4294967232 }
  0xdc   : > { %10818 = dma.done.wait (%p13081_p12), [#allocation19], 4112   ;;  %p13082_p2 = pmov %p13075_p0 }
  0xdd   : > { %p13083_p7 = scmp.ne.s32.totalorder %s10948_s14, 0 }
  0xde   : > { %10820 = vsyncadd (%p13082_p2), [#allocation19], 4294963184 }
  0xdf   : > { %596 = sbr.rel (%p13083_p7) target bundleno = 1115 (0x45b), region = 124 }
  0xe4   : > { %v9415_v0 = vld [vmem:[#allocation4 + $0x78] sm:$0xff]   ;;  %v10855_v1 = vmov 0.0   ;;  %v9417_v3 = vld [vmem:[#allocation4 + $0x70] sm:$0xff]   ;;  %v9419_v5 = vld [vmem:[#allocation4 + $0x68] sm:$0xff]   ;;  %v599_v8 = vlaneseq }
  0xe5   : > { %597 = vst [vmem:[#allocation3] sm:$0xff] %v10855_v1  ;;  %598 = vst [vmem:[#allocation3 + $0x8] sm:$0xff] %v10855_v1  ;;  %v9416_v2 = vld [vmem:[#allocation4 + $0x38] sm:$0xff]   ;;  %9127 = vmatprep.subr.bf16.mxu0 %v9415_v0  ;;  %v9418_v4 = vld [vmem:[#allocation4 + $0x30] sm:$0xff]  }
  0xe6   : > { %9159 = vmatprep.subr.bf16.mxu1 %v9416_v2  ;;  %9128 = vmatpush3.bf16.msra.mxu0 %v9415_v0  ;;  %v9420_v6 = vld [vmem:[#allocation4 + $0x28] sm:$0xff]   ;;  %v9421_v7 = vld [vmem:[#allocation4 + $0x60] sm:$0xff]   ;;  %v9423_v10 = vld [vmem:[#allocation4 + $0x58] sm:$0xff]   ;;  %v11168_v11 = vshrl.u32 %v599_v8, 7 }
  0xe7   : > { %9160 = vmatpush3.bf16.msra.mxu1 %v9416_v2  ;;  %9129 = vmatprep.subr.bf16.mxu0 %v9417_v3  ;;  %v9422_v9 = vld [vmem:[#allocation4 + $0x20] sm:$0xff]   ;;  %v9424_v12 = vld [vmem:[#allocation4 + $0x18] sm:$0xff]   ;;  %v9425_v13 = vld [vmem:[#allocation4 + $0x50] sm:$0xff]  }
  0xe8   : > { %9161 = vmatprep.subr.bf16.mxu1 %v9418_v4  ;;  %v645_v14 = vld [vmem:[%s13008_s0] sm:$0xff]  ;;  %v646_v15 = vld [vmem:[%s13008_s0 + $0x8] sm:$0xff]  ;;  %vm615_vm0 = vcmp.lt.s32.totalorder %v11168_v11, 4  ;;  %v11180_v16 = vld [vmem:[%s13008_s0 + $0x70] sm:$0xff] }
  0xe9   : > { %v9426_v17 = vld [vmem:[#allocation4 + $0x10] sm:$0xff]   ;;  %v660_v18 = vrot.slane %v645_v14, 4  ;;  %v661_v19 = vrot.slane %v646_v15, 4  ;;  %v804_v20 = vpack.c.bf16 %v646_v15, %v645_v14  ;;  %v674_v21 = vrot.slane %v11180_v16, 4  ;;  %v9427_v24 = vld [vmem:[#allocation4 + $0x48] sm:$0xff]   ;;  %v648_v29 = vld [vmem:[%s13008_s0 + $0x18] sm:$0xff] }
  0xea   : > { %9130 = vmatpush3.bf16.msra.mxu0 %v9417_v3  ;;  %v9428_v25 = vld [vmem:[#allocation4 + $0x8] sm:$0xff]   ;;  %v647_v28 = vld [vmem:[%s13008_s0 + $0x10] sm:$0xff]  ;;  %v649_v30 = vld [vmem:[%s13008_s0 + $0x20] sm:$0xff]  ;;  %v663_v34 = vrot.slane %v648_v29, 4 }
  0xeb   : > { %9162 = vmatpush3.bf16.msra.mxu1 %v9418_v4  ;;  %9131 = vmatprep.subr.bf16.mxu0 %v9419_v5  ;;  %v11185_v22 = vsel %vm615_vm0, %v660_v18, %v661_v19  ;;  %v11191_v23 = vsel %vm615_vm0, %v674_v21, %v660_v18  ;;  %v650_v31 = vld [vmem:[%s13008_s0 + $0x28] sm:$0xff]  ;;  %v9429_v32 = vld [vmem:[#allocation4 + $0x40] sm:$0xff]   ;;  %v662_v33 = vrot.slane %v647_v28, 4  ;;  %v664_v36 = vrot.slane %v649_v30, 4  ;;  %v9431_v38 = vld [vmem:[#allocation4 + $0xb8] sm:$0xff]  }
  0xec   : > { %9163 = vmatprep.subr.bf16.mxu1 %v9420_v6  ;;  %9143 = vmatprep.mubr.bf16.mxu0 %v804_v20  ;;  %v720_v26 = vsel %vm615_vm0, %v11185_v22, %v11191_v23  ;;  %v9430_v35 = vld [vmem:[#allocation4] sm:$0xff]   ;;  %v665_v37 = vrot.slane %v650_v31, 4  ;;  %v651_v39 = vld [vmem:[%s13008_s0 + $0x30] sm:$0xff]  ;;  %v652_v42 = vld [vmem:[%s13008_s0 + $0x38] sm:$0xff]  ;;  %v805_v44 = vpack.c.bf16 %v648_v29, %v647_v28  ;;  %v806_v50 = vpack.c.bf16 %v650_v31, %v649_v30 }
  0xed   : > { %v780_v27 = vpack.c.bf16 %v11185_v22, %v720_v26  ;;  %v11215_v40 = vsel %vm615_vm0, %v662_v33, %v663_v34  ;;  %v11219_v41 = vsel %vm615_vm0, %v661_v19, %v662_v33  ;;  %v653_v43 = vld [vmem:[%s13008_s0 + $0x40] sm:$0xff]  ;;  %v9432_v45 = vld [vmem:[#allocation4 + $0xb0] sm:$0xff]   ;;  %v11233_v47 = vsel %vm615_vm0, %v663_v34, %v664_v36  ;;  %v654_v48 = vld [vmem:[%s13008_s0 + $0x48] sm:$0xff] }
  0xee   : > { %9132 = vmatpush3.bf16.msra.mxu0 %v9419_v5  ;;  %v11229_v46 = vsel %vm615_vm0, %v664_v36, %v665_v37  ;;  %v781_v49 = vpack.c.bf16 %v11215_v40, %v11219_v41  ;;  %v666_v51 = vrot.slane %v651_v39, 4  ;;  %v667_v52 = vrot.slane %v652_v42, 4  ;;  %v9433_v54 = vld [vmem:[#allocation4 + $0xa8] sm:$0xff]   ;;  %v655_v57 = vld [vmem:[%s13008_s0 + $0x50] sm:$0xff]  ;;  %v656_v58 = vld [vmem:[%s13008_s0 + $0x58] sm:$0xff] }
  0xef   : > { %9164 = vmatpush3.bf16.msra.mxu1 %v9420_v6  ;;  %9133 = vmatprep.subr.bf16.mxu0 %v9421_v7  ;;  %v782_v53 = vpack.c.bf16 %v11229_v46, %v11233_v47  ;;  %v668_v55 = vrot.slane %v653_v43, 4  ;;  %v669_v56 = vrot.slane %v654_v48, 4  ;;  %v657_v61 = vld [vmem:[%s13008_s0 + $0x60] sm:$0xff]  ;;  %v658_v62 = vld [vmem:[%s13008_s0 + $0x68] sm:$0xff]  ;;  %v807_v63 = vpack.c.bf16 %v652_v42, %v651_v39  ;;  %v9435_v8 = vld [vmem:[#allocation4 + $0x98] sm:$0xff]  }
  0xf0   : > { %9165 = vmatprep.subr.bf16.mxu1 %v9422_v9  ;;  %9175 = vmatprep.mubr.bf16.mxu1 %v780_v27  ;;  %v682_v59 = vsel %vm615_vm0, %v666_v51, %v667_v52  ;;  %v683_v60 = vsel %vm615_vm0, %v665_v37, %v666_v51  ;;  %v9434_v0 = vld [vmem:[#allocation4 + $0xa0] sm:$0xff]   ;;  %v808_v4 = vpack.c.bf16 %v654_v48, %v653_v43  ;;  %v670_v5 = vrot.slane %v655_v57, 4  ;;  %v9436_v15 = vld [vmem:[#allocation4 + $0x90] sm:$0xff]  }
  0xf1   : > { %v680_v1 = vsel %vm615_vm0, %v668_v55, %v669_v56  ;;  %v681_v2 = vsel %vm615_vm0, %v667_v52, %v668_v55  ;;  %v783_v3 = vpack.c.bf16 %v682_v59, %v683_v60  ;;  %v671_v6 = vrot.slane %v656_v58, 4  ;;  %v9438_v28 = vld [vmem:[#allocation4 + $0x80] sm:$0xff]   ;;  %v9444_v39 = vld [vmem:[#allocation8 + $0xe4] ss:$8 sps:$4 sm:$0xff]   ;;  %v9445_v42 = vld [vmem:[#allocation8 + $0xd0] ss:$8 sps:$4 sm:$0xff]  }
  0xf2   : > { %9134 = vmatpush3.bf16.msra.mxu0 %v9421_v7  ;;  %v784_v7 = vpack.c.bf16 %v680_v1, %v681_v2  ;;  %v809_v14 = vpack.c.bf16 %v656_v58, %v655_v57  ;;  %v810_v20 = vpack.c.bf16 %v658_v62, %v657_v61  ;;  %v811_v27 = vpack.c.bf16 %v11180_v16, %v11180_v16  ;;  %v9441_v37 = vld [vmem:[#allocation8 + $0xf4] ss:$8 sps:$4 sm:$0xff]   ;;  %v9450_v43 = vld [vmem:[#allocation8 + $0xc4] ss:$8 sps:$4 sm:$0xff]   ;;  %v9460_v51 = vld [vmem:[#allocation8 + $0x90] ss:$8 sps:$4 sm:$0xff]  }
  0xf3   : > { %9166 = vmatpush3.bf16.msra.mxu1 %v9422_v9  ;;  %9135 = vmatprep.subr.bf16.mxu0 %v9423_v10  ;;  %v672_v9 = vrot.slane %v657_v61, 4  ;;  %v1117_v30 = vpack.c.bf16 %v11219_v41, %v11185_v22  ;;  %v1118_v31 = vpack.c.bf16 %v11233_v47, %v11215_v40  ;;  %v1120_v16 = vpack.c.bf16 %v681_v2, %v682_v59  ;;  %v9442_v40 = vld [vmem:[#allocation8 + $0xe0] ss:$8 sps:$4 sm:$0xff]   ;;  %v9447_v41 = vld [vmem:[#allocation8 + $0xd4] ss:$8 sps:$4 sm:$0xff]  }
  0xf4   : > { %9167 = vmatprep.subr.bf16.mxu1 %v9424_v12  ;;  %v11282_v33 = vadd.s32 112, %v11168_v11  ;;  %v9454_v47 = vld [vmem:[#allocation8 + $0xa0] ss:$8 sps:$4 sm:$0xff]   ;;  %v9459_v48 = vld [vmem:[#allocation8 + $0x74] ss:$8 sps:$4 sm:$0xff]   ;;  %v10856_v58 = vmov 0  }
  0xf5   : > { %v677_v18 = vsel %vm615_vm0, %v671_v6, %v672_v9  ;;  %v9465_v52 = vld [vmem:[#allocation8 + $0x64] ss:$8 sps:$4 sm:$0xff]   ;;  %v9466_v55 = vld [vmem:[#allocation8 + $0x80] ss:$8 sps:$4 sm:$0xff]   ;;  %v9469_v57 = vld [vmem:[#allocation8 + $0x50] ss:$8 sps:$4 sm:$0xff]  }
  0xf6   : > { %9136 = vmatpush3.bf16.msra.mxu0 %v9423_v10  ;;  %v673_v10 = vrot.slane %v658_v62, 4  ;;  %13084 = vst [vmem:[#allocation30_spill] sm:$0xff] %v11282_v33  ;;  %vm644_vm1 = vcmp.ge.s32.totalorder %v11282_v33, 116  ;;  %v9477_v59 = vld [vmem:[#allocation8 + $0x44] ss:$8 sps:$4 sm:$0xff]  }
  0xf7   : > { %9168 = vmatpush3.bf16.msra.mxu1 %v9424_v12  ;;  %9137 = vmatprep.subr.bf16.mxu0 %v9425_v13  ;;  %v678_v12 = vsel %vm615_vm0, %v670_v5, %v671_v6  ;;  %v9480_v61 = vld [vmem:[#allocation8 + $0x34] ss:$8 sps:$4 sm:$0xff]   ;;  %v2229_v33 = vld [vmem:[#allocation9 + $0x2] ss:$4 sm:$0x3] }
  0xf8   : > { %9169 = vmatprep.subr.bf16.mxu1 %v9426_v17  ;;  %v675_v26 = vsel %vm615_vm0, %v673_v10, %v674_v21  ;;  %v1119_v21 = vpack.c.bf16 %v683_v60, %v11229_v46  ;;  %v1122_v22 = vpack.c.bf16 %v677_v18, %v678_v12  ;;  %v9456_v46 = vld [vmem:[#allocation8 + $0xa4] ss:$8 sps:$4 sm:$0xff]   ;;  %v9475_v60 = vld [vmem:[#allocation8 + $0x40] ss:$8 sps:$4 sm:$0xff]   ;;  %v9474_v62 = vld [vmem:[#allocation8 + $0x174] ss:$8 sps:$4 sm:$0xff]  }
  0xf9   : > { %v787_v29 = vpack.c.bf16 %v675_v26, %v675_v26  ;;  %v9489_v2 = vld [vmem:[#allocation8 + $0x14] ss:$8 sps:$4 sm:$0xff]  }
  0xfa   : > { %9138 = vmatpush3.bf16.msra.mxu0 %v9425_v13  ;;  %v679_v13 = vsel %vm615_vm0, %v669_v56, %v670_v5  ;;  %v9471_v56 = vld [vmem:[#allocation8 + $0x54] ss:$8 sps:$4 sm:$0xff]   ;;  %v9493_v5 = vld [vmem:[#allocation8] ss:$8 sps:$4 sm:$0xff]  }
  0xfb   : > { %9170 = vmatpush3.bf16.msra.mxu1 %v9426_v17  ;;  %9139 = vmatprep.subr.bf16.mxu0 %v9427_v24  ;;  %v676_v17 = vsel %vm615_vm0, %v672_v9, %v673_v10  ;;  %v785_v19 = vpack.c.bf16 %v678_v12, %v679_v13 }
  0xfc   : > { %9171 = vmatprep.subr.bf16.mxu1 %v9428_v25  ;;  %v1123_v34 = vpack.c.bf16 %v675_v26, %v676_v17 }
  0xfe   : > { %9140 = vmatpush3.bf16.msra.mxu0 %v9427_v24  ;;  %v786_v24 = vpack.c.bf16 %v676_v17, %v677_v18 }
  0xff   : > { %9172 = vmatpush3.bf16.msra.mxu1 %v9428_v25  ;;  %9141 = vmatprep.subr.bf16.mxu0 %v9429_v32  ;;  %v9437_v25 = vld [vmem:[#allocation4 + $0x88] sm:$0xff]  }
 0x100   : > { %9173 = vmatprep.subr.bf16.mxu1 %v9430_v35 }
 0x102   : > { %9142 = vmatpush3.bf16.msra.mxu0 %v9429_v32  ;;  %v1121_v32 = vpack.c.bf16 %v679_v13, %v680_v1  ;;  %v9484_v1 = vld [vmem:[#allocation8 + $0x20] ss:$8 sps:$4 sm:$0xff]  }
 0x103   : > { %9174 = vmatpush3.bf16.msra.mxu1 %v9430_v35  ;;  %9191 = vmatprep.subr.bf16.mxu0 %v9431_v38  ;;  %v779_v35 = vsel %vm644_vm1, %v675_v26, %v11191_v23  ;;  %v9451_v23 = vld [vmem:[#allocation8 + $0xb0] ss:$8 sps:$4 sm:$0xff]  }
 0x104   : > { %v1124_v36 = vpack.c.bf16 %v779_v35, %v779_v35  ;;  %1565 = vmatprep.subr.bf16.mxu1 %v9441_v37 }
 0x105   : > { %9144 = vmatmul.mubr.bf16.vlgmr.msra.gmra.mxu0 %v805_v44  ;;  %v9448_v44 = vld [vmem:[#allocation8 + $0xc0] ss:$8 sps:$4 sm:$0xff]  }
 0x106   : > { %9176 = vmatmul.mubr.bf16.vlgmr.msra.gmra.mxu1 %v781_v49  ;;  %9192 = vmatpush3.bf16.msra.mxu0 %v9431_v38  ;;  %v9439_v38 = vld [vmem:[#allocation8 + $0xf0] ss:$8 sps:$4 sm:$0xff]  }
 0x107   : > { %9193 = vmatprep.subr.bf16.mxu0 %v9432_v45  ;;  %9147 = vmatprep.mubr.bf16.mxu0 %v806_v50  ;;  %v9457_v49 = vld [vmem:[#allocation8 + $0x70] ss:$8 sps:$4 sm:$0xff]   ;;  %v9462_v50 = vld [vmem:[#allocation8 + $0x94] ss:$8 sps:$4 sm:$0xff]  }
 0x108   : > { %9179 = vmatprep.mubr.bf16.mxu1 %v782_v53  ;;  %1566 = vmatpush1.bf16.msra.mxu1 %v9439_v38  ;;  %v9463_v53 = vld [vmem:[#allocation8 + $0x60] ss:$8 sps:$4 sm:$0xff]  }
 0x109   : > { %1567 = vmatprep.subr.bf16.mxu1 %v9444_v39 }
 0x10a   : > { %9194 = vmatpush3.bf16.msra.mxu0 %v9432_v45  ;;  %v9453_v45 = vld [vmem:[#allocation8 + $0xb4] ss:$8 sps:$4 sm:$0xff]  }
 0x10b   : > { %9195 = vmatprep.subr.bf16.mxu0 %v9433_v54 }
 0x10c   : > { %1568 = vmatpush1.bf16.msra.mxu1 %v9442_v40 }
 0x10d   : > { %9148 = vmatmul.mubr.bf16.gmra.mxu0 %v807_v63  ;;  %1569 = vmatprep.subr.bf16.mxu1 %v9447_v41  ;;  %v9478_v63 = vld [vmem:[#allocation8 + $0x30] ss:$8 sps:$4 sm:$0xff]  }
 0x10e   : > { %9180 = vmatmul.mubr.bf16.gmra.mxu1 %v783_v3  ;;  %9196 = vmatpush3.bf16.msra.mxu0 %v9433_v54  ;;  %v9468_v54 = vld [vmem:[#allocation8 + $0x84] ss:$8 sps:$4 sm:$0xff]   ;;  %v9487_v3 = vld [vmem:[#allocation8 + $0x10] ss:$8 sps:$4 sm:$0xff]  }
 0x10f   : > { %9197 = vmatprep.subr.bf16.mxu0 %v9434_v0  ;;  %9151 = vmatprep.mubr.bf16.mxu0 %v808_v4  ;;  %v9495_v4 = vld [vmem:[#allocation8 + $0x4] ss:$8 sps:$4 sm:$0xff]  }
 0x110   : > { %9183 = vmatprep.mubr.bf16.mxu1 %v784_v7  ;;  %1570 = vmatpush1.bf16.msra.mxu1 %v9445_v42 }
 0x111   : > { %1571 = vmatprep.subr.bf16.mxu1 %v9450_v43 }
 0x112   : > { %9198 = vmatpush3.bf16.msra.mxu0 %v9434_v0  ;;  %v9486_v0 = vld [vmem:[#allocation8 + $0x24] ss:$8 sps:$4 sm:$0xff]  }
 0x113   : > { %9199 = vmatprep.subr.bf16.mxu0 %v9435_v8 }
 0x114   : > { %1572 = vmatpush1.bf16.msra.mxu1 %v9448_v44 }
 0x115   : > { %9152 = vmatmul.mubr.bf16.gmra.mxu0 %v809_v14  ;;  %1573 = vmatprep.subr.bf16.mxu1 %v9453_v45 }
 0x116   : > { %9184 = vmatmul.mubr.bf16.gmra.mxu1 %v785_v19  ;;  %9200 = vmatpush3.bf16.msra.mxu0 %v9435_v8 }
 0x117   : > { %9201 = vmatprep.subr.bf16.mxu0 %v9436_v15  ;;  %9155 = vmatprep.mubr.bf16.mxu0 %v810_v20 }
 0x118   : > { %9187 = vmatprep.mubr.bf16.mxu1 %v786_v24  ;;  %1574 = vmatpush1.bf16.msra.mxu1 %v9451_v23  ;;  %v11320_v23 = vld [vmem:[#allocation6] ss:$0 sm:$0xff] }
 0x119   : > { %1575 = vmatprep.subr.bf16.mxu1 %v9456_v46 }
 0x11a   : > { %9202 = vmatpush3.bf16.msra.mxu0 %v9436_v15 }
 0x11b   : > { %9203 = vmatprep.subr.bf16.mxu0 %v9437_v25 }
 0x11c   : > { %1576 = vmatpush1.bf16.msra.mxu1 %v9454_v47 }
 0x11d   : > { %9156 = vmatmul.mubr.bf16.gmra.mxu0 %v811_v27  ;;  %1577 = vmatprep.subr.bf16.mxu1 %v9462_v50 }
 0x11e   : > { %9188 = vmatmul.mubr.bf16.gmra.mxu1 %v787_v29  ;;  %9204 = vmatpush3.bf16.msra.mxu0 %v9437_v25 }
 0x11f   : > { %9205 = vmatprep.subr.bf16.mxu0 %v9438_v28  ;;  %9207 = vmatprep.mubr.bf16.mxu0 %v1117_v30 }
 0x120   : > { %1578 = vmatpush1.bf16.msra.mxu1 %v9460_v51  ;;  %1597 = vmatprep.mubr.bf16.mxu1 %v10856_v58 }
 0x121   : > { %1579 = vmatprep.subr.bf16.mxu1 %v9468_v54 }
 0x122   : > { %9206 = vmatpush3.bf16.msra.mxu0 %v9438_v28 }
 0x123   : > { %1756 = vmatprep.subr.bf16.mxu0 %v9459_v48 }
 0x124   : > { %1580 = vmatpush1.bf16.msra.mxu1 %v9466_v55 }
 0x125   : > { %9208 = vmatmul.mubr.bf16.vlgmr.msra.gmra.mxu0 %v1118_v31  ;;  %1972 = vmatprep.subr.bf16.mxu1 %v9474_v62 }
 0x126   : > { %9211 = vmatprep.mubr.bf16.mxu0 %v1119_v21  ;;  %1757 = vmatpush1.bf16.msra.mxu0 %v9457_v49 }
 0x127   : > { %1758 = vmatprep.subr.bf16.mxu0 %v9465_v52 }
 0x12a   : > { %1759 = vmatpush1.bf16.msra.mxu0 %v9463_v53 }
 0x12b   : > { %1760 = vmatprep.subr.bf16.mxu0 %v9471_v56 }
 0x12d   : > { %9212 = vmatmul.mubr.bf16.gmra.mxu0 %v1120_v16 }
 0x12e   : > { %9215 = vmatprep.mubr.bf16.mxu0 %v1121_v32  ;;  %1761 = vmatpush1.bf16.msra.mxu0 %v9469_v57 }
 0x12f   : > { %1762 = vmatprep.subr.bf16.mxu0 %v9477_v59  ;;  %v11326_v59 = vld [vmem:[#allocation6 + $0x1] ss:$0 sm:$0xff] }
 0x132   : > { %1763 = vmatpush1.bf16.msra.mxu0 %v9475_v60 }
 0x133   : > { %1764 = vmatprep.subr.bf16.mxu0 %v9480_v61 }
 0x135   : > { %9216 = vmatmul.mubr.bf16.gmra.mxu0 %v1122_v22 }
 0x136   : > { %9219 = vmatprep.mubr.bf16.mxu0 %v1123_v34  ;;  %1765 = vmatpush1.bf16.msra.mxu0 %v9478_v63 }
 0x137   : > { %1766 = vmatprep.subr.bf16.mxu0 %v9486_v0 }
 0x13a   : > { %1767 = vmatpush1.bf16.msra.mxu0 %v9484_v1 }
 0x13b   : > { %1768 = vmatprep.subr.bf16.mxu0 %v9489_v2 }
 0x13d   : > { %9220 = vmatmul.mubr.bf16.gmra.mxu0 %v1124_v36 }
 0x13e   : > { %1788 = vmatprep.mubr.bf16.mxu0 %v10856_v58  ;;  %1769 = vmatpush1.bf16.msra.mxu0 %v9487_v3 }
 0x13f   : > { %1770 = vmatprep.subr.bf16.mxu0 %v9495_v4 }
 0x142   : > { %1771 = vmatpush1.bf16.msra.mxu0 %v9493_v5  ;;  %v11330_v5 = vld [vmem:[#allocation6 + $0x2] ss:$0 sm:$0xff] }
 0x1c5   : > { %v9145_v6 = vpop.f32.mrf.mxu0 }
 0x1c6   : > { %v9177_v7 = vpop.f32.mrf.mxu1 }
 0x1c7   : > { %v911_v8 = vpop.f32.mrf.mxu0  ;;  %v1064_v45 = vadd.f32 %v9177_v7, %v9145_v6 }
 0x1c8   : > { %v1055_v9 = vpop.f32.mrf.mxu1 }
 0x1c9   : > { %v9146_v10 = vpop.f32.mrf.mxu0  ;;  %v1056_v41 = vadd.f32 %v1055_v9, %v911_v8 }
 0x1ca   : > { %v9178_v12 = vpop.f32.mrf.mxu1 }
 0x1cb   : > { %v914_v13 = vpop.f32.mrf.mxu0  ;;  %v1067_v43 = vadd.f32 %v9178_v12, %v9146_v10 }
 0x1cc   : > { %v1058_v14 = vpop.f32.mrf.mxu1 }
 0x1cd   : > { %v11290_v15 = vpop.f32.mrf.mxu0  ;;  %v1059_v47 = vadd.f32 %v1058_v14, %v914_v13  ;;  %v9472_v13 = vld [vmem:[#allocation8 + $0x170] ss:$8 sps:$4 sm:$0xff]  }
 0x1ce   : > { %v11292_v17 = vpop.f32.mrf.mxu1 }
 0x1cf   : > { %v927_v18 = vpop.f32.mrf.mxu0 }
 0x1d0   : > { %v1071_v19 = vpop.f32.mrf.mxu1 }
 0x1d1   : > { %v9150_v20 = vpop.f32.mrf.mxu0  ;;  %v1072_v0 = vadd.f32 %v1071_v19, %v927_v18 }
 0x1d2   : > { %v9182_v24 = vpop.f32.mrf.mxu1 }
 0x1d3   : > { %v930_v25 = vpop.f32.mrf.mxu0 }
 0x1d4   : > { %v1074_v26 = vpop.f32.mrf.mxu1 }
 0x1d5   : > { %v11294_v27 = vpop.f32.mrf.mxu0  ;;  %v1075_v1 = vadd.f32 %v1074_v26, %v930_v25  ;;  %v9483_v25 = vld [vmem:[#allocation8 + $0x164] ss:$8 sps:$4 sm:$0xff]  }
 0x1d6   : > { %v11296_v28 = vpop.f32.mrf.mxu1 }
 0x1d7   : > { %v11298_v29 = vpop.f32.mrf.mxu0 }
 0x1d8   : > { %v11300_v30 = vpop.f32.mrf.mxu1 }
 0x1d9   : > { %v11302_v31 = vpop.f32.mrf.mxu0 }
 0x1da   : > { %v11304_v21 = vpop.f32.mrf.mxu1 }
 0x1db   : > { %v11306_v16 = vpop.f32.mrf.mxu0 }
 0x1dc   : > { %v11308_v32 = vpop.f32.mrf.mxu1 }
 0x1dd   : > { %v11310_v22 = vpop.f32.mrf.mxu0 }
 0x1de   : > { %v11312_v34 = vpop.f32.mrf.mxu1 }
 0x1df   : > { %v11314_v35 = vpop.f32.mrf.mxu0 }
 0x1e0   : > { %v11316_v36 = vpop.f32.mrf.mxu1 }
 0x1e1   : > { %v9158_v37 = vpop.f32.mrf.mxu0 }
 0x1e2   : > { %v9190_v38 = vpop.f32.mrf.mxu1  ;;  %v1083_v37 = vadd.f32 %v9182_v24, %v9150_v20  ;;  %v9492_v20 = vld [vmem:[#allocation8 + $0x154] ss:$8 sps:$4 sm:$0xff]  }
 0x1e3   : > { %v11318_v39 = vpop.f32.mrf.mxu0 }
 0x1e5   : > { %v9209_v40 = vpop.f32.mrf.mxu0 }
 0x1e6   : > { %v1288_v50 = vadd.f32 %v9209_v40, %v1064_v45 }
 0x1e7   : > { %v1224_v42 = vpop.f32.mrf.mxu0 }
 0x1e8   : > { %v1286_v44 = vadd.f32 %v1224_v42, %v1056_v41  ;;  %v1308_v57 = vadd.f32 %v11320_v23, %v1288_v50  ;;  %v9481_v42 = vld [vmem:[#allocation8 + $0x160] ss:$8 sps:$4 sm:$0xff]  }
 0x1e9   : > { %v9210_v46 = vpop.f32.mrf.mxu0 }
 0x1ea   : > { %v1306_v48 = vadd.f32 %v11320_v23, %v1286_v44  ;;  %v1289_v49 = vadd.f32 %v9210_v46, %v1067_v43  ;;  %v1323_v4 = vmax.f32 %v1308_v57, 0.0  ;;  %v1080_v43 = vadd.f32 %v11292_v17, %v11290_v15 }
 0x1eb   : > { %v1227_v51 = vpop.f32.mrf.mxu0 }
 0x1ec   : > { %v1321_v52 = vmax.f32 %v1306_v48, 0.0  ;;  %v1287_v53 = vadd.f32 %v1227_v51, %v1059_v47  ;;  %v1309_v55 = vadd.f32 %v11320_v23, %v1289_v49  ;;  %v1343_v38 = vmul.f32 %v11326_v59, %v1323_v4 }
 0x1ed   : > { %v9213_v54 = vpop.f32.mrf.mxu0  ;;  %v1112_v47 = vadd.f32 %v11312_v34, %v11310_v22  ;;  %v1091_v22 = vadd.f32 %v11308_v32, %v11306_v16  ;;  %v9501_v32 = vld [vmem:[#allocation8 + $0x134] ss:$8 sps:$4 sm:$0xff]  }
 0x1ee   : > { %v1307_v56 = vadd.f32 %v11320_v23, %v1287_v53  ;;  %v1341_v61 = vmul.f32 %v11326_v59, %v1321_v52  ;;  %v1324_v2 = vmax.f32 %v1309_v55, 0.0  ;;  %v1292_v48 = vadd.f32 %v9213_v54, %v1080_v43  ;;  %v9490_v52 = vld [vmem:[#allocation8 + $0x150] ss:$8 sps:$4 sm:$0xff]  }
 0x1ef   : > { %v1240_v60 = vpop.f32.mrf.mxu0  ;;  %v11357_v50 = vadd.f32 %v11330_v5, %v1343_v38 }
 0x1f0   : > { %v1322_v62 = vmax.f32 %v1307_v56, 0.0  ;;  %v11333_v7 = vadd.f32 %v11330_v5, %v1341_v61  ;;  %v1290_v9 = vadd.f32 %v1240_v60, %v1072_v0  ;;  %v1344_v14 = vmul.f32 %v11326_v59, %v1324_v2  ;;  %v9498_v56 = vld [vmem:[#allocation8 + $0x144] ss:$8 sps:$4 sm:$0xff]  }
 0x1f1   : > { %v9214_v63 = vpop.f32.mrf.mxu0  ;;  %v1312_v34 = vadd.f32 %v11320_v23, %v1292_v48  ;;  %v1088_v61 = vadd.f32 %v11300_v30, %v11298_v29  ;;  %v9499_v30 = vld [vmem:[#allocation8 + $0x130] ss:$8 sps:$4 sm:$0xff]  }
 0x1f2   : > { %v1342_v3 = vmul.f32 %v11326_v59, %v1322_v62  ;;  %v1310_v40 = vadd.f32 %v11320_v23, %v1290_v9  ;;  %v1293_v44 = vadd.f32 %v9214_v63, %v1083_v37  ;;  %v11352_v46 = vadd.f32 %v11330_v5, %v1344_v14  ;;  %v9496_v63 = vld [vmem:[#allocation8 + $0x140] ss:$8 sps:$4 sm:$0xff]   ;;  %v9505_v48 = vld [vmem:[#allocation8 + $0x110] ss:$8 sps:$4 sm:$0xff]  }
 0x1f3   : > { %v1243_v6 = vpop.f32.mrf.mxu0 }
 0x1f4   : > { %v11336_v8 = vadd.f32 %v11330_v5, %v1342_v3  ;;  %v1291_v10 = vadd.f32 %v1243_v6, %v1075_v1  ;;  %v1325_v49 = vmax.f32 %v1310_v40, 0.0  ;;  %v1313_v15 = vadd.f32 %v11320_v23, %v1293_v44 }
 0x1f5   : > { %v11338_v12 = vpop.f32.mrf.mxu0  ;;  %v1461_v55 = vpack.c.bf16 %v11352_v46, %v11357_v50  ;;  %v1327_v3 = vmax.f32 %v1312_v34, 0.0  ;;  %v1096_v40 = vadd.f32 %v11296_v28, %v11294_v27  ;;  %v9507_v27 = vld [vmem:[#allocation8 + $0x114] ss:$8 sps:$4 sm:$0xff]  }
 0x1f6   : > { %v1460_v18 = vpack.c.bf16 %v11336_v8, %v11333_v7  ;;  %v1311_v19 = vadd.f32 %v11320_v23, %v1291_v10  ;;  %v1345_v54 = vmul.f32 %v11326_v59, %v1325_v49  ;;  %v1328_v0 = vmax.f32 %v1313_v15, 0.0  ;;  %v9510_v15 = vld [vmem:[#allocation8 + $0x104] ss:$8 sps:$4 sm:$0xff]  }
 0x1f7   : > { %v1256_v26 = vpop.f32.mrf.mxu0  ;;  %v1377_v29 = vrot.slane %v11336_v8, 4  ;;  %v1347_v8 = vmul.f32 %v11326_v59, %v1327_v3 }
 0x1f8   : > { %1598 = vmatmul.mubr.bf16.vlgmr.msra.gmra.mxu1 %v1460_v18  ;;  %v1326_v45 = vmax.f32 %v1311_v19, 0.0  ;;  %v1294_v4 = vadd.f32 %v1256_v26, %v1088_v61  ;;  %v11378_v9 = vadd.f32 %v11330_v5, %v1345_v54  ;;  %v1348_v10 = vmul.f32 %v11326_v59, %v1328_v0  ;;  %v9504_v19 = vld [vmem:[#allocation8 + $0x124] ss:$8 sps:$4 sm:$0xff]  }
 0x1f9   : > { %v11346_v41 = vpop.f32.mrf.mxu0  ;;  %1973 = vmatpush1.bf16.msra.mxu1 %v9472_v13  ;;  %1607 = vmatprep.mubr.bf16.mxu1 %v10856_v58  ;;  %v1099_v26 = vadd.f32 %v11304_v21, %v11302_v31 }
 0x1fa   : > { %1974 = vmatprep.subr.bf16.mxu1 %v9483_v25  ;;  %v1346_v17 = vmul.f32 %v11326_v59, %v1326_v45  ;;  %v1376_v25 = vrot.slane %v11333_v7, 4  ;;  %v1314_v37 = vadd.f32 %v11320_v23, %v1294_v4  ;;  %v9502_v7 = vld [vmem:[#allocation8 + $0x120] ss:$8 sps:$4 sm:$0xff]   ;;  %v11409_v44 = vadd.f32 %v11330_v5, %v1348_v10 }
 0x1fb   : > { %v1259_v24 = vpop.f32.mrf.mxu0  ;;  %v1297_v31 = vadd.f32 %v11346_v41, %v1099_v26  ;;  %v1296_v45 = vadd.f32 %v11338_v12, %v1096_v40  ;;  %v1378_v12 = vrot.slane %v11357_v50, 4  ;;  %v9508_v50 = vld [vmem:[#allocation8 + $0x100] ss:$8 sps:$4 sm:$0xff]   ;;  %v1380_v3 = vrot.slane %v11378_v9, 4 }
 0x1fc   : > { %v1295_v1 = vadd.f32 %v1259_v24, %v1091_v22  ;;  %v11374_v16 = vadd.f32 %v11330_v5, %v1346_v17  ;;  %v1329_v41 = vmax.f32 %v1314_v37, 0.0  ;;  %v11418_v24 = vadd.f32 %v11330_v5, %v1347_v8 }
 0x1fd   : > { %v9221_v51 = vpop.f32.mrf.mxu0  ;;  %1975 = vmatpush1.bf16.msra.mxu1 %v9481_v42  ;;  %v11398_v42 = vsel %vm615_vm0, %v1376_v25, %v1377_v29  ;;  %v1317_v49 = vadd.f32 %v11320_v23, %v1297_v31  ;;  %v1379_v17 = vrot.slane %v11352_v46, 4  ;;  %v11432_v34 = vsel %vm615_vm0, %v1377_v29, %v1378_v12 }
 0x1fe   : > { %v1300_v53 = vadd.f32 %v9221_v51, %v1112_v47  ;;  %1976 = vmatprep.subr.bf16.mxu1 %v9492_v20  ;;  %v1315_v13 = vadd.f32 %v11320_v23, %v1295_v1  ;;  %v1462_v18 = vpack.c.bf16 %v11374_v16, %v11378_v9  ;;  %v1106_v47 = vpop.f32.mrf.mxu1  ;;  %v1349_v22 = vmul.f32 %v11326_v59, %v1329_v41 }
 0x1ff   : > { %v11363_v57 = vpop.f32.mrf.mxu0  ;;  %v1104_v46 = vadd.f32 %v11316_v36, %v11314_v35  ;;  %v1332_v54 = vmax.f32 %v1317_v49, 0.0  ;;  %v11440_v61 = vsel %vm615_vm0, %v1378_v12, %v1379_v17 }
 0x200   : > { %v1320_v60 = vadd.f32 %v11320_v23, %v1300_v53  ;;  %1608 = vmatmul.mubr.bf16.gmra.mxu1 %v1461_v55  ;;  %v1330_v21 = vmax.f32 %v1315_v13, 0.0  ;;  %v1107_v55 = vadd.f32 %v1106_v47, %v11318_v39  ;;  %v1437_v0 = vpack.c.bf16 %v11440_v61, %v11432_v34 }
 0x201   : > { %v9222_v62 = vpop.f32.mrf.mxu0  ;;  %1617 = vmatprep.mubr.bf16.mxu1 %v10856_v58  ;;  %1977 = vmatpush1.bf16.msra.mxu1 %v9490_v52  ;;  %v1463_v52 = vpack.c.bf16 %v11409_v44, %v11418_v24  ;;  %v1369_v1 = vadd.f32 %v11330_v5, %v1349_v22  ;;  %v1352_v35 = vmul.f32 %v11326_v59, %v1332_v54  ;;  %v9511_v22 = vld [vmem:[#allocation11 + $0x170] ss:$8 sps:$4 sm:$0xff]   ;;  %v9519_v54 = vld [vmem:[#allocation11 + $0x154] ss:$8 sps:$4 sm:$0xff]  }
 0x202   : > { %v1335_v2 = vmax.f32 %v1320_v60, 0.0  ;;  %1978 = vmatprep.subr.bf16.mxu1 %v9498_v56  ;;  %v1350_v51 = vmul.f32 %v11326_v59, %v1330_v21  ;;  %v1316_v56 = vadd.f32 %v11320_v23, %v1296_v45 }
 0x203   : > { %v1275_v53 = vpop.f32.mrf.mxu0  ;;  %v1372_v29 = vadd.f32 %v11330_v5, %v1352_v35  ;;  %v9529_v35 = vld [vmem:[#allocation11 + $0x110] ss:$8 sps:$4 sm:$0xff]  }
 0x204   : > { %v1355_v6 = vmul.f32 %v11326_v59, %v1335_v2  ;;  %v1299_v60 = vadd.f32 %v1275_v53, %v1107_v55  ;;  %v1370_v39 = vadd.f32 %v11330_v5, %v1350_v51  ;;  %v1331_v62 = vmax.f32 %v1316_v56, 0.0 }
 0x205   : > { %1979 = vmatpush1.bf16.msra.mxu1 %v9496_v63  ;;  %v1298_v63 = vadd.f32 %v11363_v57, %v1104_v46  ;;  %v1381_v2 = vrot.slane %v11374_v16, 4  ;;  %v1867_v51 = vpack.c.bf16 %v11432_v34, %v11398_v42  ;;  %v9513_v34 = vld [vmem:[#allocation11 + $0x174] ss:$8 sps:$4 sm:$0xff]   ;;  %v9516_v46 = vld [vmem:[#allocation11 + $0x164] ss:$8 sps:$4 sm:$0xff]  }
 0x206   : > { %v11384_v14 = vadd.f32 %v11330_v5, %v1355_v6  ;;  %1980 = vmatprep.subr.bf16.mxu1 %v9501_v32  ;;  %v1319_v36 = vadd.f32 %v11320_v23, %v1299_v60  ;;  %v1464_v32 = vpack.c.bf16 %v1370_v39, %v1369_v1  ;;  %v1351_v57 = vmul.f32 %v11326_v59, %v1331_v62  ;;  %v9523_v62 = vld [vmem:[#allocation11 + $0x130] ss:$8 sps:$4 sm:$0xff]  }
 0x207   : > { %v1318_v4 = vadd.f32 %v11320_v23, %v1298_v63  ;;  %v1400_v6 = vsel %vm615_vm0, %v1380_v3, %v1381_v2  ;;  %v1385_v21 = vrot.slane %v1370_v39, 4  ;;  %2648 = vmatprep.subr.bf16.mxu0 %v9513_v34  ;;  %v9520_v39 = vld [vmem:[#allocation11 + $0x140] ss:$8 sps:$4 sm:$0xff]   ;;  %v9525_v63 = vld [vmem:[#allocation11 + $0x134] ss:$8 sps:$4 sm:$0xff]  }
 0x208   : > { %v1390_v38 = vrot.slane %v11384_v14, 4  ;;  %1618 = vmatmul.mubr.bf16.gmra.mxu1 %v1462_v18  ;;  %v1334_v16 = vmax.f32 %v1319_v36, 0.0  ;;  %v1371_v13 = vadd.f32 %v11330_v5, %v1351_v57  ;;  %v9531_v36 = vld [vmem:[#allocation11 + $0x114] ss:$8 sps:$4 sm:$0xff]   ;;  %v9534_v57 = vld [vmem:[#allocation11 + $0x104] ss:$8 sps:$4 sm:$0xff]  }
 0x209   : > { %1627 = vmatprep.mubr.bf16.mxu1 %v10856_v58  ;;  %1981 = vmatpush1.bf16.msra.mxu1 %v9499_v30  ;;  %v1401_v30 = vsel %vm615_vm0, %v1379_v17, %v1380_v3  ;;  %v1333_v10 = vmax.f32 %v1318_v4, 0.0  ;;  %v9532_v3 = vld [vmem:[#allocation11 + $0x100] ss:$8 sps:$4 sm:$0xff]  }
 0x20a   : > { %v11406_v43 = vsel %vm615_vm0, %v1390_v38, %v1376_v25  ;;  %1982 = vmatprep.subr.bf16.mxu1 %v9504_v19  ;;  %v1438_v9 = vpack.c.bf16 %v1400_v6, %v1401_v30  ;;  %v1354_v18 = vmul.f32 %v11326_v59, %v1334_v16  ;;  %v1465_v23 = vpack.c.bf16 %v1372_v29, %v1371_v13  ;;  %v9537_v16 = vld [vmem:[#allocation11 + $0x1f4] ss:$8 sps:$4 sm:$0xff]  }
 0x20b   : > { %v1406_v28 = vsel %vm615_vm0, %v11398_v42, %v11406_v43  ;;  %v1382_v19 = vrot.slane %v11418_v24, 4  ;;  %v1383_v25 = vrot.slane %v11409_v44, 4  ;;  %v1353_v26 = vmul.f32 %v11326_v59, %v1333_v10  ;;  %v9540_v10 = vld [vmem:[#allocation11 + $0x1e4] ss:$8 sps:$4 sm:$0xff]  }
 0x20c   : > { %v1436_v20 = vpack.c.bf16 %v11398_v42, %v1406_v28  ;;  %v1374_v37 = vadd.f32 %v11330_v5, %v1354_v18  ;;  %v1386_v41 = vrot.slane %v1371_v13, 4  ;;  %v1868_v53 = vpack.c.bf16 %v1401_v30, %v11440_v61  ;;  %v9522_v61 = vld [vmem:[#allocation11 + $0x144] ss:$8 sps:$4 sm:$0xff]   ;;  %v9538_v30 = vld [vmem:[#allocation11 + $0x1e0] ss:$8 sps:$4 sm:$0xff]  }
 0x20d   : > { %1983 = vmatpush1.bf16.msra.mxu1 %v9502_v7  ;;  %v1399_v8 = vsel %vm615_vm0, %v1381_v2, %v1382_v19  ;;  %v1398_v40 = vsel %vm615_vm0, %v1382_v19, %v1383_v25  ;;  %v1373_v31 = vadd.f32 %v11330_v5, %v1353_v26  ;;  %v1467_v5 = vpack.c.bf16 %v11384_v14, %v11384_v14  ;;  %v9514_v14 = vld [vmem:[#allocation11 + $0x160] ss:$8 sps:$4 sm:$0xff]   ;;  %v9528_v2 = vld [vmem:[#allocation11 + $0x124] ss:$8 sps:$4 sm:$0xff]   ;;  %v9555_v26 = vld [vmem:[#allocation11 + $0x194] ss:$8 sps:$4 sm:$0xff]  }
 0x20e   : > { %1789 = vmatmul.mubr.bf16.vlgmr.msra.gmra.mxu0 %v1436_v20  ;;  %1984 = vmatprep.subr.bf16.mxu1 %v9507_v27  ;;  %v1439_v7 = vpack.c.bf16 %v1398_v40, %v1399_v8  ;;  %v1384_v27 = vrot.slane %v1369_v1, 4  ;;  %v1387_v20 = vrot.slane %v1372_v29, 4  ;;  %v1395_v24 = vsel %vm615_vm0, %v1385_v21, %v1386_v41  ;;  %v9526_v1 = vld [vmem:[#allocation11 + $0x120] ss:$8 sps:$4 sm:$0xff]   ;;  %v9546_v13 = vld [vmem:[#allocation11 + $0x1c4] ss:$8 sps:$4 sm:$0xff]  }
 0x20f   : > { %1798 = vmatprep.mubr.bf16.mxu0 %v10856_v58  ;;  %v1466_v44 = vpack.c.bf16 %v1374_v37, %v1373_v31  ;;  %v1389_v49 = vrot.slane %v1374_v37, 4  ;;  %v1869_v56 = vpack.c.bf16 %v1399_v8, %v1400_v6  ;;  %2649 = vmatpush1.bf16.msra.mxu0 %v9511_v22  ;;  %v9535_v6 = vld [vmem:[#allocation11 + $0x1f0] ss:$8 sps:$4 sm:$0xff]   ;;  %v9544_v18 = vld [vmem:[#allocation11 + $0x1c0] ss:$8 sps:$4 sm:$0xff]  }
 0x210   : > { %1628 = vmatmul.mubr.bf16.gmra.mxu1 %v1463_v52  ;;  %v1396_v59 = vsel %vm615_vm0, %v1384_v27, %v1385_v21  ;;  %v1397_v28 = vsel %vm615_vm0, %v1383_v25, %v1384_v27  ;;  %v1394_v47 = vsel %vm615_vm0, %v1386_v41, %v1387_v20  ;;  %v1388_v52 = vrot.slane %v1373_v31, 4  ;;  %2650 = vmatprep.subr.bf16.mxu0 %v9516_v46  ;;  %v9552_v19 = vld [vmem:[#allocation11 + $0x1a4] ss:$8 sps:$4 sm:$0xff]   ;;  %v9550_v25 = vld [vmem:[#allocation11 + $0x1a0] ss:$8 sps:$4 sm:$0xff]  }
 0x211   : > { %1637 = vmatprep.mubr.bf16.mxu1 %v10856_v58  ;;  %1985 = vmatpush1.bf16.msra.mxu1 %v9505_v48  ;;  %v1440_v45 = vpack.c.bf16 %v1396_v59, %v1397_v28  ;;  %v1441_v48 = vpack.c.bf16 %v1394_v47, %v1395_v24  ;;  %v1391_v42 = vsel %vm615_vm0, %v1389_v49, %v1390_v38  ;;  %v9517_v38 = vld [vmem:[#allocation11 + $0x150] ss:$8 sps:$4 sm:$0xff]   ;;  %v9558_v8 = vld [vmem:[#allocation11 + $0x74] ss:$8 sps:$4 sm:$0xff]   ;;  %v9564_v31 = vld [vmem:[#allocation11 + $0x64] ss:$8 sps:$4 sm:$0xff]  }
 0x212   : > { %1986 = vmatprep.subr.bf16.mxu1 %v9510_v15  ;;  %v1392_v15 = vsel %vm615_vm0, %v1388_v52, %v1389_v49  ;;  %v1393_v12 = vsel %vm615_vm0, %v1387_v20, %v1388_v52  ;;  %v1443_v55 = vpack.c.bf16 %v1391_v42, %v1391_v42  ;;  %v1871_v60 = vpack.c.bf16 %v1395_v24, %v1396_v59  ;;  %v9553_v37 = vld [vmem:[#allocation11 + $0x190] ss:$8 sps:$4 sm:$0xff]   ;;  %v9559_v21 = vld [vmem:[#allocation11 + $0x180] ss:$8 sps:$4 sm:$0xff]   ;;  %v9567_v27 = vld [vmem:[#allocation11 + $0x54] ss:$8 sps:$4 sm:$0xff]  }
 0x213   : > { %v1442_v17 = vpack.c.bf16 %v1392_v15, %v1393_v12  ;;  %2651 = vmatpush1.bf16.msra.mxu0 %v9514_v14  ;;  %v1435_v4 = vsel %vm644_vm1, %v1391_v42, %v11406_v43  ;;  %v9549_v43 = vld [vmem:[#allocation11 + $0x1b4] ss:$8 sps:$4 sm:$0xff]   ;;  %v9577_v20 = vld [vmem:[#allocation11 + $0x30] ss:$8 sps:$4 sm:$0xff]   ;;  %v9585_v24 = vld [vmem:[#allocation11 + $0x24] ss:$8 sps:$4 sm:$0xff]  }
 0x214   : > { %2652 = vmatprep.subr.bf16.mxu0 %v9519_v54  ;;  %v1874_v29 = vpack.c.bf16 %v1435_v4, %v1435_v4  ;;  %v11509_v59 = vld [vmem:[#allocation11 + $0x274] ss:$8 sps:$4 sm:$0xff]   ;;  %v9589_v49 = vld [vmem:[#allocation11 + $0x10] ss:$8 sps:$4 sm:$0xff]   ;;  %v9595_v52 = vld [vmem:[#allocation11] ss:$8 sps:$4 sm:$0xff]  }
 0x215   : > { %1987 = vmatpush1.bf16.msra.mxu1 %v9508_v50  ;;  %v1870_v50 = vpack.c.bf16 %v1397_v28, %v1398_v40  ;;  %v9556_v40 = vld [vmem:[#allocation11 + $0x70] ss:$8 sps:$4 sm:$0xff]   ;;  %v9579_v41 = vld [vmem:[#allocation11 + $0x34] ss:$8 sps:$4 sm:$0xff]   ;;  %v9619_v22 = vld [vmem:[#allocation11 + $0xc0] ss:$8 sps:$4 sm:$0xff]  }
 0x216   : > { %1799 = vmatmul.mubr.bf16.gmra.mxu0 %v1437_v0  ;;  %v1872_v0 = vpack.c.bf16 %v1393_v12, %v1394_v47  ;;  %2919 = vmatprep.subr.bf16.mxu1 %v9558_v8  ;;  %v9565_v28 = vld [vmem:[#allocation11 + $0x50] ss:$8 sps:$4 sm:$0xff]   ;;  %v9583_v47 = vld [vmem:[#allocation11 + $0x20] ss:$8 sps:$4 sm:$0xff]  }
 0x217   : > { %1808 = vmatprep.mubr.bf16.mxu0 %v10856_v58  ;;  %2653 = vmatpush1.bf16.msra.mxu0 %v9517_v38  ;;  %v9601_v12 = vld [vmem:[#allocation11 + $0xf0] ss:$8 sps:$4 sm:$0xff]   ;;  %v9633_v38 = vld [vmem:[#allocation11 + $0xa4] ss:$8 sps:$4 sm:$0xff]   ;;  %v9631_v54 = vld [vmem:[#allocation11 + $0xa0] ss:$8 sps:$4 sm:$0xff]  }
 0x218   : > { %1638 = vmatmul.mubr.bf16.gmra.mxu1 %v1464_v32  ;;  %2654 = vmatprep.subr.bf16.mxu0 %v9522_v61  ;;  %v1873_v32 = vpack.c.bf16 %v1391_v42, %v1392_v15  ;;  %v9603_v15 = vld [vmem:[#allocation11 + $0xf4] ss:$8 sps:$4 sm:$0xff]   ;;  %v9625_v14 = vld [vmem:[#allocation11 + $0xb0] ss:$8 sps:$4 sm:$0xff]  }
 0x219   : > { %1647 = vmatprep.mubr.bf16.mxu1 %v10856_v58  ;;  %v9615_v42 = vld [vmem:[#allocation11 + $0xd4] ss:$8 sps:$4 sm:$0xff]  }
 0x21b   : > { %2655 = vmatpush1.bf16.msra.mxu0 %v9520_v39  ;;  %v9639_v39 = vld [vmem:[#allocation11 + $0x94] ss:$8 sps:$4 sm:$0xff]  }
 0x21c   : > { %2656 = vmatprep.subr.bf16.mxu0 %v9525_v63 }
 0x21e   : > { %1809 = vmatmul.mubr.bf16.gmra.mxu0 %v1438_v9  ;;  %v9541_v9 = vld [vmem:[#allocation11 + $0x1d0] ss:$8 sps:$4 sm:$0xff]  }
 0x21f   : > { %1818 = vmatprep.mubr.bf16.mxu0 %v10856_v58  ;;  %2657 = vmatpush1.bf16.msra.mxu0 %v9523_v62  ;;  %v9637_v62 = vld [vmem:[#allocation11 + $0x90] ss:$8 sps:$4 sm:$0xff]  }
 0x220   : > { %1648 = vmatmul.mubr.bf16.gmra.mxu1 %v1465_v23  ;;  %2658 = vmatprep.subr.bf16.mxu0 %v9528_v2  ;;  %v9547_v23 = vld [vmem:[#allocation11 + $0x1b0] ss:$8 sps:$4 sm:$0xff]   ;;  %v9643_v2 = vld [vmem:[#allocation11 + $0x80] ss:$8 sps:$4 sm:$0xff]  }
 0x221   : > { %1657 = vmatprep.mubr.bf16.mxu1 %v10856_v58 }
 0x223   : > { %2659 = vmatpush1.bf16.msra.mxu0 %v9526_v1 }
 0x224   : > { %2660 = vmatprep.subr.bf16.mxu0 %v9531_v36 }
 0x226   : > { %1819 = vmatmul.mubr.bf16.gmra.mxu0 %v1439_v7  ;;  %v9561_v7 = vld [vmem:[#allocation11 + $0x184] ss:$8 sps:$4 sm:$0xff]  }
 0x227   : > { %1828 = vmatprep.mubr.bf16.mxu0 %v10856_v58  ;;  %2661 = vmatpush1.bf16.msra.mxu0 %v9529_v35 }
 0x228   : > { %1658 = vmatmul.mubr.bf16.gmra.mxu1 %v1466_v44  ;;  %2662 = vmatprep.subr.bf16.mxu0 %v9534_v57  ;;  %v9562_v44 = vld [vmem:[#allocation11 + $0x60] ss:$8 sps:$4 sm:$0xff]  }
 0x229   : > { %1667 = vmatprep.mubr.bf16.mxu1 %v10856_v58 }
 0x22b   : > { %2663 = vmatpush1.bf16.msra.mxu0 %v9532_v3 }
 0x22c   : > { %2664 = vmatprep.subr.bf16.mxu0 %v9537_v16 }
 0x22e   : > { %1829 = vmatmul.mubr.bf16.gmra.mxu0 %v1440_v45  ;;  %v9573_v45 = vld [vmem:[#allocation11 + $0x44] ss:$8 sps:$4 sm:$0xff]  }
 0x22f   : > { %1838 = vmatprep.mubr.bf16.mxu0 %v10856_v58  ;;  %2665 = vmatpush2.bf16.msra.mxu0 %v9535_v6 }
 0x230   : > { %1668 = vmatmul.mubr.bf16.gmra.mxu1 %v1467_v5  ;;  %2666 = vmatprep.subr.bf16.mxu0 %v9540_v10  ;;  %v9571_v5 = vld [vmem:[#allocation11 + $0x40] ss:$8 sps:$4 sm:$0xff]  }
 0x231   : > { %2004 = vmatprep.mubr.bf16.mxu1 %v10856_v58 }
 0x233   : > { %2667 = vmatpush2.bf16.msra.mxu0 %v9538_v30 }
 0x236   : > { %1839 = vmatmul.mubr.bf16.gmra.mxu0 %v1441_v48  ;;  %v9591_v48 = vld [vmem:[#allocation11 + $0x14] ss:$8 sps:$4 sm:$0xff]  }
 0x237   : > { %1848 = vmatprep.mubr.bf16.mxu0 %v10856_v58 }
 0x238   : > { %2005 = vmatmul.mubr.bf16.vlgmr.msra.gmra.mxu1 %v1867_v51  ;;  %v9597_v51 = vld [vmem:[#allocation11 + $0x4] ss:$8 sps:$4 sm:$0xff]  }
 0x239   : > { %2014 = vmatprep.mubr.bf16.mxu1 %v10856_v58  ;;  %2920 = vmatpush1.bf16.msra.mxu1 %v9556_v40 }
 0x23a   : > { %2921 = vmatprep.subr.bf16.mxu1 %v9564_v31 }
 0x23d   : > { %2922 = vmatpush1.bf16.msra.mxu1 %v9562_v44 }
 0x23e   : > { %1849 = vmatmul.mubr.bf16.gmra.mxu0 %v1442_v17  ;;  %2923 = vmatprep.subr.bf16.mxu1 %v9567_v27  ;;  %v9609_v17 = vld [vmem:[#allocation11 + $0xe4] ss:$8 sps:$4 sm:$0xff]  }
 0x23f   : > { %1858 = vmatprep.mubr.bf16.mxu0 %v10856_v58 }
 0x240   : > { %2015 = vmatmul.mubr.bf16.gmra.mxu1 %v1868_v53  ;;  %v9607_v53 = vld [vmem:[#allocation11 + $0xe0] ss:$8 sps:$4 sm:$0xff]  }
 0x241   : > { %2024 = vmatprep.mubr.bf16.mxu1 %v10856_v58  ;;  %2924 = vmatpush1.bf16.msra.mxu1 %v9565_v28 }
 0x242   : > { %2925 = vmatprep.subr.bf16.mxu1 %v9573_v45 }
 0x245   : > { %2926 = vmatpush1.bf16.msra.mxu1 %v9571_v5 }
 0x246   : > { %1859 = vmatmul.mubr.bf16.gmra.mxu0 %v1443_v55  ;;  %2927 = vmatprep.subr.bf16.mxu1 %v9579_v41  ;;  %v9613_v55 = vld [vmem:[#allocation11 + $0xd0] ss:$8 sps:$4 sm:$0xff]  }
 0x248   : > { %2025 = vmatmul.mubr.bf16.gmra.mxu1 %v1869_v56  ;;  %v9621_v56 = vld [vmem:[#allocation11 + $0xc4] ss:$8 sps:$4 sm:$0xff]  }
 0x249   : > { %2034 = vmatprep.mubr.bf16.mxu1 %v10856_v58  ;;  %2928 = vmatpush1.bf16.msra.mxu1 %v9577_v20 }
 0x24a   : > { %2929 = vmatprep.subr.bf16.mxu1 %v9585_v24 }
 0x24d   : > { %2930 = vmatpush1.bf16.msra.mxu1 %v9583_v47 }
 0x24e   : > { %2931 = vmatprep.subr.bf16.mxu1 %v9591_v48 }
 0x250   : > { %2035 = vmatmul.mubr.bf16.gmra.mxu1 %v1870_v50  ;;  %v9627_v50 = vld [vmem:[#allocation11 + $0xb4] ss:$8 sps:$4 sm:$0xff]  }
 0x251   : > { %2044 = vmatprep.mubr.bf16.mxu1 %v10856_v58  ;;  %2932 = vmatpush1.bf16.msra.mxu1 %v9589_v49 }
 0x252   : > { %2933 = vmatprep.subr.bf16.mxu1 %v9597_v51 }
 0x255   : > { %2934 = vmatpush1.bf16.msra.mxu1 %v9595_v52 }
 0x256   : > { %2935 = vmatprep.subr.bf16.mxu1 %v9603_v15 }
 0x258   : > { %2045 = vmatmul.mubr.bf16.gmra.mxu1 %v1871_v60 }
 0x259   : > { %2054 = vmatprep.mubr.bf16.mxu1 %v10856_v58  ;;  %2936 = vmatpush2.bf16.msra.mxu1 %v9601_v12 }
 0x25a   : > { %2937 = vmatprep.subr.bf16.mxu1 %v9609_v17 }
 0x25d   : > { %2938 = vmatpush2.bf16.msra.mxu1 %v9607_v53  ;;  %v11574_v53 = vsub.s32 0, %v11168_v11 }
 0x25e   : > { %2939 = vmatprep.subr.bf16.mxu1 %v9615_v42 }
 0x25f   : > { %13091 = vst [vmem:[#allocation37_spill] sm:$0xff] %v11574_v53 }
 0x260   : > { %2055 = vmatmul.mubr.bf16.gmra.mxu1 %v1872_v0  ;;  %v9645_v0 = vld [vmem:[#allocation11 + $0x84] ss:$8 sps:$4 sm:$0xff]  }
 0x261   : > { %2064 = vmatprep.mubr.bf16.mxu1 %v10856_v58  ;;  %2940 = vmatpush2.bf16.msra.mxu1 %v9613_v55 }
 0x262   : > { %2941 = vmatprep.subr.bf16.mxu1 %v9621_v56  ;;  %v2113_v56 = vld [vmem:[#allocation9] ss:$4 sm:$0x3] }
 0x265   : > { %2942 = vmatpush2.bf16.msra.mxu1 %v9619_v22  ;;  %v11579_v22 = vsub.s32 1, %v11168_v11 }
 0x266   : > { %2943 = vmatprep.subr.bf16.mxu1 %v9627_v50 }
 0x267   : > { %13092 = vst [vmem:[#allocation38_spill] sm:$0xff] %v11579_v22 }
 0x268   : > { %2065 = vmatmul.mubr.bf16.gmra.mxu1 %v1873_v32 }
 0x269   : > { %2074 = vmatprep.mubr.bf16.mxu1 %v10856_v58  ;;  %v9543_v58 = vld [vmem:[#allocation11 + $0x1d4] ss:$8 sps:$4 sm:$0xff]   ;;  %2944 = vmatpush2.bf16.msra.mxu1 %v9625_v14 }
 0x26a   : > { %2668 = vmatprep.subr.bf16.mxu0 %v9543_v58  ;;  %2945 = vmatprep.subr.bf16.mxu1 %v9633_v38 }
 0x26b   : > { %2669 = vmatpush2.bf16.msra.mxu0 %v9541_v9 }
 0x26c   : > { %2670 = vmatprep.subr.bf16.mxu0 %v9546_v13 }
 0x26d   : > { %2946 = vmatpush2.bf16.msra.mxu1 %v9631_v54  ;;  %v11585_v54 = vrot.slane %v2113_v56, %v11574_v53 }
 0x26e   : > { %2947 = vmatprep.subr.bf16.mxu1 %v9639_v39 }
 0x26f   : > { %2671 = vmatpush2.bf16.msra.mxu0 %v9544_v18 }
 0x270   : > { %2075 = vmatmul.mubr.bf16.gmra.mxu1 %v1874_v29  ;;  %2672 = vmatprep.subr.bf16.mxu0 %v9549_v43 }
 0x271   : > { %2948 = vmatpush2.bf16.msra.mxu1 %v9637_v62 }
 0x272   : > { %2949 = vmatprep.subr.bf16.mxu1 %v9645_v0  ;;  %v2186_v0 = vld [vmem:[#allocation9 + $0x1] ss:$4 sm:$0x3] }
 0x273   : > { %2673 = vmatpush2.bf16.msra.mxu0 %v9547_v23 }
 0x274   : > { %2674 = vmatprep.subr.bf16.mxu0 %v9552_v19 }
 0x275   : > { %2950 = vmatpush2.bf16.msra.mxu1 %v9643_v2 }
 0x276   : > { %9223 = vmatprep.subr.bf16.mxu1 %v11509_v59 }
 0x277   : > { %2675 = vmatpush2.bf16.msra.mxu0 %v9550_v25 }
 0x278   : > { %2676 = vmatprep.subr.bf16.mxu0 %v9555_v26 }
 0x27b   : > { %2677 = vmatpush2.bf16.msra.mxu0 %v9553_v37 }
 0x27c   : > { %2678 = vmatprep.subr.bf16.mxu0 %v9561_v7 }
 0x27f   : > { %2679 = vmatpush2.bf16.msra.mxu0 %v9559_v21 }
 0x280   : > { %3239 = vmatprep.subr.bf16.mxu0 %v11509_v59 }
 0x2b8   : > { %v11512_v34 = vpop.f32.mrf.mxu1 }
 0x2ba   : > { %v11514_v46 = vpop.f32.mrf.mxu1 }
 0x2bc   : > { %v11516_v60 = vpop.f32.mrf.mxu1 }
 0x2be   : > { %v11518_v61 = vpop.f32.mrf.mxu1 }
 0x2c0   : > { %v11520_v63 = vpop.f32.mrf.mxu1 }
 0x2c2   : > { %v11522_v1 = vpop.f32.mrf.mxu1 }
 0x2c4   : > { %v11524_v35 = vpop.f32.mrf.mxu1 }
 0x2c6   : > { %v11526_v36 = vpop.f32.mrf.mxu1 }
 0x2c8   : > { %v11528_v32 = vpop.f32.mrf.mxu1 }
 0x2ca   : > { %v11531_v3 = vpop.f32.mrf.mxu1 }
 0x2cc   : > { %v11533_v57 = vpop.f32.mrf.mxu1 }
 0x2ce   : > { %v11535_v4 = vpop.f32.mrf.mxu1  ;;  %v1790_v6 = vpop.f32.mrf.mxu0 }
 0x2cf   : > { %v1791_v38 = vadd.f32 %v1790_v6, %v11512_v34  ;;  %v11598_v6 = vrot.slane %v2186_v0, %v11574_v53 }
 0x2d0   : > { %v11537_v16 = vpop.f32.mrf.mxu1  ;;  %v1792_v29 = vpop.f32.mrf.mxu0 }
 0x2d1   : > { %v1793_v2 = vadd.f32 %v1792_v29, %v11514_v46  ;;  %v11604_v46 = vrot.slane %v2186_v0, %v11579_v22 }
 0x2d2   : > { %v11539_v30 = vpop.f32.mrf.mxu1  ;;  %v1794_v10 = vpop.f32.mrf.mxu0 }
 0x2d4   : > { %v11541_v9 = vpop.f32.mrf.mxu1  ;;  %v1796_v58 = vpop.f32.mrf.mxu0 }
 0x2d6   : > { %v11543_v13 = vpop.f32.mrf.mxu1  ;;  %v1800_v18 = vpop.f32.mrf.mxu0 }
 0x2d8   : > { %v11545_v43 = vpop.f32.mrf.mxu1  ;;  %v1802_v23 = vpop.f32.mrf.mxu0 }
 0x2da   : > { %v11547_v19 = vpop.f32.mrf.mxu1  ;;  %v1804_v25 = vpop.f32.mrf.mxu0 }
 0x2dc   : > { %v11549_v26 = vpop.f32.mrf.mxu1  ;;  %v1806_v8 = vpop.f32.mrf.mxu0 }
 0x2dd   : > { %v1807_v0 = vadd.f32 %v1806_v8, %v11526_v36 }
 0x2de   : > { %v11551_v37 = vpop.f32.mrf.mxu1  ;;  %v1810_v40 = vpop.f32.mrf.mxu0 }
 0x2e0   : > { %v11553_v7 = vpop.f32.mrf.mxu1  ;;  %v1812_v31 = vpop.f32.mrf.mxu0 }
 0x2e2   : > { %v11555_v21 = vpop.f32.mrf.mxu1  ;;  %v1814_v44 = vpop.f32.mrf.mxu0 }
 0x2e4   : > { %v11557_v27 = vpop.f32.mrf.mxu1  ;;  %v1816_v59 = vpop.f32.mrf.mxu0 }
 0x2e6   : > { %v11559_v28 = vpop.f32.mrf.mxu1  ;;  %v1820_v45 = vpop.f32.mrf.mxu0 }
 0x2e8   : > { %v11561_v5 = vpop.f32.mrf.mxu1  ;;  %v1822_v41 = vpop.f32.mrf.mxu0 }
 0x2e9   : > { %13085 = vst [vmem:[#allocation31_spill] sm:$0xff] %v11561_v5 }
 0x2ea   : > { %v11563_v20 = vpop.f32.mrf.mxu1  ;;  %v1824_v24 = vpop.f32.mrf.mxu0 }
 0x2eb   : > { %13086 = vst [vmem:[#allocation32_spill] sm:$0xff] %v11563_v20  ;;  %v11601_v20 = vrot.slane %v2229_v33, %v11574_v53  ;;  %v1805_v53 = vadd.f32 %v1804_v25, %v11524_v35 }
 0x2ec   : > { %v11565_v47 = vpop.f32.mrf.mxu1  ;;  %v1826_v48 = vpop.f32.mrf.mxu0 }
 0x2ed   : > { %13087 = vst [vmem:[#allocation33_spill] sm:$0xff] %v11565_v47 }
 0x2ee   : > { %v11567_v49 = vpop.f32.mrf.mxu1  ;;  %v1830_v51 = vpop.f32.mrf.mxu0 }
 0x2ef   : > { %13088 = vst [vmem:[#allocation34_spill] sm:$0xff] %v11567_v49  ;;  %v1795_v49 = vadd.f32 %v1794_v10, %v11516_v60  ;;  %v1797_v60 = vadd.f32 %v1796_v58, %v11518_v61 }
 0x2f0   : > { %v11569_v52 = vpop.f32.mrf.mxu1  ;;  %v1832_v15 = vpop.f32.mrf.mxu0 }
 0x2f1   : > { %13089 = vst [vmem:[#allocation35_spill] sm:$0xff] %v11569_v52 }
 0x2f2   : > { %v11571_v12 = vpop.f32.mrf.mxu1  ;;  %v1834_v17 = vpop.f32.mrf.mxu0 }
 0x2f3   : > { %13090 = vst [vmem:[#allocation36_spill] sm:$0xff] %v11571_v12  ;;  %v11591_v12 = vrot.slane %v2113_v56, %v11579_v22 }
 0x2f4   : > { %v1673_v42 = vpop.f32.mrf.mxu1  ;;  %v11576_v55 = vpop.f32.mrf.mxu0 }
 0x2f6   : > { %v1674_v50 = vpop.f32.mrf.mxu1  ;;  %v11581_v14 = vpop.f32.mrf.mxu0 }
 0x2f8   : > { %v11587_v39 = vpop.f32.mrf.mxu0  ;;  %v2006_v62 = vpop.f32.mrf.mxu1 }
 0x2f9   : > { %v2083_v42 = vadd.f32 %v2006_v62, %v1791_v38  ;;  %v11609_v38 = vrot.slane %v2229_v33, %v11579_v22  ;;  %v1811_v33 = vadd.f32 %v1810_v40, %v11528_v32  ;;  %v1813_v22 = vadd.f32 %v1812_v31, %v11531_v3 }
 0x2fa   : > { %v11593_v52 = vpop.f32.mrf.mxu0  ;;  %v2008_v50 = vpop.f32.mrf.mxu1  ;;  %v11635_v32 = vadd.f32 %v1822_v41, %v11539_v30  ;;  %v11638_v3 = vadd.f32 %v1824_v24, %v11541_v9  ;;  %v11653_v30 = vadd.f32 %v1832_v15, %v11547_v19 }
 0x2fb   : > { %v2125_v34 = vadd.f32 %v11585_v54, %v2083_v42  ;;  %v2084_v47 = vadd.f32 %v2008_v50, %v1793_v2  ;;  %v1801_v2 = vadd.f32 %v1800_v18, %v11520_v63  ;;  %v1803_v50 = vadd.f32 %v1802_v23, %v11522_v1 }
 0x2fc   : > { %v11606_v29 = vpop.f32.mrf.mxu0  ;;  %v2010_v56 = vpop.f32.mrf.mxu1  ;;  %v11627_v63 = vadd.f32 %v1816_v59, %v11535_v4  ;;  %v11632_v23 = vadd.f32 %v1820_v45, %v11537_v16 }
 0x2fd   : > { %13093 = vst [vmem:[#allocation39_spill] sm:$0xff] %v11606_v29  ;;  %v2155_v10 = vmax.f32 %v2125_v34, 0.0  ;;  %v2126_v62 = vadd.f32 %v11591_v12, %v2084_v47  ;;  %v2085_v42 = vadd.f32 %v2010_v56, %v1795_v49  ;;  %v11624_v47 = vadd.f32 %v1814_v44, %v11533_v57 }
 0x2fe   : > { %v11617_v5 = vpop.f32.mrf.mxu0  ;;  %v2012_v29 = vpop.f32.mrf.mxu1  ;;  %v11641_v57 = vadd.f32 %v1826_v48, %v11543_v13  ;;  %v11650_v44 = vadd.f32 %v1830_v51, %v11545_v43  ;;  %v11657_v13 = vadd.f32 %v1834_v17, %v11549_v26  ;;  %v11665_v43 = vadd.f32 %v11576_v55, %v11551_v37 }
 0x2ff   : > { %v2198_v61 = vmul.f32 %v11598_v6, %v2155_v10  ;;  %v2127_v58 = vadd.f32 %v11585_v54, %v2085_v42  ;;  %v2156_v1 = vmax.f32 %v2126_v62, 0.0  ;;  %v2086_v35 = vadd.f32 %v2012_v29, %v1797_v60 }
 0x300   : > { %v11629_v36 = vpop.f32.mrf.mxu0  ;;  %v2016_v18 = vpop.f32.mrf.mxu1  ;;  %v11673_v26 = vadd.f32 %v11581_v14, %v11553_v7  ;;  %v11685_v7 = vadd.f32 %v11587_v39, %v11555_v21 }
 0x301   : > { %v2157_v25 = vmax.f32 %v2127_v58, 0.0  ;;  %v11644_v4 = vadd.f32 %v11601_v20, %v2198_v61  ;;  %v2128_v8 = vadd.f32 %v11591_v12, %v2086_v35  ;;  %v2087_v40 = vadd.f32 %v2016_v18, %v1801_v2 }
 0x302   : > { %v11647_v31 = vpop.f32.mrf.mxu0  ;;  %v2018_v16 = vpop.f32.mrf.mxu1  ;;  %v2199_v45 = vmul.f32 %v11604_v46, %v2156_v1  ;;  %v11695_v61 = vadd.f32 %v11593_v52, %v11557_v27  ;;  %v11709_v52 = vld [vmem:[#allocation11 + $0x270] ss:$8 sps:$4 sm:$0xff]  }
 0x303   : > { %v2200_v9 = vmul.f32 %v11598_v6, %v2157_v25  ;;  %v2088_v59 = vadd.f32 %v2018_v16, %v1803_v50  ;;  %v2158_v41 = vmax.f32 %v2128_v8, 0.0  ;;  %v2129_v24 = vadd.f32 %v11585_v54, %v2087_v40 }
 0x304   : > { %v11661_v48 = vpop.f32.mrf.mxu0  ;;  %v2020_v49 = vpop.f32.mrf.mxu1  ;;  %v13036_v17 = vrot.slane %v11644_v4, 4  ;;  %v11690_v2 = vadd.f32 %v11609_v38, %v2199_v45  ;;  %v13094_v45 = vld [vmem:[#allocation39_spill] sm:$0xff] }
 0x305   : > { %v11668_v19 = vadd.f32 %v11601_v20, %v2200_v9  ;;  %v2130_v51 = vadd.f32 %v11591_v12, %v2088_v59  ;;  %v2089_v15 = vadd.f32 %v2020_v49, %v1805_v53  ;;  %v2201_v34 = vmul.f32 %v11604_v46, %v2158_v41  ;;  %v11712_v9 = vld [vmem:[#allocation11 + $0x264] ss:$8 sps:$4 sm:$0xff]  }
 0x306   : > { %v2159_v29 = vmax.f32 %v2129_v24, 0.0  ;;  %v11677_v56 = vpop.f32.mrf.mxu0  ;;  %v2022_v60 = vpop.f32.mrf.mxu1  ;;  %v11719_v41 = vadd.f32 %v13094_v45, %v11559_v28  ;;  %v13035_v49 = vrot.slane %v11690_v2, 4  ;;  %v13095_v28 = vld [vmem:[#allocation31_spill] sm:$0xff] }
 0x307   : > { %v2273_v37 = vrot.slane %v11668_v19, 4  ;;  %v2439_v55 = vpack.c.bf16 %v11668_v19, %v11644_v4  ;;  %v2160_v10 = vmax.f32 %v2130_v51, 0.0  ;;  %v2131_v53 = vadd.f32 %v11585_v54, %v2089_v15 }
 0x308   : > { %v2090_v14 = vadd.f32 %v2022_v60, %v1807_v0  ;;  %v11687_v62 = vpop.f32.mrf.mxu0  ;;  %v2026_v42 = vpop.f32.mrf.mxu1  ;;  %v2244_v50 = vadd.f32 %v11609_v38, %v2201_v34  ;;  %v2202_v58 = vmul.f32 %v11598_v6, %v2159_v29 }
 0x309   : > { %v11703_v21 = vsel %vm615_vm0, %v13036_v17, %v2273_v37  ;;  %v2203_v39 = vmul.f32 %v11604_v46, %v2160_v10  ;;  %v2161_v0 = vmax.f32 %v2131_v53, 0.0  ;;  %v2091_v35 = vadd.f32 %v2026_v42, %v1811_v33 }
 0x30a   : > { %v2132_v1 = vadd.f32 %v11591_v12, %v2090_v14  ;;  %v1864_v18 = vpop.f32.mrf.mxu0  ;;  %v2028_v25 = vpop.f32.mrf.mxu1  ;;  %v2440_v27 = vpack.c.bf16 %v2244_v50, %v11690_v2  ;;  %v2274_v16 = vrot.slane %v2244_v50, 4  ;;  %v11731_v10 = vadd.f32 %v11617_v5, %v13095_v28  ;;  %v11735_v50 = vld [vmem:[#allocation11 + $0x260] ss:$8 sps:$4 sm:$0xff]  }
 0x30b   : > { %v2204_v8 = vmul.f32 %v11598_v6, %v2161_v0  ;;  %v2092_v40 = vadd.f32 %v2028_v25, %v1813_v22  ;;  %v11715_v59 = vadd.f32 %v11609_v38, %v2203_v39  ;;  %v2133_v24 = vadd.f32 %v11585_v54, %v2091_v35 }
 0x30c   : > { %v2162_v33 = vmax.f32 %v2132_v1, 0.0  ;;  %2680 = vmatprep.mubr.bf16.mxu0 %v2440_v27  ;;  %v1865_v51 = vpop.f32.mrf.mxu0  ;;  %v2030_v15 = vpop.f32.mrf.mxu1  ;;  %v11741_v1 = vld [vmem:[#allocation11 + $0x254] ss:$8 sps:$4 sm:$0xff]   ;;  %v11747_v5 = vsel %vm615_vm0, %v13035_v49, %v2274_v16 }
 0x30d   : > { %v2134_v22 = vadd.f32 %v11591_v12, %v2092_v40  ;;  %v2093_v34 = vadd.f32 %v2030_v15, %v11624_v47  ;;  %2681 = vmatmul.mubr.bf16.vlgmr.msra.gmra.mxu0 %v2439_v55  ;;  %v2276_v29 = vrot.slane %v11715_v59, 4  ;;  %v11727_v60 = vadd.f32 %v11601_v20, %v2204_v8 }
 0x30e   : > { %v2205_v53 = vmul.f32 %v11604_v46, %v2162_v33  ;;  %v2163_v14 = vmax.f32 %v2133_v24, 0.0  ;;  %3240 = vmatpush1.bf16.msra.mxu0 %v11709_v52  ;;  %v2032_v42 = vpop.f32.mrf.mxu1  ;;  %v2245_v47 = vadd.f32 %v11601_v20, %v2202_v58 }
 0x30f   : > { %v2164_v55 = vmax.f32 %v2134_v22, 0.0  ;;  %v2135_v39 = vadd.f32 %v11585_v54, %v2093_v34  ;;  %v2094_v0 = vadd.f32 %v2032_v42, %v11627_v63  ;;  %3241 = vmatprep.subr.bf16.mxu0 %v11712_v9  ;;  %v13038_v58 = vrot.slane %v11727_v60, 4  ;;  %v11767_v22 = vld [vmem:[#allocation11 + $0x250] ss:$8 sps:$4 sm:$0xff]   ;;  %v13096_v42 = vld [vmem:[#allocation32_spill] sm:$0xff] }
 0x310   : > { %v2036_v35 = vpop.f32.mrf.mxu1  ;;  %v11750_v18 = vadd.f32 %v11609_v38, %v2205_v53  ;;  %v2441_v25 = vpack.c.bf16 %v11727_v60, %v2245_v47  ;;  %v11758_v63 = vsel %vm615_vm0, %v2274_v16, %v2276_v29  ;;  %v2206_v33 = vmul.f32 %v11598_v6, %v2163_v14  ;;  %v11775_v14 = vld [vmem:[#allocation11 + $0x244] ss:$8 sps:$4 sm:$0xff]  }
 0x311   : > { %v2207_v27 = vmul.f32 %v11604_v46, %v2164_v55  ;;  %v2165_v8 = vmax.f32 %v2135_v39, 0.0  ;;  %v2136_v40 = vadd.f32 %v11591_v12, %v2094_v0  ;;  %v2095_v45 = vadd.f32 %v2036_v35, %v11632_v23 }
 0x312   : > { %3242 = vmatpush1.bf16.msra.mxu0 %v11735_v50  ;;  %v2038_v24 = vpop.f32.mrf.mxu1  ;;  %v2442_v51 = vpack.c.bf16 %v11750_v18, %v11715_v59  ;;  %v2275_v15 = vrot.slane %v2245_v47, 4  ;;  %v11779_v55 = vadd.f32 %v11629_v36, %v13096_v42  ;;  %v13097_v47 = vld [vmem:[#allocation33_spill] sm:$0xff]  ;;  %v11805_v42 = vadd.f32 %v11601_v20, %v2206_v33  ;;  %v11820_v33 = vld [vmem:[#allocation11 + $0x234] ss:$8 sps:$4 sm:$0xff]  }
 0x313   : > { %v2208_v34 = vmul.f32 %v11598_v6, %v2165_v8  ;;  %v2166_v28 = vmax.f32 %v2136_v40, 0.0  ;;  %v2137_v53 = vadd.f32 %v11585_v54, %v2095_v45  ;;  %v2096_v23 = vadd.f32 %v2038_v24, %v11635_v32  ;;  %3243 = vmatprep.subr.bf16.mxu0 %v11741_v1  ;;  %v13098_v8 = vld [vmem:[#allocation34_spill] sm:$0xff] }
 0x314   : > { %v11783_v39 = vadd.f32 %v11647_v31, %v13097_v47  ;;  %2690 = vmatprep.mubr.bf16.mxu0 %v2442_v51  ;;  %v2040_v0 = vpop.f32.mrf.mxu1  ;;  %v11786_v35 = vadd.f32 %v11609_v38, %v2207_v27  ;;  %v11792_v32 = vsel %vm615_vm0, %v2275_v15, %v13038_v58  ;;  %v11796_v40 = vadd.f32 %v11661_v48, %v13098_v8  ;;  %v11802_v51 = vld [vmem:[#allocation11 + $0x240] ss:$8 sps:$4 sm:$0xff]   ;;  %v11911_v58 = vld [vmem:[#allocation11 + $0x210] ss:$8 sps:$4 sm:$0xff]  }
 0x315   : > { %v2209_v36 = vmul.f32 %v11604_v46, %v2166_v28  ;;  %v2138_v31 = vadd.f32 %v11591_v12, %v2096_v23  ;;  %v2097_v45 = vadd.f32 %v2040_v0, %v11638_v3  ;;  %2691 = vmatmul.mubr.bf16.gmra.mxu0 %v2441_v25  ;;  %v2167_v24 = vmax.f32 %v2137_v53, 0.0  ;;  %13102 = vst [vmem:[#allocation31_spill] sm:$0xff] %v11911_v58 }
 0x316   : > { %3244 = vmatpush1.bf16.msra.mxu0 %v11767_v22  ;;  %v2042_v27 = vpop.f32.mrf.mxu1  ;;  %v11808_v47 = vadd.f32 %v11601_v20, %v2208_v34  ;;  %v11814_v48 = vsel %vm615_vm0, %v2273_v37, %v2275_v15  ;;  %v2278_v25 = vrot.slane %v11750_v18, 4  ;;  %v13037_v19 = vrot.slane %v11786_v35, 4  ;;  %v11841_v18 = vld [vmem:[#allocation11 + $0x230] ss:$8 sps:$4 sm:$0xff]  }
 0x317   : > { %v2168_v3 = vmax.f32 %v2138_v31, 0.0  ;;  %v2139_v28 = vadd.f32 %v11585_v54, %v2097_v45  ;;  %v2098_v53 = vadd.f32 %v2042_v27, %v11641_v57  ;;  %3245 = vmatprep.subr.bf16.mxu0 %v11775_v14  ;;  %v11823_v34 = vadd.f32 %v11609_v38, %v2209_v36  ;;  %v13099_v31 = vld [vmem:[#allocation35_spill] sm:$0xff] }
 0x318   : > { %v2046_v23 = vpop.f32.mrf.mxu1  ;;  %v2443_v37 = vpack.c.bf16 %v11808_v47, %v11805_v42  ;;  %v11835_v45 = vadd.f32 %v11677_v56, %v13099_v31  ;;  %v2210_v36 = vmul.f32 %v11598_v6, %v2167_v24  ;;  %v11849_v24 = vld [vmem:[#allocation11 + $0x224] ss:$8 sps:$4 sm:$0xff]   ;;  %v2279_v31 = vrot.slane %v11805_v42, 4 }
 0x319   : > { %v2211_v15 = vmul.f32 %v11604_v46, %v2168_v3  ;;  %v2169_v0 = vmax.f32 %v2139_v28, 0.0  ;;  %v2140_v57 = vadd.f32 %v11591_v12, %v2098_v53  ;;  %v2099_v8 = vadd.f32 %v2046_v23, %v11650_v44 }
 0x31a   : > { %3246 = vmatpush1.bf16.msra.mxu0 %v11802_v51  ;;  %v2048_v27 = vpop.f32.mrf.mxu1  ;;  %v2444_v16 = vpack.c.bf16 %v11823_v34, %v11786_v35  ;;  %v13039_v49 = vrot.slane %v11808_v47, 4  ;;  %v11875_v3 = vadd.f32 %v11601_v20, %v2210_v36  ;;  %v2282_v36 = vrot.slane %v11823_v34, 4 }
 0x31b   : > { %v2212_v28 = vmul.f32 %v11598_v6, %v2169_v0  ;;  %v2170_v44 = vmax.f32 %v2140_v57, 0.0  ;;  %v2141_v53 = vadd.f32 %v11585_v54, %v2099_v8  ;;  %v2100_v56 = vadd.f32 %v2048_v27, %v11653_v30  ;;  %3247 = vmatprep.subr.bf16.mxu0 %v11820_v33  ;;  %v11872_v27 = vld [vmem:[#allocation11 + $0x220] ss:$8 sps:$4 sm:$0xff]  }
 0x31c   : > { %2700 = vmatprep.mubr.bf16.mxu0 %v2444_v16  ;;  %v2050_v23 = vpop.f32.mrf.mxu1  ;;  %v11857_v0 = vsel %vm615_vm0, %v2276_v29, %v2278_v25  ;;  %v11863_v30 = vsel %vm615_vm0, %v2278_v25, %v13037_v19  ;;  %v11869_v8 = vadd.f32 %v11609_v38, %v2211_v15  ;;  %13100 = vst [vmem:[#allocation39_spill] sm:$0xff] %v11872_v27 }
 0x31d   : > { %v2213_v57 = vmul.f32 %v11604_v46, %v2170_v44  ;;  %v2142_v16 = vadd.f32 %v11591_v12, %v2100_v56  ;;  %v2101_v42 = vadd.f32 %v2050_v23, %v11657_v13  ;;  %2701 = vmatmul.mubr.bf16.gmra.mxu0 %v2443_v37  ;;  %v2171_v59 = vmax.f32 %v2141_v53, 0.0  ;;  %v13101_v13 = vld [vmem:[#allocation36_spill] sm:$0xff]  ;;  %v11889_v23 = vld [vmem:[#allocation11 + $0x214] ss:$8 sps:$4 sm:$0xff]  }
 0x31e   : > { %3248 = vmatpush1.bf16.msra.mxu0 %v11841_v18  ;;  %v2052_v29 = vpop.f32.mrf.mxu1  ;;  %v11878_v25 = vadd.f32 %v11601_v20, %v2212_v28  ;;  %v11884_v37 = vadd.f32 %v11687_v62, %v13101_v13  ;;  %v11901_v62 = vsel %vm615_vm0, %v2279_v31, %v13039_v49  ;;  %v11923_v49 = vld [vmem:[#allocation11 + $0x204] ss:$8 sps:$4 sm:$0xff]  }
 0x31f   : > { %v2172_v15 = vmax.f32 %v2142_v16, 0.0  ;;  %v2143_v53 = vadd.f32 %v11585_v54, %v2101_v42  ;;  %v2102_v56 = vadd.f32 %v2052_v29, %v11665_v43  ;;  %3249 = vmatprep.subr.bf16.mxu0 %v11849_v24  ;;  %v11893_v17 = vadd.f32 %v11609_v38, %v2213_v57  ;;  %13104 = vst [vmem:[#allocation32_spill] sm:$0xff] %v11923_v49 }
 0x320   : > { %v2056_v28 = vpop.f32.mrf.mxu1  ;;  %v2445_v44 = vpack.c.bf16 %v11878_v25, %v11875_v3  ;;  %v2214_v29 = vmul.f32 %v11598_v6, %v2171_v59 }
 0x321   : > { %v2173_v43 = vmax.f32 %v2143_v53, 0.0  ;;  %v2144_v16 = vadd.f32 %v11591_v12, %v2102_v56  ;;  %v2103_v42 = vadd.f32 %v2056_v28, %v11673_v26  ;;  %v2215_v57 = vmul.f32 %v11604_v46, %v2172_v15 }
 0x322   : > { %3250 = vmatpush1.bf16.msra.mxu0 %v11872_v27  ;;  %v2058_v13 = vpop.f32.mrf.mxu1  ;;  %v2446_v19 = vpack.c.bf16 %v11893_v17, %v11869_v8  ;;  %v13103_v53 = vrot.slane %v11727_v60, 4  ;;  %v2283_v27 = vrot.slane %v11875_v3, 4  ;;  %v13105_v60 = vrot.slane %v11786_v35, 4 }
 0x323   : > { %v2216_v26 = vmul.f32 %v11598_v6, %v2173_v43  ;;  %v2174_v28 = vmax.f32 %v2144_v16, 0.0  ;;  %v2145_v59 = vadd.f32 %v11585_v54, %v2103_v42  ;;  %v2104_v15 = vadd.f32 %v2058_v13, %v11685_v7  ;;  %3251 = vmatprep.subr.bf16.mxu0 %v11889_v23 }
 0x324   : > { %v11917_v56 = vsel %vm615_vm0, %v13103_v53, %v2279_v31  ;;  %2710 = vmatprep.mubr.bf16.mxu0 %v2446_v19  ;;  %v2060_v34 = vpop.f32.mrf.mxu1  ;;  %v11930_v31 = vsel %vm615_vm0, %v13105_v60, %v2282_v36  ;;  %v11941_v53 = vld [vmem:[#allocation11 + $0x200] ss:$8 sps:$4 sm:$0xff]   ;;  %v11944_v60 = vadd.f32 %v11609_v38, %v2215_v57  ;;  %v11947_v7 = vadd.f32 %v11601_v20, %v2214_v29 }
 0x325   : > { %v2217_v16 = vmul.f32 %v11604_v46, %v2174_v28  ;;  %v2175_v42 = vmax.f32 %v2145_v59, 0.0  ;;  %v2146_v19 = vadd.f32 %v11591_v12, %v2104_v15  ;;  %v2105_v13 = vadd.f32 %v2060_v34, %v11695_v61  ;;  %2711 = vmatmul.mubr.bf16.gmra.mxu0 %v2445_v44  ;;  %13106 = vst [vmem:[#allocation33_spill] sm:$0xff] %v11941_v53  ;;  %v11955_v34 = vld [vmem:[#allocation11 + $0x2f4] ss:$8 sps:$4 sm:$0xff]  }
 0x326   : > { %3252 = vmatpush1.bf16.msra.mxu0 %v11911_v58  ;;  %v2062_v3 = vpop.f32.mrf.mxu1  ;;  %v11950_v28 = vadd.f32 %v11601_v20, %v2216_v26  ;;  %13107 = vst [vmem:[#allocation34_spill] sm:$0xff] %v11955_v34  ;;  %v13108_v15 = vrot.slane %v11869_v8, 4  ;;  %v2286_v26 = vrot.slane %v11893_v17, 4  ;;  %v13111_v58 = vrot.slane %v11869_v8, 4 }
 0x327   : > { %v2176_v59 = vmax.f32 %v2146_v19, 0.0  ;;  %v2147_v61 = vadd.f32 %v11585_v54, %v2105_v13  ;;  %v2106_v44 = vadd.f32 %v2062_v3, %v11719_v41  ;;  %3253 = vmatprep.subr.bf16.mxu0 %v11923_v49  ;;  %v2218_v29 = vmul.f32 %v11598_v6, %v2175_v42 }
 0x328   : > { %v11961_v57 = vsel %vm615_vm0, %v2282_v36, %v13108_v15  ;;  %v2066_v43 = vpop.f32.mrf.mxu1  ;;  %v11966_v19 = vadd.f32 %v11609_v38, %v2217_v16  ;;  %v2447_v41 = vpack.c.bf16 %v11950_v28, %v11947_v7  ;;  %v2288_v42 = vrot.slane %v11944_v60, 4  ;;  %v11978_v15 = vld [vmem:[#allocation11 + $0x2f0] ss:$8 sps:$4 sm:$0xff]  }
 0x329   : > { %v2219_v13 = vmul.f32 %v11604_v46, %v2176_v59  ;;  %v2177_v3 = vmax.f32 %v2147_v61, 0.0  ;;  %v2148_v35 = vadd.f32 %v11591_v12, %v2106_v44  ;;  %v2107_v49 = vadd.f32 %v2066_v43, %v11731_v10  ;;  %13109 = vst [vmem:[#allocation35_spill] sm:$0xff] %v11978_v15 }
 0x32a   : > { %3254 = vmatpush1.bf16.msra.mxu0 %v11941_v53  ;;  %v2068_v36 = vpop.f32.mrf.mxu1  ;;  %v2448_v17 = vpack.c.bf16 %v11966_v19, %v11944_v60  ;;  %v11986_v53 = vld [vmem:[#allocation11 + $0x2e4] ss:$8 sps:$4 sm:$0xff]   ;;  %v11989_v16 = vadd.f32 %v11601_v20, %v2218_v29  ;;  %v11995_v59 = vsel %vm615_vm0, %v13111_v58, %v2286_v26 }
 0x32b   : > { %v2220_v61 = vmul.f32 %v11598_v6, %v2177_v3  ;;  %v2178_v44 = vmax.f32 %v2148_v35, 0.0  ;;  %v2149_v10 = vadd.f32 %v11585_v54, %v2107_v49  ;;  %v2108_v43 = vadd.f32 %v2068_v36, %v11779_v55  ;;  %3255 = vmatprep.subr.bf16.mxu0 %v11955_v34  ;;  %13110 = vst [vmem:[#allocation36_spill] sm:$0xff] %v11986_v53  ;;  %v12016_v34 = vld [vmem:[#allocation11 + $0x2e0] ss:$8 sps:$4 sm:$0xff]  }
 0x32c   : > { %2720 = vmatprep.mubr.bf16.mxu0 %v2448_v17  ;;  %v2070_v60 = vpop.f32.mrf.mxu1  ;;  %v13112_v35 = vrot.slane %v11878_v25, 4  ;;  %v13113_v55 = vrot.slane %v11808_v47, 4  ;;  %v12013_v58 = vadd.f32 %v11609_v38, %v2219_v13  ;;  %13114 = vst [vmem:[#allocation40_spill] sm:$0xff] %v12016_v34 }
 0x32d   : > { %v2221_v29 = vmul.f32 %v11604_v46, %v2178_v44  ;;  %v2150_v8 = vadd.f32 %v11591_v12, %v2108_v43  ;;  %v2109_v36 = vadd.f32 %v2070_v60, %v11783_v39  ;;  %2721 = vmatmul.mubr.bf16.gmra.mxu0 %v2447_v41  ;;  %v2179_v17 = vmax.f32 %v2149_v10, 0.0  ;;  %v12029_v43 = vld [vmem:[#allocation11 + $0x2d4] ss:$8 sps:$4 sm:$0xff]  }
 0x32e   : > { %v12001_v49 = vsel %vm615_vm0, %v2283_v27, %v13112_v35  ;;  %v12007_v3 = vsel %vm615_vm0, %v13113_v55, %v2283_v27  ;;  %3256 = vmatpush2.bf16.msra.mxu0 %v11978_v15  ;;  %v2072_v35 = vpop.f32.mrf.mxu1  ;;  %v12019_v47 = vadd.f32 %v11601_v20, %v2220_v61  ;;  %v2290_v61 = vrot.slane %v11966_v19, 4  ;;  %v12046_v15 = vld [vmem:[#allocation11 + $0x2d0] ss:$8 sps:$4 sm:$0xff]  }
 0x32f   : > { %v2180_v39 = vmax.f32 %v2150_v8, 0.0  ;;  %v2151_v41 = vadd.f32 %v11585_v54, %v2109_v36  ;;  %v2110_v10 = vadd.f32 %v2072_v35, %v11796_v40  ;;  %3257 = vmatprep.subr.bf16.mxu0 %v11986_v53  ;;  %v12033_v55 = vadd.f32 %v11609_v38, %v2221_v29 }
 0x330   : > { %v2076_v60 = vpop.f32.mrf.mxu1  ;;  %v2291_v27 = vrot.slane %v11989_v16, 4  ;;  %v2449_v8 = vpack.c.bf16 %v12019_v47, %v11989_v16  ;;  %v2222_v13 = vmul.f32 %v11598_v6, %v2179_v17  ;;  %v2292_v29 = vrot.slane %v12013_v58, 4 }
 0x331   : > { %v2223_v36 = vmul.f32 %v11604_v46, %v2180_v39  ;;  %v2181_v44 = vmax.f32 %v2151_v41, 0.0  ;;  %v2152_v40 = vadd.f32 %v11591_v12, %v2110_v10  ;;  %v2111_v35 = vadd.f32 %v2076_v60, %v11835_v45  ;;  %v12056_v10 = vld [vmem:[#allocation11 + $0x2c4] ss:$8 sps:$4 sm:$0xff]  }
 0x332   : > { %3258 = vmatpush2.bf16.msra.mxu0 %v12016_v34  ;;  %v2078_v19 = vpop.f32.mrf.mxu1  ;;  %v2450_v53 = vpack.c.bf16 %v12033_v55, %v12013_v58  ;;  %v12050_v16 = vsel %vm615_vm0, %v2286_v26, %v2288_v42  ;;  %v2293_v58 = vrot.slane %v12019_v47, 4  ;;  %v12064_v26 = vsel %vm615_vm0, %v2288_v42, %v2290_v61 }
 0x333   : > { %v2224_v39 = vmul.f32 %v11598_v6, %v2181_v44  ;;  %v2182_v41 = vmax.f32 %v2152_v40, 0.0  ;;  %v2153_v45 = vadd.f32 %v11585_v54, %v2111_v35  ;;  %v2112_v17 = vadd.f32 %v2078_v19, %v11884_v37  ;;  %3259 = vmatprep.subr.bf16.mxu0 %v12029_v43  ;;  %v12097_v54 = vld [vmem:[#allocation11 + $0x2b4] ss:$8 sps:$4 sm:$0xff]  }
 0x334   : > { %2730 = vmatprep.mubr.bf16.mxu0 %v2450_v53  ;;  %v2080_v60 = vpop.f32.mrf.mxu1  ;;  %v12060_v34 = vadd.f32 %v11609_v38, %v2223_v36  ;;  %v12072_v36 = vld [vmem:[#allocation11 + $0x2c0] ss:$8 sps:$4 sm:$0xff]   ;;  %v2265_v42 = vadd.f32 %v11601_v20, %v2222_v13  ;;  %v13115_v19 = vrot.slane %v11950_v28, 4 }
 0x335   : > { %v2225_v37 = vmul.f32 %v11604_v46, %v2182_v41  ;;  %v2183_v44 = vmax.f32 %v2153_v45, 0.0  ;;  %v2154_v40 = vadd.f32 %v11591_v12, %v2112_v17  ;;  %2731 = vmatmul.mubr.bf16.gmra.mxu0 %v2449_v8  ;;  %v2267_v53 = vadd.f32 %v11601_v20, %v2224_v39 }
 0x336   : > { %3260 = vmatpush2.bf16.msra.mxu0 %v12046_v15  ;;  %v2081_v47 = vpop.f32.mrf.mxu1  ;;  %v13048_v35 = vrot.slane %v12060_v34, 4  ;;  %v13116_v60 = vrot.slane %v11947_v7, 4  ;;  %v13118_v8 = vrot.slane %v11878_v25, 4  ;;  %v12184_v25 = vld [vmem:[#allocation11 + $0x294] ss:$8 sps:$4 sm:$0xff]  }
 0x337   : > { %v2226_v45 = vmul.f32 %v11598_v6, %v2183_v44  ;;  %v2184_v17 = vmax.f32 %v2154_v40, 0.0  ;;  %3261 = vmatprep.subr.bf16.mxu0 %v12056_v10  ;;  %v12095_v13 = vadd.f32 %v11609_v38, %v2225_v37  ;;  %v2297_v47 = vrot.slane %v2267_v53, 4 }
 0x338   : > { %v12082_v41 = vsel %vm615_vm0, %v13116_v60, %v13115_v19  ;;  %v13117_v12 = vmov %v13116_v60  ;;  %v2451_v19 = vpack.c.bf16 %v2267_v53, %v2265_v42  ;;  %v12105_v60 = vsel %vm615_vm0, %v2290_v61, %v2292_v29 }
 0x339   : > { %v12090_v39 = vsel %vm615_vm0, %v13118_v8, %v13117_v12  ;;  %v2227_v6 = vmul.f32 %v11604_v46, %v2184_v17  ;;  %v2294_v44 = vrot.slane %v12033_v55, 4  ;;  %v2452_v37 = vpack.c.bf16 %v12095_v13, %v12060_v34  ;;  %v12113_v12 = vld [vmem:[#allocation11 + $0x2b0] ss:$8 sps:$4 sm:$0xff]   ;;  %v12159_v17 = vld [vmem:[#allocation11 + $0x2a0] ss:$8 sps:$4 sm:$0xff]  }
 0x33a   : > { %v2399_v7 = vpack.c.bf16 %v12082_v41, %v12090_v39  ;;  %v2269_v40 = vadd.f32 %v11601_v20, %v2226_v45  ;;  %3262 = vmatpush2.bf16.msra.mxu0 %v12072_v36  ;;  %v2295_v53 = vrot.slane %v2265_v42, 4  ;;  %v12119_v61 = vsel %vm615_vm0, %v2291_v27, %v2293_v58  ;;  %v12131_v42 = vld [vmem:[#allocation11 + $0x2a4] ss:$8 sps:$4 sm:$0xff]  }
 0x33b   : > { %v13119_v46 = vrot.slane %v11950_v28, 4  ;;  %2740 = vmatprep.mubr.bf16.mxu0 %v2452_v37  ;;  %3263 = vmatprep.subr.bf16.mxu0 %v12097_v54  ;;  %v12129_v20 = vadd.f32 %v11609_v38, %v2227_v6  ;;  %v12141_v28 = vsel %vm615_vm0, %v2294_v44, %v13048_v35  ;;  %v13120_v37 = vrot.slane %v11644_v4, 4 }
 0x33c   : > { %v2299_v45 = vrot.slane %v2269_v40, 4  ;;  %v12156_v8 = vsel %vm615_vm0, %v2292_v29, %v2294_v44  ;;  %v13121_v29 = vrot.slane %v11690_v2, 4  ;;  %v2394_v2 = vpack.c.bf16 %v11857_v0, %v11758_v63 }
 0x33d   : > { %v12125_v55 = vsel %vm615_vm0, %v13119_v46, %v2291_v27  ;;  %v12145_v27 = vsel %vm615_vm0, %v2295_v53, %v2297_v47  ;;  %2741 = vmatmul.mubr.bf16.gmra.mxu0 %v2451_v19  ;;  %v2300_v38 = vrot.slane %v12129_v20, 4  ;;  %v2454_v6 = vpack.c.bf16 %v12129_v20, %v12129_v20 }
 0x33e   : > { %v2329_v46 = vsel %vm615_vm0, %v2299_v45, %v13120_v37  ;;  %3264 = vmatpush2.bf16.msra.mxu0 %v12113_v12  ;;  %v12168_v4 = vsel %vm615_vm0, %v2297_v47, %v2299_v45  ;;  %v12172_v37 = vsel %vm615_vm0, %v2293_v58, %v2295_v53  ;;  %v2453_v47 = vpack.c.bf16 %v2269_v40, %v2269_v40  ;;  %v12208_v53 = vld [vmem:[#allocation11 + $0x284] ss:$8 sps:$4 sm:$0xff]  }
 0x33f   : > { %v2331_v19 = vsel %vm615_vm0, %v11703_v21, %v2329_v46  ;;  %2750 = vmatprep.mubr.bf16.mxu0 %v2454_v6  ;;  %3265 = vmatprep.subr.bf16.mxu0 %v12131_v42  ;;  %v12181_v44 = vsel %vm615_vm0, %v2300_v38, %v13121_v29  ;;  %v12198_v6 = vld [vmem:[#allocation11 + $0x290] ss:$8 sps:$4 sm:$0xff]   ;;  %v12203_v29 = vsel %vm644_vm1, %v12168_v4, %v2329_v46 }
 0x340   : > { %v2391_v35 = vpack.c.bf16 %v11703_v21, %v2331_v19  ;;  %v2332_v58 = vsel %vm615_vm0, %v11747_v5, %v12181_v44  ;;  %v13123_v46 = vpack.c.bf16 %v11758_v63, %v11747_v5  ;;  %v13129_v63 = vpack.c.bf16 %v11961_v57, %v11930_v31 }
 0x341   : > { %v2392_v45 = vpack.c.bf16 %v11747_v5, %v2332_v58  ;;  %v12212_v58 = vld [vmem:[#allocation11 + $0x280] ss:$8 sps:$4 sm:$0xff]   ;;  %v13125_v5 = vpack.c.bf16 %v11814_v48, %v11703_v21  ;;  %v13127_v21 = vpack.c.bf16 %v11901_v62, %v11917_v56  ;;  %v2405_v11 = vpack.c.bf16 %v12168_v4, %v12168_v4 }
 0x342   : > { %3266 = vmatpush2.bf16.msra.mxu0 %v12159_v17 }
 0x343   : > { %2951 = vmatprep.mubr.bf16.mxu1 %v2392_v45  ;;  %3267 = vmatprep.subr.bf16.mxu0 %v12184_v25 }
 0x344   : > { %2952 = vmatmul.mubr.bf16.vlgmr.msra.gmra.mxu1 %v2391_v35  ;;  %v13124_v35 = vpack.c.bf16 %v11792_v32, %v11814_v48  ;;  %v13133_v48 = vld [vmem:[#allocation31_spill] sm:$0xff] }
 0x345   : > { %2751 = vmatmul.mubr.bf16.gmra.mxu0 %v2453_v47  ;;  %2961 = vmatprep.mubr.bf16.mxu1 %v2394_v2 }
 0x346   : > { %9239 = vmatpush1.bf16.msra.mxu1 %v11709_v52  ;;  %3268 = vmatpush2.bf16.msra.mxu0 %v12198_v6  ;;  %v2396_v52 = vpack.c.bf16 %v11930_v31, %v11863_v30  ;;  %v13140_v31 = vpack.c.bf16 %v12105_v60, %v12064_v26 }
 0x347   : > { %3271 = vmatprep.mubr.bf16.mxu0 %v13123_v46  ;;  %9224 = vmatprep.subr.bf16.mxu1 %v11712_v9  ;;  %v13126_v9 = vpack.c.bf16 %v11863_v30, %v11857_v0  ;;  %v13137_v0 = vld [vmem:[#allocation34_spill] sm:$0xff]  ;;  %v2402_v30 = vpack.c.bf16 %v12156_v8, %v12105_v60 }
 0x348   : > { %3269 = vmatprep.subr.bf16.mxu0 %v12208_v53 }
 0x34a   : > { %9240 = vmatpush1.bf16.msra.mxu1 %v11735_v50  ;;  %3270 = vmatpush2.bf16.msra.mxu0 %v12212_v58  ;;  %v2398_v50 = vpack.c.bf16 %v11995_v59, %v11961_v57  ;;  %v13141_v57 = vld [vmem:[#allocation36_spill] sm:$0xff] }
 0x34b   : > { %9225 = vmatprep.subr.bf16.mxu1 %v11741_v1  ;;  %v13128_v1 = vpack.c.bf16 %v11917_v56, %v11792_v32  ;;  %v13131_v32 = vpack.c.bf16 %v12001_v49, %v12007_v3  ;;  %v13139_v56 = vld [vmem:[#allocation35_spill] sm:$0xff] }
 0x34c   : > { %2962 = vmatmul.mubr.bf16.gmra.mxu1 %v13124_v35 }
 0x34d   : > { %3272 = vmatmul.mubr.bf16.vlgmr.msra.gmra.mxu0 %v13125_v5  ;;  %2971 = vmatprep.mubr.bf16.mxu1 %v2396_v52 }
 0x34e   : > { %9241 = vmatpush1.bf16.msra.mxu1 %v11767_v22  ;;  %3281 = vmatprep.mubr.bf16.mxu0 %v13126_v9  ;;  %v13130_v22 = vld [vmem:[#allocation39_spill] sm:$0xff] }
 0x34f   : > { %9226 = vmatprep.subr.bf16.mxu1 %v11775_v14  ;;  %v2400_v14 = vpack.c.bf16 %v12064_v26, %v12050_v16  ;;  %v13145_v26 = vpack.c.bf16 %v12125_v55, %v12082_v41 }
 0x352   : > { %9242 = vmatpush1.bf16.msra.mxu1 %v11802_v51  ;;  %v13132_v51 = vpack.c.bf16 %v12007_v3, %v11901_v62  ;;  %v13138_v62 = vpack.c.bf16 %v12090_v39, %v12001_v49  ;;  %v13144_v39 = vpack.c.bf16 %v12119_v61, %v12125_v55 }
 0x353   : > { %9227 = vmatprep.subr.bf16.mxu1 %v11820_v33  ;;  %v13134_v33 = vpack.c.bf16 %v12050_v16, %v11995_v59  ;;  %v13142_v59 = vrot.slane %v12060_v34, 4  ;;  %v13143_v16 = vld [vmem:[#allocation40_spill] sm:$0xff]  ;;  %v13146_v34 = vpack.c.bf16 %v12141_v28, %v12156_v8 }
 0x354   : > { %2972 = vmatmul.mubr.bf16.gmra.mxu1 %v13127_v21 }
 0x355   : > { %3282 = vmatmul.mubr.bf16.gmra.mxu0 %v13128_v1  ;;  %2981 = vmatprep.mubr.bf16.mxu1 %v2398_v50 }
 0x356   : > { %9243 = vmatpush1.bf16.msra.mxu1 %v11841_v18  ;;  %3291 = vmatprep.mubr.bf16.mxu0 %v13129_v63  ;;  %v13135_v18 = vld [vmem:[#allocation32_spill] sm:$0xff] }
 0x357   : > { %9228 = vmatprep.subr.bf16.mxu1 %v11849_v24  ;;  %v13136_v24 = vld [vmem:[#allocation33_spill] sm:$0xff] }
 0x35a   : > { %9244 = vmatpush1.bf16.msra.mxu1 %v13130_v22 }
 0x35b   : > { %9229 = vmatprep.subr.bf16.mxu1 %v11889_v23  ;;  %v2298_v23 = vrot.slane %v12095_v13, 4  ;;  %v13147_v13 = vpack.c.bf16 %v12145_v27, %v12172_v37 }
 0x35c   : > { %2982 = vmatmul.mubr.bf16.gmra.mxu1 %v13131_v32  ;;  %v3380_v32 = vld [vmem:[#allocation12] ss:$4 sm:$0x3] }
 0x35d   : > { %3292 = vmatmul.mubr.bf16.gmra.mxu0 %v13132_v51  ;;  %2991 = vmatprep.mubr.bf16.mxu1 %v2400_v14  ;;  %v2304_v3 = vsel %vm615_vm0, %v13142_v59, %v2298_v23  ;;  %v13151_v59 = vld [vmem:[#allocation38_spill] sm:$0xff] }
 0x35e   : > { %9245 = vmatpush1.bf16.msra.mxu1 %v13133_v48  ;;  %3301 = vmatprep.mubr.bf16.mxu0 %v13134_v33  ;;  %v2404_v49 = vpack.c.bf16 %v2304_v3, %v12141_v28 }
 0x35f   : > { %9230 = vmatprep.subr.bf16.mxu1 %v13135_v18 }
 0x362   : > { %9246 = vmatpush1.bf16.msra.mxu1 %v13136_v24  ;;  %v13150_v24 = vld [vmem:[#allocation37_spill] sm:$0xff] }
 0x363   : > { %9231 = vmatprep.subr.bf16.mxu1 %v13137_v0  ;;  %v12381_v0 = vrot.slane %v3380_v32, %v13150_v24 }
 0x364   : > { %2992 = vmatmul.mubr.bf16.gmra.mxu1 %v2399_v7  ;;  %v13149_v7 = vpack.c.bf16 %v12168_v4, %v12145_v27 }
 0x365   : > { %3302 = vmatmul.mubr.bf16.gmra.mxu0 %v13138_v62  ;;  %3001 = vmatprep.mubr.bf16.mxu1 %v2402_v30 }
 0x366   : > { %9247 = vmatpush2.bf16.msra.mxu1 %v13139_v56  ;;  %3311 = vmatprep.mubr.bf16.mxu0 %v13140_v31  ;;  %v3496_v31 = vld [vmem:[#allocation12 + $0x2] ss:$4 sm:$0x3] }
 0x367   : > { %9232 = vmatprep.subr.bf16.mxu1 %v13141_v57 }
 0x36a   : > { %9248 = vmatpush2.bf16.msra.mxu1 %v13143_v16 }
 0x36b   : > { %9233 = vmatprep.subr.bf16.mxu1 %v12029_v43  ;;  %v2302_v43 = vsel %vm615_vm0, %v2298_v23, %v2300_v38  ;;  %v3453_v23 = vld [vmem:[#allocation12 + $0x1] ss:$4 sm:$0x3] }
 0x36c   : > { %3002 = vmatmul.mubr.bf16.gmra.mxu1 %v13144_v39  ;;  %v2406_v41 = vpack.c.bf16 %v2302_v43, %v2302_v43 }
 0x36d   : > { %3312 = vmatmul.mubr.bf16.gmra.mxu0 %v13145_v26  ;;  %3011 = vmatprep.mubr.bf16.mxu1 %v2404_v49  ;;  %v12388_v26 = vrot.slane %v3453_v23, %v13150_v24 }
 0x36e   : > { %9249 = vmatpush2.bf16.msra.mxu1 %v12046_v15  ;;  %3321 = vmatprep.mubr.bf16.mxu0 %v13146_v34  ;;  %v13148_v15 = vpack.c.bf16 %v12172_v37, %v12119_v61 }
 0x36f   : > { %9234 = vmatprep.subr.bf16.mxu1 %v12056_v10  ;;  %v3043_v10 = vpack.c.bf16 %v2302_v43, %v2304_v3  ;;  %v12384_v3 = vrot.slane %v3380_v32, %v13151_v59 }
 0x372   : > { %9250 = vmatpush2.bf16.msra.mxu1 %v12072_v36 }
 0x373   : > { %9235 = vmatprep.subr.bf16.mxu1 %v12097_v54  ;;  %v2390_v54 = vsel %vm644_vm1, %v2302_v43, %v12181_v44 }
 0x374   : > { %3012 = vmatmul.mubr.bf16.gmra.mxu1 %v13147_v13  ;;  %v3045_v36 = vpack.c.bf16 %v2390_v54, %v2390_v54  ;;  %v12394_v13 = vrot.slane %v3453_v23, %v13151_v59 }
 0x375   : > { %3322 = vmatmul.mubr.bf16.gmra.mxu0 %v13148_v15  ;;  %3021 = vmatprep.mubr.bf16.mxu1 %v2406_v41  ;;  %v12391_v41 = vrot.slane %v3496_v31, %v13150_v24 }
 0x376   : > { %9251 = vmatpush2.bf16.msra.mxu1 %v12113_v12 }
 0x377   : > { %9236 = vmatprep.subr.bf16.mxu1 %v12131_v42 }
 0x37a   : > { %9252 = vmatpush2.bf16.msra.mxu1 %v12159_v17 }
 0x37b   : > { %9237 = vmatprep.subr.bf16.mxu1 %v12184_v25  ;;  %v3044_v25 = vpack.c.bf16 %v12203_v29, %v12203_v29 }
 0x37c   : > { %3022 = vmatmul.mubr.bf16.gmra.mxu1 %v2405_v11 }
 0x37d   : > { %3331 = vmatprep.mubr.bf16.mxu1 %v3043_v10 }
 0x37e   : > { %9253 = vmatpush2.bf16.msra.mxu1 %v12198_v6 }
 0x37f   : > { %9238 = vmatprep.subr.bf16.mxu1 %v12208_v53 }
 0x382   : > { %9254 = vmatpush2.bf16.msra.mxu1 %v12212_v58 }
 0x385   : > { %3332 = vmatmul.mubr.bf16.vlgmr.msra.gmra.mxu1 %v13149_v7 }
 0x386   : > { %3341 = vmatprep.mubr.bf16.mxu1 %v3045_v36 }
 0x38d   : > { %3342 = vmatmul.mubr.bf16.gmra.mxu1 %v3044_v25  ;;  %v12398_v25 = vrot.slane %v3496_v31, %v13151_v59 }
 0x3cd   : > { %v2682_v60 = vpop.f32.mrf.mxu0 }
 0x3cf   : > { %v2684_v40 = vpop.f32.mrf.mxu0 }
 0x3d1   : > { %v2686_v12 = vpop.f32.mrf.mxu0 }
 0x3d3   : > { %v2688_v8 = vpop.f32.mrf.mxu0 }
 0x3d5   : > { %v12328_v61 = vpop.f32.mrf.mxu0 }
 0x3d7   : > { %v12330_v55 = vpop.f32.mrf.mxu0 }
 0x3d9   : > { %v12332_v20 = vpop.f32.mrf.mxu0 }
 0x3db   : > { %v12334_v42 = vpop.f32.mrf.mxu0 }
 0x3dd   : > { %v12336_v17 = vpop.f32.mrf.mxu0 }
 0x3df   : > { %v12338_v28 = vpop.f32.mrf.mxu0 }
 0x3e1   : > { %v12340_v27 = vpop.f32.mrf.mxu0 }
 0x3e3   : > { %v12342_v38 = vpop.f32.mrf.mxu0 }
 0x3e5   : > { %v12344_v4 = vpop.f32.mrf.mxu0 }
 0x3e7   : > { %v12346_v37 = vpop.f32.mrf.mxu0 }
 0x3e9   : > { %v12348_v44 = vpop.f32.mrf.mxu0 }
 0x3eb   : > { %v12350_v47 = vpop.f32.mrf.mxu0 }
 0x3ed   : > { %v12352_v2 = vpop.f32.mrf.mxu0 }
 0x3ef   : > { %v12354_v53 = vpop.f32.mrf.mxu0 }
 0x3f1   : > { %v12356_v45 = vpop.f32.mrf.mxu0 }
 0x3f3   : > { %v12358_v6 = vpop.f32.mrf.mxu0 }
 0x3f5   : > { %v12360_v19 = vpop.f32.mrf.mxu0 }
 0x3f7   : > { %v12362_v29 = vpop.f32.mrf.mxu0 }
 0x3f9   : > { %v12364_v58 = vpop.f32.mrf.mxu0 }
 0x3fb   : > { %v12366_v46 = vpop.f32.mrf.mxu0 }
 0x3fd   : > { %v12368_v52 = vpop.f32.mrf.mxu0 }
 0x3ff   : > { %v12370_v35 = vpop.f32.mrf.mxu0 }
 0x401   : > { %v12372_v5 = vpop.f32.mrf.mxu0 }
 0x403   : > { %v12374_v9 = vpop.f32.mrf.mxu0 }
 0x404   : > { %v2953_v50 = vpop.f32.mrf.mxu1 }
 0x405   : > { %v12376_v21 = vpop.f32.mrf.mxu0  ;;  %v2954_v33 = vadd.f32 %v2953_v50, %v2682_v60 }
 0x406   : > { %v2955_v1 = vpop.f32.mrf.mxu1 }
 0x407   : > { %v12378_v63 = vpop.f32.mrf.mxu0  ;;  %v2956_v62 = vadd.f32 %v2955_v1, %v2684_v40 }
 0x408   : > { %v2957_v22 = vpop.f32.mrf.mxu1 }
 0x409   : > { %v2756_v14 = vpop.f32.mrf.mxu0  ;;  %v2958_v49 = vadd.f32 %v2957_v22, %v2686_v12 }
 0x40a   : > { %v2959_v51 = vpop.f32.mrf.mxu1 }
 0x40b   : > { %v2757_v48 = vpop.f32.mrf.mxu0  ;;  %v2960_v11 = vadd.f32 %v2959_v51, %v2688_v8 }
 0x40c   : > { %v2963_v18 = vpop.f32.mrf.mxu1 }
 0x40d   : > { %v3273_v30 = vpop.f32.mrf.mxu0  ;;  %v2964_v14 = vadd.f32 %v2963_v18, %v12328_v61 }
 0x40e   : > { %v3350_v56 = vadd.f32 %v3273_v30, %v2954_v33  ;;  %v2965_v57 = vpop.f32.mrf.mxu1 }
 0x40f   : > { %v3275_v16 = vpop.f32.mrf.mxu0  ;;  %v2966_v8 = vadd.f32 %v2965_v57, %v12330_v55 }
 0x410   : > { %v3392_v39 = vadd.f32 %v12381_v0, %v3350_v56  ;;  %v3351_v34 = vadd.f32 %v3275_v16, %v2956_v62  ;;  %v2967_v43 = vpop.f32.mrf.mxu1 }
 0x411   : > { %v3277_v15 = vpop.f32.mrf.mxu0  ;;  %v2968_v23 = vadd.f32 %v2967_v43, %v12332_v20 }
 0x412   : > { %v3422_v10 = vmax.f32 %v3392_v39, 0.0  ;;  %v3393_v54 = vadd.f32 %v12384_v3, %v3351_v34  ;;  %v3352_v36 = vadd.f32 %v3277_v15, %v2958_v49  ;;  %v2969_v7 = vpop.f32.mrf.mxu1 }
 0x413   : > { %v3279_v60 = vpop.f32.mrf.mxu0  ;;  %v2970_v59 = vadd.f32 %v2969_v7, %v12334_v42 }
 0x414   : > { %v3465_v40 = vmul.f32 %v12388_v26, %v3422_v10  ;;  %v3423_v12 = vmax.f32 %v3393_v54, 0.0  ;;  %v3394_v50 = vadd.f32 %v12381_v0, %v3352_v36  ;;  %v3353_v1 = vadd.f32 %v3279_v60, %v2960_v11  ;;  %v2973_v22 = vpop.f32.mrf.mxu1 }
 0x415   : > { %v3283_v32 = vpop.f32.mrf.mxu0  ;;  %v2974_v11 = vadd.f32 %v2973_v22, %v12336_v17 }
 0x416   : > { %v3508_v51 = vadd.f32 %v12391_v41, %v3465_v40  ;;  %v3466_v48 = vmul.f32 %v12394_v13, %v3423_v12  ;;  %v3424_v33 = vmax.f32 %v3394_v50, 0.0  ;;  %v3395_v24 = vadd.f32 %v12384_v3, %v3353_v1  ;;  %v2975_v30 = vpop.f32.mrf.mxu1 }
 0x417   : > { %v3354_v62 = vadd.f32 %v3283_v32, %v2964_v14  ;;  %v3285_v56 = vpop.f32.mrf.mxu0 }
 0x418   : > { %3538 = vst [vmem:[#allocation2] sm:$0xff] %v3508_v51  ;;  %v3509_v31 = vadd.f32 %v12398_v25, %v3466_v48  ;;  %v3467_v61 = vmul.f32 %v12388_v26, %v3424_v33  ;;  %v3425_v18 = vmax.f32 %v3395_v24, 0.0  ;;  %v3355_v55 = vadd.f32 %v3285_v56, %v2966_v8  ;;  %v2977_v57 = vpop.f32.mrf.mxu1 }
 0x419   : > { %v3396_v16 = vadd.f32 %v12381_v0, %v3354_v62  ;;  %v3287_v49 = vpop.f32.mrf.mxu0  ;;  %v2976_v51 = vadd.f32 %v2975_v30, %v12338_v28  ;;  %v2978_v48 = vadd.f32 %v2977_v57, %v12340_v27 }
 0x41a   : > { %3539 = vst [vmem:[#allocation2 + $0x8] sm:$0xff] %v3509_v31  ;;  %v3510_v39 = vadd.f32 %v12391_v41, %v3467_v61  ;;  %v3468_v20 = vmul.f32 %v12394_v13, %v3425_v18  ;;  %v3397_v34 = vadd.f32 %v12384_v3, %v3355_v55  ;;  %v3356_v43 = vadd.f32 %v3287_v49, %v2968_v23  ;;  %v2979_v15 = vpop.f32.mrf.mxu1 }
 0x41b   : > { %v3426_v10 = vmax.f32 %v3396_v16, 0.0  ;;  %v3289_v54 = vpop.f32.mrf.mxu0  ;;  %v2980_v61 = vadd.f32 %v2979_v15, %v12342_v38 }
 0x41c   : > { %3540 = vst [vmem:[#allocation2 + $0x10] sm:$0xff] %v3510_v39  ;;  %v3511_v36 = vadd.f32 %v12398_v25, %v3468_v20  ;;  %v3427_v42 = vmax.f32 %v3397_v34, 0.0  ;;  %v3398_v7 = vadd.f32 %v12381_v0, %v3356_v43  ;;  %v3357_v60 = vadd.f32 %v3289_v54, %v2970_v59  ;;  %v2983_v40 = vpop.f32.mrf.mxu1 }
 0x41d   : > { %v3469_v12 = vmul.f32 %v12388_v26, %v3426_v10  ;;  %v3293_v50 = vpop.f32.mrf.mxu0  ;;  %v2984_v16 = vadd.f32 %v2983_v40, %v12344_v4 }
 0x41e   : > { %3541 = vst [vmem:[#allocation2 + $0x18] sm:$0xff] %v3511_v36  ;;  %v3470_v1 = vmul.f32 %v12394_v13, %v3427_v42  ;;  %v3428_v14 = vmax.f32 %v3398_v7, 0.0  ;;  %v3399_v8 = vadd.f32 %v12384_v3, %v3357_v60  ;;  %v3358_v17 = vadd.f32 %v3293_v50, %v2974_v11  ;;  %v2985_v22 = vpop.f32.mrf.mxu1 }
 0x41f   : > { %v3512_v32 = vadd.f32 %v12391_v41, %v3469_v12  ;;  %v3295_v33 = vpop.f32.mrf.mxu0  ;;  %v2986_v11 = vadd.f32 %v2985_v22, %v12346_v37 }
 0x420   : > { %v3513_v24 = vadd.f32 %v12398_v25, %v3470_v1  ;;  %v3471_v23 = vmul.f32 %v12388_v26, %v3428_v14  ;;  %v3429_v62 = vmax.f32 %v3399_v8, 0.0  ;;  %v3400_v56 = vadd.f32 %v12381_v0, %v3358_v17  ;;  %v2987_v31 = vpop.f32.mrf.mxu1 }
 0x421   : > { %3542 = vst [vmem:[#allocation2 + $0x20] sm:$0xff] %v3512_v32  ;;  %v3359_v18 = vadd.f32 %v3295_v33, %v2976_v51  ;;  %v3297_v55 = vpop.f32.mrf.mxu0  ;;  %v2988_v22 = vadd.f32 %v2987_v31, %v12348_v44 }
 0x422   : > { %3543 = vst [vmem:[#allocation2 + $0x28] sm:$0xff] %v3513_v24  ;;  %v3514_v59 = vadd.f32 %v12391_v41, %v3471_v23  ;;  %v3472_v28 = vmul.f32 %v12394_v13, %v3429_v62  ;;  %v3430_v27 = vmax.f32 %v3400_v56, 0.0  ;;  %v3360_v30 = vadd.f32 %v3297_v55, %v2978_v48  ;;  %v2989_v57 = vpop.f32.mrf.mxu1 }
 0x423   : > { %v3401_v49 = vadd.f32 %v12384_v3, %v3359_v18  ;;  %v3299_v39 = vpop.f32.mrf.mxu0  ;;  %v2990_v32 = vadd.f32 %v2989_v57, %v12350_v47 }
 0x424   : > { %3544 = vst [vmem:[#allocation2 + $0x30] sm:$0xff] %v3514_v59  ;;  %v3515_v20 = vadd.f32 %v12398_v25, %v3472_v28  ;;  %v3473_v38 = vmul.f32 %v12388_v26, %v3430_v27  ;;  %v3402_v34 = vadd.f32 %v12381_v0, %v3360_v30  ;;  %v3361_v43 = vadd.f32 %v3299_v39, %v2980_v61  ;;  %v2993_v15 = vpop.f32.mrf.mxu1 }
 0x425   : > { %v3431_v10 = vmax.f32 %v3401_v49, 0.0  ;;  %v3303_v54 = vpop.f32.mrf.mxu0  ;;  %v2994_v56 = vadd.f32 %v2993_v15, %v12352_v2 }
 0x426   : > { %3545 = vst [vmem:[#allocation2 + $0x38] sm:$0xff] %v3515_v20  ;;  %v3516_v36 = vadd.f32 %v12391_v41, %v3473_v38  ;;  %v3432_v4 = vmax.f32 %v3402_v34, 0.0  ;;  %v3403_v42 = vadd.f32 %v12384_v3, %v3361_v43  ;;  %v3362_v7 = vadd.f32 %v3303_v54, %v2984_v16  ;;  %v2995_v60 = vpop.f32.mrf.mxu1 }
 0x427   : > { %v3474_v40 = vmul.f32 %v12394_v13, %v3431_v10  ;;  %v3305_v12 = vpop.f32.mrf.mxu0  ;;  %v2996_v28 = vadd.f32 %v2995_v60, %v12354_v53 }
 0x428   : > { %3546 = vst [vmem:[#allocation2 + $0x40] sm:$0xff] %v3516_v36  ;;  %v3475_v50 = vmul.f32 %v12388_v26, %v3432_v4  ;;  %v3433_v1 = vmax.f32 %v3403_v42, 0.0  ;;  %v3404_v14 = vadd.f32 %v12381_v0, %v3362_v7  ;;  %v3363_v37 = vadd.f32 %v3305_v12, %v2986_v11  ;;  %v2997_v8 = vpop.f32.mrf.mxu1 }
 0x429   : > { %v3517_v17 = vadd.f32 %v12398_v25, %v3474_v40  ;;  %v3307_v51 = vpop.f32.mrf.mxu0  ;;  %v2998_v20 = vadd.f32 %v2997_v8, %v12356_v45 }
 0x42a   : > { %v3518_v48 = vadd.f32 %v12391_v41, %v3475_v50  ;;  %v3476_v33 = vmul.f32 %v12394_v13, %v3433_v1  ;;  %v3434_v24 = vmax.f32 %v3404_v14, 0.0  ;;  %v3405_v23 = vadd.f32 %v12384_v3, %v3363_v37  ;;  %v2999_v62 = vpop.f32.mrf.mxu1 }
 0x42b   : > { %3547 = vst [vmem:[#allocation2 + $0x48] sm:$0xff] %v3517_v17  ;;  %v3364_v61 = vadd.f32 %v3307_v51, %v2988_v22  ;;  %v3309_v18 = vpop.f32.mrf.mxu0  ;;  %v3000_v12 = vadd.f32 %v2999_v62, %v12358_v6 }
 0x42c   : > { %3548 = vst [vmem:[#allocation2 + $0x50] sm:$0xff] %v3518_v48  ;;  %v3519_v55 = vadd.f32 %v12398_v25, %v3476_v33  ;;  %v3477_v44 = vmul.f32 %v12388_v26, %v3434_v24  ;;  %v3435_v47 = vmax.f32 %v3405_v23, 0.0  ;;  %v3365_v31 = vadd.f32 %v3309_v18, %v2990_v32  ;;  %v3003_v59 = vpop.f32.mrf.mxu1 }
 0x42d   : > { %v3406_v27 = vadd.f32 %v12381_v0, %v3364_v61  ;;  %v3313_v30 = vpop.f32.mrf.mxu0  ;;  %v3004_v50 = vadd.f32 %v3003_v59, %v12360_v19 }
 0x42e   : > { %3549 = vst [vmem:[#allocation2 + $0x58] sm:$0xff] %v3519_v55  ;;  %v3520_v57 = vadd.f32 %v12391_v41, %v3477_v44  ;;  %v3478_v2 = vmul.f32 %v12394_v13, %v3435_v47  ;;  %v3407_v16 = vadd.f32 %v12384_v3, %v3365_v31  ;;  %v3366_v49 = vadd.f32 %v3313_v30, %v2994_v56  ;;  %v3005_v39 = vpop.f32.mrf.mxu1 }
 0x42f   : > { %v3436_v38 = vmax.f32 %v3406_v27, 0.0  ;;  %v3315_v34 = vpop.f32.mrf.mxu0  ;;  %v3006_v32 = vadd.f32 %v3005_v39, %v12362_v29 }
 0x430   : > { %3550 = vst [vmem:[#allocation2 + $0x60] sm:$0xff] %v3520_v57  ;;  %v3521_v43 = vadd.f32 %v12398_v25, %v3478_v2  ;;  %v3437_v53 = vmax.f32 %v3407_v16, 0.0  ;;  %v3408_v15 = vadd.f32 %v12381_v0, %v3366_v49  ;;  %v3367_v11 = vadd.f32 %v3315_v34, %v2996_v28  ;;  %v3007_v10 = vpop.f32.mrf.mxu1 }
 0x431   : > { %v3479_v54 = vmul.f32 %v12388_v26, %v3436_v38  ;;  %v3317_v36 = vpop.f32.mrf.mxu0  ;;  %v3008_v62 = vadd.f32 %v3007_v10, %v12364_v58 }
 0x432   : > { %3551 = vst [vmem:[#allocation2 + $0x68] sm:$0xff] %v3521_v43  ;;  %v3480_v4 = vmul.f32 %v12394_v13, %v3437_v53  ;;  %v3438_v42 = vmax.f32 %v3408_v15, 0.0  ;;  %v3409_v7 = vadd.f32 %v12384_v3, %v3367_v11  ;;  %v3368_v45 = vadd.f32 %v3317_v36, %v2998_v20  ;;  %v3009_v60 = vpop.f32.mrf.mxu1 }
 0x433   : > { %v3522_v40 = vadd.f32 %v12391_v41, %v3479_v54  ;;  %v3319_v1 = vpop.f32.mrf.mxu0  ;;  %v3010_v31 = vadd.f32 %v3009_v60, %v12366_v46 }
 0x434   : > { %v3523_v14 = vadd.f32 %v12398_v25, %v3480_v4  ;;  %v3481_v37 = vmul.f32 %v12388_v26, %v3438_v42  ;;  %v3439_v8 = vmax.f32 %v3409_v7, 0.0  ;;  %v3410_v17 = vadd.f32 %v12381_v0, %v3368_v45  ;;  %v3013_v22 = vpop.f32.mrf.mxu1 }
 0x435   : > { %3552 = vst [vmem:[#allocation2 + $0x70] sm:$0xff] %v3522_v40  ;;  %v3369_v51 = vadd.f32 %v3319_v1, %v3000_v12  ;;  %v3323_v48 = vpop.f32.mrf.mxu0  ;;  %v3014_v12 = vadd.f32 %v3013_v22, %v12368_v52 }
 0x436   : > { %3553 = vst [vmem:[#allocation2 + $0x78] sm:$0xff] %v3523_v14  ;;  %v3524_v33 = vadd.f32 %v12391_v41, %v3481_v37  ;;  %v3482_v6 = vmul.f32 %v12394_v13, %v3439_v8  ;;  %v3440_v19 = vmax.f32 %v3410_v17, 0.0  ;;  %v3370_v24 = vadd.f32 %v3323_v48, %v3004_v50  ;;  %v3015_v23 = vpop.f32.mrf.mxu1 }
 0x437   : > { %v3411_v56 = vadd.f32 %v12384_v3, %v3369_v51  ;;  %v3325_v61 = vpop.f32.mrf.mxu0  ;;  %v3016_v14 = vadd.f32 %v3015_v23, %v12370_v35 }
 0x438   : > { %3554 = vst [vmem:[#allocation2 + $0x80] sm:$0xff] %v3524_v33  ;;  %v3525_v18 = vadd.f32 %v12398_v25, %v3482_v6  ;;  %v3483_v29 = vmul.f32 %v12388_v26, %v3440_v19  ;;  %v3412_v55 = vadd.f32 %v12381_v0, %v3370_v24  ;;  %v3371_v44 = vadd.f32 %v3325_v61, %v3006_v32  ;;  %v3017_v47 = vpop.f32.mrf.mxu1 }
 0x439   : > { %v3441_v59 = vmax.f32 %v3411_v56, 0.0  ;;  %v3327_v28 = vpop.f32.mrf.mxu0  ;;  %v3018_v17 = vadd.f32 %v3017_v47, %v12372_v5 }
 0x43a   : > { %3555 = vst [vmem:[#allocation2 + $0x88] sm:$0xff] %v3525_v18  ;;  %v3526_v27 = vadd.f32 %v12391_v41, %v3483_v29  ;;  %v3442_v58 = vmax.f32 %v3412_v55, 0.0  ;;  %v3413_v30 = vadd.f32 %v12384_v3, %v3371_v44  ;;  %v3372_v57 = vadd.f32 %v3327_v28, %v3008_v62  ;;  %v3019_v2 = vpop.f32.mrf.mxu1 }
 0x43b   : > { %v3484_v16 = vmul.f32 %v12394_v13, %v3441_v59  ;;  %v3329_v49 = vpop.f32.mrf.mxu0  ;;  %v3020_v33 = vadd.f32 %v3019_v2, %v12374_v9 }
 0x43c   : > { %3556 = vst [vmem:[#allocation2 + $0x90] sm:$0xff] %v3526_v27  ;;  %v3485_v39 = vmul.f32 %v12388_v26, %v3442_v58  ;;  %v3443_v20 = vmax.f32 %v3413_v30, 0.0  ;;  %v3414_v38 = vadd.f32 %v12381_v0, %v3372_v57  ;;  %v3373_v46 = vadd.f32 %v3329_v49, %v3010_v31  ;;  %v3023_v34 = vpop.f32.mrf.mxu1 }
 0x43d   : > { %v3527_v43 = vadd.f32 %v12398_v25, %v3484_v16  ;;  %v3024_v56 = vadd.f32 %v3023_v34, %v12376_v21 }
 0x43e   : > { %v3528_v53 = vadd.f32 %v12391_v41, %v3485_v39  ;;  %v3486_v15 = vmul.f32 %v12394_v13, %v3443_v20  ;;  %v3444_v11 = vmax.f32 %v3414_v38, 0.0  ;;  %v3415_v10 = vadd.f32 %v12384_v3, %v3373_v46  ;;  %v3025_v54 = vpop.f32.mrf.mxu1 }
 0x43f   : > { %3557 = vst [vmem:[#allocation2 + $0x98] sm:$0xff] %v3527_v43  ;;  %v3026_v5 = vadd.f32 %v3025_v54, %v12378_v63 }
 0x440   : > { %3558 = vst [vmem:[#allocation2 + $0xa0] sm:$0xff] %v3528_v53  ;;  %v3529_v36 = vadd.f32 %v12398_v25, %v3486_v15  ;;  %v3487_v4 = vmul.f32 %v12388_v26, %v3444_v11  ;;  %v3445_v42 = vmax.f32 %v3415_v10, 0.0  ;;  %v3027_v7 = vpop.f32.mrf.mxu1 }
 0x442   : > { %3559 = vst [vmem:[#allocation2 + $0xa8] sm:$0xff] %v3529_v36  ;;  %v3530_v45 = vadd.f32 %v12391_v41, %v3487_v4  ;;  %v3488_v60 = vmul.f32 %v12394_v13, %v3445_v42  ;;  %v3028_v40 = vpop.f32.mrf.mxu1 }
 0x444   : > { %3560 = vst [vmem:[#allocation2 + $0xb0] sm:$0xff] %v3530_v45  ;;  %v3531_v50 = vadd.f32 %v12398_v25, %v3488_v60 }
 0x445   : > { %v3333_v1 = vpop.f32.mrf.mxu1 }
 0x446   : > { %3561 = vst [vmem:[#allocation2 + $0xb8] sm:$0xff] %v3531_v50  ;;  %v3374_v37 = vadd.f32 %v3333_v1, %v3014_v12 }
 0x447   : > { %v3335_v8 = vpop.f32.mrf.mxu1 }
 0x448   : > { %v3416_v32 = vadd.f32 %v12381_v0, %v3374_v37  ;;  %v3375_v51 = vadd.f32 %v3335_v8, %v3016_v14 }
 0x449   : > { %v3337_v48 = vpop.f32.mrf.mxu1 }
 0x44a   : > { %v3446_v6 = vmax.f32 %v3416_v32, 0.0  ;;  %v3417_v52 = vadd.f32 %v12384_v3, %v3375_v51  ;;  %v3376_v22 = vadd.f32 %v3337_v48, %v3018_v17 }
 0x44b   : > { %v3339_v19 = vpop.f32.mrf.mxu1 }
 0x44c   : > { %v3489_v24 = vmul.f32 %v12388_v26, %v3446_v6  ;;  %v3447_v62 = vmax.f32 %v3417_v52, 0.0  ;;  %v3418_v35 = vadd.f32 %v12381_v0, %v3376_v22  ;;  %v3377_v23 = vadd.f32 %v3339_v19, %v3020_v33 }
 0x44d   : > { %v3343_v61 = vpop.f32.mrf.mxu1 }
 0x44e   : > { %v3532_v18 = vadd.f32 %v12391_v41, %v3489_v24  ;;  %v3490_v9 = vmul.f32 %v12394_v13, %v3447_v62  ;;  %v3448_v29 = vmax.f32 %v3418_v35, 0.0  ;;  %v3419_v55 = vadd.f32 %v12384_v3, %v3377_v23 }
 0x44f   : > { %v3378_v44 = vadd.f32 %v3343_v61, %v3024_v56  ;;  %v3345_v47 = vpop.f32.mrf.mxu1 }
 0x450   : > { %3562 = vst [vmem:[#allocation2 + $0xc0] sm:$0xff] %v3532_v18  ;;  %v3533_v31 = vadd.f32 %v12398_v25, %v3490_v9  ;;  %v3491_v59 = vmul.f32 %v12388_v26, %v3448_v29  ;;  %v3449_v28 = vmax.f32 %v3419_v55, 0.0  ;;  %v3379_v27 = vadd.f32 %v3345_v47, %v3026_v5 }
 0x451   : > { %v3420_v21 = vadd.f32 %v12381_v0, %v3378_v44  ;;  %v3347_v63 = vpop.f32.mrf.mxu1 }
 0x452   : > { %3563 = vst [vmem:[#allocation2 + $0xc8] sm:$0xff] %v3533_v31  ;;  %v3534_v58 = vadd.f32 %v12391_v41, %v3491_v59  ;;  %v3492_v30 = vmul.f32 %v12394_v13, %v3449_v28  ;;  %v3421_v57 = vadd.f32 %v12384_v3, %v3379_v27 }
 0x453   : > { %v3450_v2 = vmax.f32 %v3420_v21, 0.0  ;;  %v3348_v16 = vpop.f32.mrf.mxu1 }
 0x454   : > { %3564 = vst [vmem:[#allocation2 + $0xd0] sm:$0xff] %v3534_v58  ;;  %v3535_v49 = vadd.f32 %v12398_v25, %v3492_v30  ;;  %v3451_v39 = vmax.f32 %v3421_v57, 0.0 }
 0x455   : > { %v3493_v20 = vmul.f32 %v12388_v26, %v3450_v2 }
 0x456   : > { %3565 = vst [vmem:[#allocation2 + $0xd8] sm:$0xff] %v3535_v49  ;;  %v3494_v38 = vmul.f32 %v12394_v13, %v3451_v39 }
 0x457   : > { %v3536_v0 = vadd.f32 %v12391_v41, %v3493_v20 }
 0x458   : > { %v3537_v46 = vadd.f32 %v12398_v25, %v3494_v38 }
 0x459   : > { %3566 = vst [vmem:[#allocation2 + $0xe0] sm:$0xff] %v3536_v0 }
 0x45a   : > { %3567 = vst [vmem:[#allocation2 + $0xe8] sm:$0xff] %v3537_v46 }
 0x45b PF: > { %v9655_v3 = vld [vmem:[%s11144_s20 + $0xe4] ss:$16 sps:$4 sm:$0xff]   ;;  %v9657_v26 = vld [vmem:[%s11144_s20 + $0xec] ss:$16 sps:$4 sm:$0xff]   ;;  %v9659_v41 = vld [vmem:[%s11144_s20 + $0xe0] ss:$16 sps:$4 sm:$0xff]  }
 0x45c   : > { %3968 = vmatprep.subr.bf16.mxu0 %v9655_v3  ;;  %v9660_v13 = vld [vmem:[%s11144_s20 + $0xe8] ss:$16 sps:$4 sm:$0xff]   ;;  %4009 = vmatprep.subr.bf16.mxu1 %v9657_v26  ;;  %v9661_v25 = vld [vmem:[%s11144_s20 + $0xc4] ss:$16 sps:$4 sm:$0xff]   ;;  %v9663_v34 = vld [vmem:[%s11144_s20 + $0xcc] ss:$16 sps:$4 sm:$0xff]  }
 0x45d   : > { %3969 = vmatpush1.bf16.msra.mxu0 %v9659_v41  ;;  %4010 = vmatpush1.bf16.msra.mxu1 %v9660_v13  ;;  %v9665_v43 = vld [vmem:[%s11144_s20 + $0xc0] ss:$16 sps:$4 sm:$0xff]   ;;  %v9666_v53 = vld [vmem:[%s11144_s20 + $0xc8] ss:$16 sps:$4 sm:$0xff]   ;;  %v9667_v15 = vld [vmem:[%s11144_s20 + $0xa4] ss:$16 sps:$4 sm:$0xff]  }
 0x45e   : > { %3970 = vmatprep.subr.bf16.mxu0 %v9661_v25  ;;  %4011 = vmatprep.subr.bf16.mxu1 %v9663_v34  ;;  %v9669_v11 = vld [vmem:[%s11144_s20 + $0xac] ss:$16 sps:$4 sm:$0xff]   ;;  %v9671_v10 = vld [vmem:[%s11144_s20 + $0xa0] ss:$16 sps:$4 sm:$0xff]   ;;  %v9672_v54 = vld [vmem:[%s11144_s20 + $0xa8] ss:$16 sps:$4 sm:$0xff]  }
 0x45f   : > { %v9673_v36 = vld [vmem:[%s11144_s20 + $0x84] ss:$16 sps:$4 sm:$0xff]   ;;  %v9675_v4 = vld [vmem:[%s11144_s20 + $0x8c] ss:$16 sps:$4 sm:$0xff]   ;;  %v9677_v42 = vld [vmem:[%s11144_s20 + $0x80] ss:$16 sps:$4 sm:$0xff]  }
 0x460   : > { %v9678_v7 = vld [vmem:[%s11144_s20 + $0x88] ss:$16 sps:$4 sm:$0xff]   ;;  %v9679_v45 = vld [vmem:[%s11144_s20 + $0x64] ss:$16 sps:$4 sm:$0xff]   ;;  %v9681_v60 = vld [vmem:[%s11144_s20 + $0x6c] ss:$16 sps:$4 sm:$0xff]  }
 0x461   : > { %3971 = vmatpush1.bf16.msra.mxu0 %v9665_v43  ;;  %4012 = vmatpush1.bf16.msra.mxu1 %v9666_v53  ;;  %v9683_v40 = vld [vmem:[%s11144_s20 + $0x60] ss:$16 sps:$4 sm:$0xff]   ;;  %v9684_v12 = vld [vmem:[%s11144_s20 + $0x68] ss:$16 sps:$4 sm:$0xff]   ;;  %v9685_v50 = vld [vmem:[%s11144_s20 + $0x44] ss:$16 sps:$4 sm:$0xff]  }
 0x462   : > { %3972 = vmatprep.subr.bf16.mxu0 %v9667_v15  ;;  %4013 = vmatprep.subr.bf16.mxu1 %v9669_v11  ;;  %v9687_v1 = vld [vmem:[%s11144_s20 + $0x4c] ss:$16 sps:$4 sm:$0xff]   ;;  %v9689_v14 = vld [vmem:[%s11144_s20 + $0x40] ss:$16 sps:$4 sm:$0xff]   ;;  %v9690_v37 = vld [vmem:[%s11144_s20 + $0x48] ss:$16 sps:$4 sm:$0xff]  }
 0x463   : > { %v9691_v8 = vld [vmem:[%s11144_s20 + $0x24] ss:$16 sps:$4 sm:$0xff]   ;;  %v9693_v17 = vld [vmem:[%s11144_s20 + $0x2c] ss:$16 sps:$4 sm:$0xff]   ;;  %v9695_v32 = vld [vmem:[%s11144_s20 + $0x20] ss:$16 sps:$4 sm:$0xff]  }
 0x464   : > { %v9696_v51 = vld [vmem:[%s11144_s20 + $0x28] ss:$16 sps:$4 sm:$0xff]   ;;  %v9697_v48 = vld [vmem:[%s11144_s20 + $0x4] ss:$16 sps:$4 sm:$0xff]   ;;  %v9699_v33 = vld [vmem:[%s11144_s20 + $0xc] ss:$16 sps:$4 sm:$0xff]  }
 0x465   : > { %3973 = vmatpush1.bf16.msra.mxu0 %v9671_v10  ;;  %4014 = vmatpush1.bf16.msra.mxu1 %v9672_v54  ;;  %v9701_v6 = vld [vmem:[%s11144_s20] ss:$16 sps:$4 sm:$0xff]   ;;  %v9702_v52 = vld [vmem:[%s11144_s20 + $0x8] ss:$16 sps:$4 sm:$0xff]   ;;  %v9703_v22 = vld [vmem:[%s11144_s20 + $0x1e4] ss:$16 sps:$4 sm:$0xff]  }
 0x466   : > { %3974 = vmatprep.subr.bf16.mxu0 %v9673_v36  ;;  %4015 = vmatprep.subr.bf16.mxu1 %v9675_v4  ;;  %v9705_v19 = vld [vmem:[%s11144_s20 + $0x1ec] ss:$16 sps:$4 sm:$0xff]   ;;  %s3568_s17 = smul.u32 24, %s10948_s14  ;;  %v9707_v24 = vld [vmem:[%s11144_s20 + $0x1e0] ss:$16 sps:$4 sm:$0xff]   ;;  %p8867_p13 = scmp.ne.s32.totalorder %s10948_s14, 4 }
 0x467   : > { %v9708_v62 = vld [vmem:[%s11144_s20 + $0x1e8] ss:$16 sps:$4 sm:$0xff]   ;;  %v9709_v35 = vld [vmem:[%s11144_s20 + $0x1c4] ss:$16 sps:$4 sm:$0xff]   ;;  %v9711_v23 = vld [vmem:[%s11144_s20 + $0x1cc] ss:$16 sps:$4 sm:$0xff]  }
 0x468   : > { %s3569_s25 = sshra.s32 %s3568_s17, 3  ;;  %v9713_v56 = vld [vmem:[%s11144_s20 + $0x1c0] ss:$16 sps:$4 sm:$0xff]   ;;  %v9714_v5 = vld [vmem:[%s11144_s20 + $0x1c8] ss:$16 sps:$4 sm:$0xff]  }
 0x469   : > { %3975 = vmatpush1.bf16.msra.mxu0 %v9677_v42  ;;  %4016 = vmatpush1.bf16.msra.mxu1 %v9678_v7  ;;  %v9715_v61 = vld [vmem:[%s11144_s20 + $0x1a4] ss:$16 sps:$4 sm:$0xff]   ;;  %s9033_s19 = sshll.u32 %s3569_s25, 4  ;;  %v9717_v18 = vld [vmem:[%s11144_s20 + $0x1ac] ss:$16 sps:$4 sm:$0xff]  }
 0x46a   : > { %3976 = vmatprep.subr.bf16.mxu0 %v9679_v45  ;;  %4017 = vmatprep.subr.bf16.mxu1 %v9681_v60  ;;  %v9719_v9 = vld [vmem:[%s11144_s20 + $0x1a0] ss:$16 sps:$4 sm:$0xff]   ;;  %v9720_v29 = vld [vmem:[%s11144_s20 + $0x1a8] ss:$16 sps:$4 sm:$0xff]   ;;  %v9721_v55 = vld [vmem:[%s11144_s20 + $0x184] ss:$16 sps:$4 sm:$0xff]  }
 0x46b   : > { %v9723_v44 = vld [vmem:[%s11144_s20 + $0x18c] ss:$16 sps:$4 sm:$0xff]   ;;  %s12561_s29 = scalar_lea.vmem [#allocation2], %s9033_s19  ;;  %v9725_v59 = vld [vmem:[%s11144_s20 + $0x180] ss:$16 sps:$4 sm:$0xff]  }
 0x46c   : > { %v3575_v47 = vld [vmem:[%s12561_s29 + $0x8] sm:$0xff]  ;;  %v9729_v21 = vld [vmem:[%s11144_s20 + $0x16c] ss:$16 sps:$4 sm:$0xff]   ;;  %v9731_v63 = vld [vmem:[%s11144_s20 + $0x160] ss:$16 sps:$4 sm:$0xff]  }
 0x46d   : > { %3977 = vmatpush1.bf16.msra.mxu0 %v9683_v40  ;;  %4018 = vmatpush1.bf16.msra.mxu1 %v9684_v12  ;;  %v12564_v31 = vpack.c.bf16 %v3575_v47, %v3575_v47  ;;  %v9726_v28 = vld [vmem:[%s11144_s20 + $0x188] ss:$16 sps:$4 sm:$0xff]   ;;  %v9727_v27 = vld [vmem:[%s11144_s20 + $0x164] ss:$16 sps:$4 sm:$0xff]   ;;  %v9735_v57 = vld [vmem:[%s11144_s20 + $0x14c] ss:$16 sps:$4 sm:$0xff]  }
 0x46e   : > { %3978 = vmatprep.subr.bf16.mxu0 %v9685_v50  ;;  %4019 = vmatprep.subr.bf16.mxu1 %v9687_v1  ;;  %v9732_v58 = vld [vmem:[%s11144_s20 + $0x168] ss:$16 sps:$4 sm:$0xff]   ;;  %v9733_v30 = vld [vmem:[%s11144_s20 + $0x144] ss:$16 sps:$4 sm:$0xff]   ;;  %v9737_v2 = vld [vmem:[%s11144_s20 + $0x140] ss:$16 sps:$4 sm:$0xff]  }
 0x46f   : > { %4000 = vmatprep.mubr.bf16.mxu0 %v12564_v31  ;;  %4041 = vmatprep.mubr.bf16.mxu1 %v12564_v31  ;;  %v9738_v16 = vld [vmem:[%s11144_s20 + $0x148] ss:$16 sps:$4 sm:$0xff]   ;;  %v9739_v49 = vld [vmem:[%s11144_s20 + $0x124] ss:$16 sps:$4 sm:$0xff]   ;;  %v9741_v39 = vld [vmem:[%s11144_s20 + $0x12c] ss:$16 sps:$4 sm:$0xff]  }
 0x470   : > { %v9743_v20 = vld [vmem:[%s11144_s20 + $0x120] ss:$16 sps:$4 sm:$0xff]   ;;  %v9744_v38 = vld [vmem:[%s11144_s20 + $0x128] ss:$16 sps:$4 sm:$0xff]   ;;  %v9745_v0 = vld [vmem:[%s11144_s20 + $0x104] ss:$16 sps:$4 sm:$0xff]  }
 0x471   : > { %3979 = vmatpush1.bf16.msra.mxu0 %v9689_v14  ;;  %4020 = vmatpush1.bf16.msra.mxu1 %v9690_v37  ;;  %v9747_v46 = vld [vmem:[%s11144_s20 + $0x10c] ss:$16 sps:$4 sm:$0xff]   ;;  %v9749_v3 = vld [vmem:[%s11144_s20 + $0x100] ss:$16 sps:$4 sm:$0xff]   ;;  %v9750_v26 = vld [vmem:[%s11144_s20 + $0x108] ss:$16 sps:$4 sm:$0xff]  }
 0x472   : > { %3980 = vmatprep.subr.bf16.mxu0 %v9691_v8  ;;  %4021 = vmatprep.subr.bf16.mxu1 %v9693_v17  ;;  %v3574_v41 = vld [vmem:[%s12561_s29] sm:$0xff]  ;;  %v9753_v13 = vld [vmem:[%s11144_s20 + $0x2e4] ss:$16 sps:$4 sm:$0xff]   ;;  %v9754_v53 = vld [vmem:[%s11144_s20 + $0x2e8] ss:$16 sps:$4 sm:$0xff]   ;;  %v4128_v10 = vrot.slane %v12564_v31, 2 }
 0x473   : > { %v9756_v25 = vld [vmem:[%s11144_s20 + $0x2ec] ss:$16 sps:$4 sm:$0xff]   ;;  %v12589_v34 = vpack.c.bf16 %v3574_v41, %v3574_v41  ;;  %v9751_v43 = vld [vmem:[%s11144_s20 + $0x2e0] ss:$16 sps:$4 sm:$0xff]   ;;  %v9759_v15 = vld [vmem:[%s11144_s20 + $0x2c4] ss:$16 sps:$4 sm:$0xff]  }
 0x474   : > { %v9762_v11 = vld [vmem:[%s11144_s20 + $0x2cc] ss:$16 sps:$4 sm:$0xff]   ;;  %v9757_v54 = vld [vmem:[%s11144_s20 + $0x2c0] ss:$16 sps:$4 sm:$0xff]   ;;  %v9760_v36 = vld [vmem:[%s11144_s20 + $0x2c8] ss:$16 sps:$4 sm:$0xff]  }
 0x475   : > { %3981 = vmatpush1.bf16.msra.mxu0 %v9695_v32  ;;  %4022 = vmatpush1.bf16.msra.mxu1 %v9696_v51  ;;  %v9765_v4 = vld [vmem:[%s11144_s20 + $0x2a4] ss:$16 sps:$4 sm:$0xff]   ;;  %v9768_v42 = vld [vmem:[%s11144_s20 + $0x2ac] ss:$16 sps:$4 sm:$0xff]   ;;  %v9763_v7 = vld [vmem:[%s11144_s20 + $0x2a0] ss:$16 sps:$4 sm:$0xff]  }
 0x476   : > { %3982 = vmatprep.subr.bf16.mxu0 %v9697_v48  ;;  %4023 = vmatprep.subr.bf16.mxu1 %v9699_v33  ;;  %v9766_v45 = vld [vmem:[%s11144_s20 + $0x2a8] ss:$16 sps:$4 sm:$0xff]   ;;  %v9771_v60 = vld [vmem:[%s11144_s20 + $0x284] ss:$16 sps:$4 sm:$0xff]   ;;  %v9774_v40 = vld [vmem:[%s11144_s20 + $0x28c] ss:$16 sps:$4 sm:$0xff]  }
 0x477   : > { %v9769_v12 = vld [vmem:[%s11144_s20 + $0x280] ss:$16 sps:$4 sm:$0xff]   ;;  %v9772_v50 = vld [vmem:[%s11144_s20 + $0x288] ss:$16 sps:$4 sm:$0xff]   ;;  %v9777_v1 = vld [vmem:[%s11144_s20 + $0x264] ss:$16 sps:$4 sm:$0xff]  }
 0x478   : > { %v9780_v14 = vld [vmem:[%s11144_s20 + $0x26c] ss:$16 sps:$4 sm:$0xff]   ;;  %v9775_v37 = vld [vmem:[%s11144_s20 + $0x260] ss:$16 sps:$4 sm:$0xff]   ;;  %v9778_v8 = vld [vmem:[%s11144_s20 + $0x268] ss:$16 sps:$4 sm:$0xff]  }
 0x479   : > { %3983 = vmatpush1.bf16.msra.mxu0 %v9701_v6  ;;  %4024 = vmatpush1.bf16.msra.mxu1 %v9702_v52  ;;  %v9783_v17 = vld [vmem:[%s11144_s20 + $0x244] ss:$16 sps:$4 sm:$0xff]   ;;  %v9786_v32 = vld [vmem:[%s11144_s20 + $0x24c] ss:$16 sps:$4 sm:$0xff]   ;;  %v9781_v51 = vld [vmem:[%s11144_s20 + $0x240] ss:$16 sps:$4 sm:$0xff]  }
 0x47a   : > { %3984 = vmatprep.subr.bf16.mxu0 %v9703_v22  ;;  %4025 = vmatprep.subr.bf16.mxu1 %v9705_v19  ;;  %v9784_v48 = vld [vmem:[%s11144_s20 + $0x248] ss:$16 sps:$4 sm:$0xff]   ;;  %v9789_v33 = vld [vmem:[%s11144_s20 + $0x224] ss:$16 sps:$4 sm:$0xff]   ;;  %v9792_v6 = vld [vmem:[%s11144_s20 + $0x22c] ss:$16 sps:$4 sm:$0xff]  }
 0x47b   : > { %v9787_v52 = vld [vmem:[%s11144_s20 + $0x220] ss:$16 sps:$4 sm:$0xff]   ;;  %v9790_v22 = vld [vmem:[%s11144_s20 + $0x228] ss:$16 sps:$4 sm:$0xff]   ;;  %v9795_v19 = vld [vmem:[%s11144_s20 + $0x204] ss:$16 sps:$4 sm:$0xff]  }
 0x47c   : > { %v9816_v47 = vld [vmem:[%s11144_s20 + $0x3ac] ss:$16 sps:$4 sm:$0xff]   ;;  %v9811_v31 = vld [vmem:[%s11144_s20 + $0x3a0] ss:$16 sps:$4 sm:$0xff]  }
 0x47d   : > { %3985 = vmatpush2.bf16.msra.mxu0 %v9707_v24  ;;  %4026 = vmatpush2.bf16.msra.mxu1 %v9708_v62  ;;  %v9798_v24 = vld [vmem:[%s11144_s20 + $0x20c] ss:$16 sps:$4 sm:$0xff]   ;;  %v9793_v62 = vld [vmem:[%s11144_s20 + $0x200] ss:$16 sps:$4 sm:$0xff]  }
 0x47e   : > { %3986 = vmatprep.subr.bf16.mxu0 %v9709_v35  ;;  %4027 = vmatprep.subr.bf16.mxu1 %v9711_v23  ;;  %v9796_v35 = vld [vmem:[%s11144_s20 + $0x208] ss:$16 sps:$4 sm:$0xff]   ;;  %v9801_v23 = vld [vmem:[%s11144_s20 + $0x3e4] ss:$16 sps:$4 sm:$0xff]   ;;  %v9846_v41 = vld [vmem:[%s11144_s20 + $0x30c] ss:$16 sps:$4 sm:$0xff]  }
 0x481   : > { %3987 = vmatpush2.bf16.msra.mxu0 %v9713_v56  ;;  %4028 = vmatpush2.bf16.msra.mxu1 %v9714_v5  ;;  %v9804_v56 = vld [vmem:[%s11144_s20 + $0x3ec] ss:$16 sps:$4 sm:$0xff]   ;;  %v9799_v5 = vld [vmem:[%s11144_s20 + $0x3e0] ss:$16 sps:$4 sm:$0xff]  }
 0x482   : > { %3988 = vmatprep.subr.bf16.mxu0 %v9715_v61  ;;  %4029 = vmatprep.subr.bf16.mxu1 %v9717_v18  ;;  %v9802_v61 = vld [vmem:[%s11144_s20 + $0x3e8] ss:$16 sps:$4 sm:$0xff]   ;;  %v9807_v18 = vld [vmem:[%s11144_s20 + $0x3c4] ss:$16 sps:$4 sm:$0xff]  }
 0x485   : > { %3989 = vmatpush2.bf16.msra.mxu0 %v9719_v9  ;;  %4030 = vmatpush2.bf16.msra.mxu1 %v9720_v29  ;;  %v9810_v9 = vld [vmem:[%s11144_s20 + $0x3cc] ss:$16 sps:$4 sm:$0xff]   ;;  %v9805_v29 = vld [vmem:[%s11144_s20 + $0x3c0] ss:$16 sps:$4 sm:$0xff]  }
 0x486   : > { %3990 = vmatprep.subr.bf16.mxu0 %v9721_v55  ;;  %4031 = vmatprep.subr.bf16.mxu1 %v9723_v44  ;;  %v9808_v55 = vld [vmem:[%s11144_s20 + $0x3c8] ss:$16 sps:$4 sm:$0xff]   ;;  %v9813_v44 = vld [vmem:[%s11144_s20 + $0x3a4] ss:$16 sps:$4 sm:$0xff]  }
 0x489   : > { %3991 = vmatpush2.bf16.msra.mxu0 %v9725_v59  ;;  %4032 = vmatpush2.bf16.msra.mxu1 %v9726_v28  ;;  %v9814_v59 = vld [vmem:[%s11144_s20 + $0x3a8] ss:$16 sps:$4 sm:$0xff]   ;;  %v9819_v28 = vld [vmem:[%s11144_s20 + $0x384] ss:$16 sps:$4 sm:$0xff]  }
 0x48a   : > { %3992 = vmatprep.subr.bf16.mxu0 %v9727_v27  ;;  %4033 = vmatprep.subr.bf16.mxu1 %v9729_v21  ;;  %v9822_v27 = vld [vmem:[%s11144_s20 + $0x38c] ss:$16 sps:$4 sm:$0xff]   ;;  %v9817_v21 = vld [vmem:[%s11144_s20 + $0x380] ss:$16 sps:$4 sm:$0xff]  }
 0x48d   : > { %3993 = vmatpush2.bf16.msra.mxu0 %v9731_v63  ;;  %4034 = vmatpush2.bf16.msra.mxu1 %v9732_v58  ;;  %v9820_v63 = vld [vmem:[%s11144_s20 + $0x388] ss:$16 sps:$4 sm:$0xff]   ;;  %v9825_v58 = vld [vmem:[%s11144_s20 + $0x364] ss:$16 sps:$4 sm:$0xff]  }
 0x48e   : > { %3994 = vmatprep.subr.bf16.mxu0 %v9733_v30  ;;  %4035 = vmatprep.subr.bf16.mxu1 %v9735_v57  ;;  %v9828_v30 = vld [vmem:[%s11144_s20 + $0x36c] ss:$16 sps:$4 sm:$0xff]   ;;  %v9823_v57 = vld [vmem:[%s11144_s20 + $0x360] ss:$16 sps:$4 sm:$0xff]  }
 0x491   : > { %3995 = vmatpush2.bf16.msra.mxu0 %v9737_v2  ;;  %4036 = vmatpush2.bf16.msra.mxu1 %v9738_v16  ;;  %v9826_v2 = vld [vmem:[%s11144_s20 + $0x368] ss:$16 sps:$4 sm:$0xff]   ;;  %v9831_v16 = vld [vmem:[%s11144_s20 + $0x344] ss:$16 sps:$4 sm:$0xff]  }
 0x492   : > { %3996 = vmatprep.subr.bf16.mxu0 %v9739_v49  ;;  %4037 = vmatprep.subr.bf16.mxu1 %v9741_v39  ;;  %v9834_v49 = vld [vmem:[%s11144_s20 + $0x34c] ss:$16 sps:$4 sm:$0xff]   ;;  %v9829_v39 = vld [vmem:[%s11144_s20 + $0x340] ss:$16 sps:$4 sm:$0xff]  }
 0x495   : > { %3997 = vmatpush2.bf16.msra.mxu0 %v9743_v20  ;;  %4038 = vmatpush2.bf16.msra.mxu1 %v9744_v38  ;;  %v9832_v20 = vld [vmem:[%s11144_s20 + $0x348] ss:$16 sps:$4 sm:$0xff]   ;;  %v9837_v38 = vld [vmem:[%s11144_s20 + $0x324] ss:$16 sps:$4 sm:$0xff]  }
 0x496   : > { %3998 = vmatprep.subr.bf16.mxu0 %v9745_v0  ;;  %4039 = vmatprep.subr.bf16.mxu1 %v9747_v46  ;;  %v9840_v0 = vld [vmem:[%s11144_s20 + $0x32c] ss:$16 sps:$4 sm:$0xff]   ;;  %v9835_v46 = vld [vmem:[%s11144_s20 + $0x320] ss:$16 sps:$4 sm:$0xff]  }
 0x499   : > { %3999 = vmatpush2.bf16.msra.mxu0 %v9749_v3  ;;  %4040 = vmatpush2.bf16.msra.mxu1 %v9750_v26  ;;  %v9838_v3 = vld [vmem:[%s11144_s20 + $0x328] ss:$16 sps:$4 sm:$0xff]   ;;  %v9843_v26 = vld [vmem:[%s11144_s20 + $0x304] ss:$16 sps:$4 sm:$0xff]  }
 0x49a   : > { %4451 = vmatprep.subr.bf16.mxu0 %v9753_v13  ;;  %4492 = vmatprep.subr.bf16.mxu1 %v9756_v25  ;;  %v9841_v13 = vld [vmem:[%s11144_s20 + $0x300] ss:$16 sps:$4 sm:$0xff]   ;;  %v9844_v25 = vld [vmem:[%s11144_s20 + $0x308] ss:$16 sps:$4 sm:$0xff]  }
 0x49c   : > { %4001 = vmatmul.mubr.bf16.vlgmr.msra.gmra.mxu0 %v12589_v34  ;;  %4042 = vmatmul.mubr.bf16.vlgmr.msra.gmra.mxu1 %v12589_v34 }
 0x49d   : > { %4452 = vmatpush1.bf16.msra.mxu0 %v9751_v43  ;;  %4493 = vmatpush1.bf16.msra.mxu1 %v9754_v53  ;;  %v9849_v43 = vld [vmem:[%s11144_s20 + $0x4e4] ss:$16 sps:$4 sm:$0xff]   ;;  %v9852_v53 = vld [vmem:[%s11144_s20 + $0x4ec] ss:$16 sps:$4 sm:$0xff]  }
 0x49e   : > { %4453 = vmatprep.subr.bf16.mxu0 %v9759_v15  ;;  %4494 = vmatprep.subr.bf16.mxu1 %v9762_v11  ;;  %v4127_v15 = vrot.slane %v12589_v34, 2  ;;  %v9847_v11 = vld [vmem:[%s11144_s20 + $0x4e0] ss:$16 sps:$4 sm:$0xff]   ;;  %v9856_v34 = vld [vmem:[%s11144_s20 + $0x4c8] ss:$16 sps:$4 sm:$0xff]  }
 0x49f   : > { %4483 = vmatprep.mubr.bf16.mxu0 %v4128_v10  ;;  %4524 = vmatprep.mubr.bf16.mxu1 %v4128_v10  ;;  %v9850_v10 = vld [vmem:[%s11144_s20 + $0x4e8] ss:$16 sps:$4 sm:$0xff]  }
 0x4a1   : > { %4454 = vmatpush1.bf16.msra.mxu0 %v9757_v54  ;;  %4495 = vmatpush1.bf16.msra.mxu1 %v9760_v36  ;;  %v9855_v54 = vld [vmem:[%s11144_s20 + $0x4c4] ss:$16 sps:$4 sm:$0xff]  }
 0x4a2   : > { %4455 = vmatprep.subr.bf16.mxu0 %v9765_v4  ;;  %4496 = vmatprep.subr.bf16.mxu1 %v9768_v42  ;;  %v3577_v36 = vld [vmem:[%s12561_s29 + $0x18] sm:$0xff]  ;;  %v9858_v4 = vld [vmem:[%s11144_s20 + $0x4cc] ss:$16 sps:$4 sm:$0xff]  }
 0x4a3   : > { %v12664_v42 = vpack.c.bf16 %v3577_v36, %v3577_v36 }
 0x4a5   : > { %4456 = vmatpush1.bf16.msra.mxu0 %v9763_v7  ;;  %4497 = vmatpush1.bf16.msra.mxu1 %v9766_v45  ;;  %v9853_v7 = vld [vmem:[%s11144_s20 + $0x4c0] ss:$16 sps:$4 sm:$0xff]   ;;  %v9861_v45 = vld [vmem:[%s11144_s20 + $0x4a4] ss:$16 sps:$4 sm:$0xff]  }
 0x4a6   : > { %4457 = vmatprep.subr.bf16.mxu0 %v9771_v60  ;;  %4498 = vmatprep.subr.bf16.mxu1 %v9774_v40  ;;  %v9864_v60 = vld [vmem:[%s11144_s20 + $0x4ac] ss:$16 sps:$4 sm:$0xff]   ;;  %v9859_v40 = vld [vmem:[%s11144_s20 + $0x4a0] ss:$16 sps:$4 sm:$0xff]  }
 0x4a9   : > { %4458 = vmatpush1.bf16.msra.mxu0 %v9769_v12  ;;  %4499 = vmatpush1.bf16.msra.mxu1 %v9772_v50  ;;  %v9862_v12 = vld [vmem:[%s11144_s20 + $0x4a8] ss:$16 sps:$4 sm:$0xff]   ;;  %v9867_v50 = vld [vmem:[%s11144_s20 + $0x484] ss:$16 sps:$4 sm:$0xff]  }
 0x4aa   : > { %4459 = vmatprep.subr.bf16.mxu0 %v9777_v1  ;;  %4500 = vmatprep.subr.bf16.mxu1 %v9780_v14  ;;  %v9870_v1 = vld [vmem:[%s11144_s20 + $0x48c] ss:$16 sps:$4 sm:$0xff]   ;;  %v9865_v14 = vld [vmem:[%s11144_s20 + $0x480] ss:$16 sps:$4 sm:$0xff]  }
 0x4ad   : > { %4460 = vmatpush1.bf16.msra.mxu0 %v9775_v37  ;;  %4501 = vmatpush1.bf16.msra.mxu1 %v9778_v8  ;;  %v9868_v37 = vld [vmem:[%s11144_s20 + $0x488] ss:$16 sps:$4 sm:$0xff]   ;;  %v9873_v8 = vld [vmem:[%s11144_s20 + $0x464] ss:$16 sps:$4 sm:$0xff]  }
 0x4ae   : > { %4461 = vmatprep.subr.bf16.mxu0 %v9783_v17  ;;  %4502 = vmatprep.subr.bf16.mxu1 %v9786_v32  ;;  %v9876_v17 = vld [vmem:[%s11144_s20 + $0x46c] ss:$16 sps:$4 sm:$0xff]   ;;  %v9871_v32 = vld [vmem:[%s11144_s20 + $0x460] ss:$16 sps:$4 sm:$0xff]  }
 0x4b1   : > { %4462 = vmatpush1.bf16.msra.mxu0 %v9781_v51  ;;  %4503 = vmatpush1.bf16.msra.mxu1 %v9784_v48  ;;  %v9874_v51 = vld [vmem:[%s11144_s20 + $0x468] ss:$16 sps:$4 sm:$0xff]   ;;  %v9879_v48 = vld [vmem:[%s11144_s20 + $0x444] ss:$16 sps:$4 sm:$0xff]  }
 0x4b2   : > { %4463 = vmatprep.subr.bf16.mxu0 %v9789_v33  ;;  %4504 = vmatprep.subr.bf16.mxu1 %v9792_v6  ;;  %v9882_v33 = vld [vmem:[%s11144_s20 + $0x44c] ss:$16 sps:$4 sm:$0xff]   ;;  %v9877_v6 = vld [vmem:[%s11144_s20 + $0x440] ss:$16 sps:$4 sm:$0xff]  }
 0x4b5   : > { %4464 = vmatpush1.bf16.msra.mxu0 %v9787_v52  ;;  %4505 = vmatpush1.bf16.msra.mxu1 %v9790_v22  ;;  %v9880_v52 = vld [vmem:[%s11144_s20 + $0x448] ss:$16 sps:$4 sm:$0xff]   ;;  %v9885_v22 = vld [vmem:[%s11144_s20 + $0x424] ss:$16 sps:$4 sm:$0xff]  }
 0x4b6   : > { %4465 = vmatprep.subr.bf16.mxu0 %v9795_v19  ;;  %4506 = vmatprep.subr.bf16.mxu1 %v9798_v24  ;;  %v9888_v19 = vld [vmem:[%s11144_s20 + $0x42c] ss:$16 sps:$4 sm:$0xff]   ;;  %v9883_v24 = vld [vmem:[%s11144_s20 + $0x420] ss:$16 sps:$4 sm:$0xff]  }
 0x4b9   : > { %4466 = vmatpush1.bf16.msra.mxu0 %v9793_v62  ;;  %4507 = vmatpush1.bf16.msra.mxu1 %v9796_v35  ;;  %v9886_v62 = vld [vmem:[%s11144_s20 + $0x428] ss:$16 sps:$4 sm:$0xff]   ;;  %v9891_v35 = vld [vmem:[%s11144_s20 + $0x404] ss:$16 sps:$4 sm:$0xff]  }
 0x4ba   : > { %4467 = vmatprep.subr.bf16.mxu0 %v9801_v23  ;;  %4508 = vmatprep.subr.bf16.mxu1 %v9804_v56  ;;  %v9894_v23 = vld [vmem:[%s11144_s20 + $0x40c] ss:$16 sps:$4 sm:$0xff]   ;;  %v9889_v56 = vld [vmem:[%s11144_s20 + $0x400] ss:$16 sps:$4 sm:$0xff]  }
 0x4bd   : > { %4468 = vmatpush2.bf16.msra.mxu0 %v9799_v5  ;;  %4509 = vmatpush2.bf16.msra.mxu1 %v9802_v61  ;;  %v9892_v5 = vld [vmem:[%s11144_s20 + $0x408] ss:$16 sps:$4 sm:$0xff]   ;;  %v9897_v61 = vld [vmem:[%s11144_s20 + $0x5e4] ss:$16 sps:$4 sm:$0xff]  }
 0x4be   : > { %4469 = vmatprep.subr.bf16.mxu0 %v9807_v18  ;;  %4510 = vmatprep.subr.bf16.mxu1 %v9810_v9  ;;  %v9900_v18 = vld [vmem:[%s11144_s20 + $0x5ec] ss:$16 sps:$4 sm:$0xff]   ;;  %v9895_v9 = vld [vmem:[%s11144_s20 + $0x5e0] ss:$16 sps:$4 sm:$0xff]  }
 0x4c1   : > { %4470 = vmatpush2.bf16.msra.mxu0 %v9805_v29  ;;  %4511 = vmatpush2.bf16.msra.mxu1 %v9808_v55  ;;  %v9898_v29 = vld [vmem:[%s11144_s20 + $0x5e8] ss:$16 sps:$4 sm:$0xff]   ;;  %v9903_v55 = vld [vmem:[%s11144_s20 + $0x5c4] ss:$16 sps:$4 sm:$0xff]  }
 0x4c2   : > { %4471 = vmatprep.subr.bf16.mxu0 %v9813_v44  ;;  %4512 = vmatprep.subr.bf16.mxu1 %v9816_v47  ;;  %v9906_v44 = vld [vmem:[%s11144_s20 + $0x5cc] ss:$16 sps:$4 sm:$0xff]   ;;  %v9901_v47 = vld [vmem:[%s11144_s20 + $0x5c0] ss:$16 sps:$4 sm:$0xff]  }
 0x4c5   : > { %4472 = vmatpush2.bf16.msra.mxu0 %v9811_v31  ;;  %4513 = vmatpush2.bf16.msra.mxu1 %v9814_v59  ;;  %v9904_v31 = vld [vmem:[%s11144_s20 + $0x5c8] ss:$16 sps:$4 sm:$0xff]   ;;  %v9909_v59 = vld [vmem:[%s11144_s20 + $0x5a4] ss:$16 sps:$4 sm:$0xff]  }
 0x4c6   : > { %4473 = vmatprep.subr.bf16.mxu0 %v9819_v28  ;;  %4514 = vmatprep.subr.bf16.mxu1 %v9822_v27  ;;  %v9912_v28 = vld [vmem:[%s11144_s20 + $0x5ac] ss:$16 sps:$4 sm:$0xff]   ;;  %v9907_v27 = vld [vmem:[%s11144_s20 + $0x5a0] ss:$16 sps:$4 sm:$0xff]  }
 0x4c9   : > { %4474 = vmatpush2.bf16.msra.mxu0 %v9817_v21  ;;  %4515 = vmatpush2.bf16.msra.mxu1 %v9820_v63  ;;  %v9910_v21 = vld [vmem:[%s11144_s20 + $0x5a8] ss:$16 sps:$4 sm:$0xff]   ;;  %v9915_v63 = vld [vmem:[%s11144_s20 + $0x584] ss:$16 sps:$4 sm:$0xff]  }
 0x4ca   : > { %4475 = vmatprep.subr.bf16.mxu0 %v9825_v58  ;;  %4516 = vmatprep.subr.bf16.mxu1 %v9828_v30  ;;  %v9918_v58 = vld [vmem:[%s11144_s20 + $0x58c] ss:$16 sps:$4 sm:$0xff]   ;;  %v9913_v30 = vld [vmem:[%s11144_s20 + $0x580] ss:$16 sps:$4 sm:$0xff]  }
 0x4cd   : > { %4476 = vmatpush2.bf16.msra.mxu0 %v9823_v57  ;;  %4517 = vmatpush2.bf16.msra.mxu1 %v9826_v2  ;;  %v9916_v57 = vld [vmem:[%s11144_s20 + $0x588] ss:$16 sps:$4 sm:$0xff]   ;;  %v9921_v2 = vld [vmem:[%s11144_s20 + $0x564] ss:$16 sps:$4 sm:$0xff]  }
 0x4ce   : > { %4477 = vmatprep.subr.bf16.mxu0 %v9831_v16  ;;  %4518 = vmatprep.subr.bf16.mxu1 %v9834_v49  ;;  %v9924_v16 = vld [vmem:[%s11144_s20 + $0x56c] ss:$16 sps:$4 sm:$0xff]   ;;  %v9919_v49 = vld [vmem:[%s11144_s20 + $0x560] ss:$16 sps:$4 sm:$0xff]  }
 0x4d1   : > { %4478 = vmatpush2.bf16.msra.mxu0 %v9829_v39  ;;  %4519 = vmatpush2.bf16.msra.mxu1 %v9832_v20  ;;  %v9922_v39 = vld [vmem:[%s11144_s20 + $0x568] ss:$16 sps:$4 sm:$0xff]   ;;  %v9927_v20 = vld [vmem:[%s11144_s20 + $0x544] ss:$16 sps:$4 sm:$0xff]  }
 0x4d2   : > { %4479 = vmatprep.subr.bf16.mxu0 %v9837_v38  ;;  %4520 = vmatprep.subr.bf16.mxu1 %v9840_v0  ;;  %v9930_v38 = vld [vmem:[%s11144_s20 + $0x54c] ss:$16 sps:$4 sm:$0xff]   ;;  %v9925_v0 = vld [vmem:[%s11144_s20 + $0x540] ss:$16 sps:$4 sm:$0xff]  }
 0x4d5   : > { %4480 = vmatpush2.bf16.msra.mxu0 %v9835_v46  ;;  %4521 = vmatpush2.bf16.msra.mxu1 %v9838_v3  ;;  %v9928_v46 = vld [vmem:[%s11144_s20 + $0x548] ss:$16 sps:$4 sm:$0xff]   ;;  %v9933_v3 = vld [vmem:[%s11144_s20 + $0x524] ss:$16 sps:$4 sm:$0xff]  }
 0x4d6   : > { %4481 = vmatprep.subr.bf16.mxu0 %v9843_v26  ;;  %4522 = vmatprep.subr.bf16.mxu1 %v9846_v41  ;;  %v9936_v26 = vld [vmem:[%s11144_s20 + $0x52c] ss:$16 sps:$4 sm:$0xff]   ;;  %v9931_v41 = vld [vmem:[%s11144_s20 + $0x520] ss:$16 sps:$4 sm:$0xff]  }
 0x4d9   : > { %4482 = vmatpush2.bf16.msra.mxu0 %v9841_v13  ;;  %4523 = vmatpush2.bf16.msra.mxu1 %v9844_v25  ;;  %v9934_v13 = vld [vmem:[%s11144_s20 + $0x528] ss:$16 sps:$4 sm:$0xff]   ;;  %v9939_v25 = vld [vmem:[%s11144_s20 + $0x504] ss:$16 sps:$4 sm:$0xff]  }
 0x4da   : > { %4930 = vmatprep.subr.bf16.mxu0 %v9849_v43  ;;  %4971 = vmatprep.subr.bf16.mxu1 %v9852_v53  ;;  %v9942_v43 = vld [vmem:[%s11144_s20 + $0x50c] ss:$16 sps:$4 sm:$0xff]   ;;  %v9937_v53 = vld [vmem:[%s11144_s20 + $0x500] ss:$16 sps:$4 sm:$0xff]  }
 0x4dc   : > { %4484 = vmatmul.mubr.bf16.vlgmr.msra.gmra.mxu0 %v4127_v15  ;;  %4525 = vmatmul.mubr.bf16.vlgmr.msra.gmra.mxu1 %v4127_v15  ;;  %v9940_v15 = vld [vmem:[%s11144_s20 + $0x508] ss:$16 sps:$4 sm:$0xff]  }
 0x4dd   : > { %4931 = vmatpush1.bf16.msra.mxu0 %v9847_v11  ;;  %4972 = vmatpush1.bf16.msra.mxu1 %v9850_v10  ;;  %v3576_v11 = vld [vmem:[%s12561_s29 + $0x10] sm:$0xff]  ;;  %v9945_v10 = vld [vmem:[%s11144_s20 + $0x6e4] ss:$16 sps:$4 sm:$0xff]  }
 0x4de   : > { %4932 = vmatprep.subr.bf16.mxu0 %v9855_v54  ;;  %4973 = vmatprep.subr.bf16.mxu1 %v9858_v4  ;;  %v9948_v54 = vld [vmem:[%s11144_s20 + $0x6ec] ss:$16 sps:$4 sm:$0xff]   ;;  %v12729_v36 = vpack.c.bf16 %v3576_v11, %v3576_v11  ;;  %v9943_v4 = vld [vmem:[%s11144_s20 + $0x6e0] ss:$16 sps:$4 sm:$0xff]  }
 0x4df   : > { %4962 = vmatprep.mubr.bf16.mxu0 %v12664_v42  ;;  %5003 = vmatprep.mubr.bf16.mxu1 %v12664_v42  ;;  %v10038_v11 = vld [vmem:[%s11144_s20 + $0x70c] ss:$16 sps:$4 sm:$0xff]  }
 0x4e1   : > { %4933 = vmatpush1.bf16.msra.mxu0 %v9853_v7  ;;  %4974 = vmatpush1.bf16.msra.mxu1 %v9856_v34  ;;  %v9946_v7 = vld [vmem:[%s11144_s20 + $0x6e8] ss:$16 sps:$4 sm:$0xff]   ;;  %v9951_v34 = vld [vmem:[%s11144_s20 + $0x6c4] ss:$16 sps:$4 sm:$0xff]  }
 0x4e2   : > { %4934 = vmatprep.subr.bf16.mxu0 %v9861_v45  ;;  %4975 = vmatprep.subr.bf16.mxu1 %v9864_v60  ;;  %v9954_v45 = vld [vmem:[%s11144_s20 + $0x6cc] ss:$16 sps:$4 sm:$0xff]   ;;  %v5090_v60 = vrot.slane %v12664_v42, 2  ;;  %v9955_v42 = vld [vmem:[%s11144_s20 + $0x6a0] ss:$16 sps:$4 sm:$0xff]  }
 0x4e5   : > { %4935 = vmatpush1.bf16.msra.mxu0 %v9859_v40  ;;  %4976 = vmatpush1.bf16.msra.mxu1 %v9862_v12  ;;  %v9949_v40 = vld [vmem:[%s11144_s20 + $0x6c0] ss:$16 sps:$4 sm:$0xff]   ;;  %v9952_v12 = vld [vmem:[%s11144_s20 + $0x6c8] ss:$16 sps:$4 sm:$0xff]  }
 0x4e6   : > { %4936 = vmatprep.subr.bf16.mxu0 %v9867_v50  ;;  %4977 = vmatprep.subr.bf16.mxu1 %v9870_v1  ;;  %v9957_v50 = vld [vmem:[%s11144_s20 + $0x6a4] ss:$16 sps:$4 sm:$0xff]   ;;  %v9960_v1 = vld [vmem:[%s11144_s20 + $0x6ac] ss:$16 sps:$4 sm:$0xff]  }
 0x4e9   : > { %4937 = vmatpush1.bf16.msra.mxu0 %v9865_v14  ;;  %4978 = vmatpush1.bf16.msra.mxu1 %v9868_v37  ;;  %v9958_v14 = vld [vmem:[%s11144_s20 + $0x6a8] ss:$16 sps:$4 sm:$0xff]   ;;  %v9963_v37 = vld [vmem:[%s11144_s20 + $0x684] ss:$16 sps:$4 sm:$0xff]  }
 0x4ea   : > { %4938 = vmatprep.subr.bf16.mxu0 %v9873_v8  ;;  %4979 = vmatprep.subr.bf16.mxu1 %v9876_v17  ;;  %v9966_v8 = vld [vmem:[%s11144_s20 + $0x68c] ss:$16 sps:$4 sm:$0xff]   ;;  %v9961_v17 = vld [vmem:[%s11144_s20 + $0x680] ss:$16 sps:$4 sm:$0xff]  }
 0x4ed   : > { %4939 = vmatpush1.bf16.msra.mxu0 %v9871_v32  ;;  %4980 = vmatpush1.bf16.msra.mxu1 %v9874_v51  ;;  %v9964_v32 = vld [vmem:[%s11144_s20 + $0x688] ss:$16 sps:$4 sm:$0xff]   ;;  %v9969_v51 = vld [vmem:[%s11144_s20 + $0x664] ss:$16 sps:$4 sm:$0xff]  }
 0x4ee   : > { %4940 = vmatprep.subr.bf16.mxu0 %v9879_v48  ;;  %4981 = vmatprep.subr.bf16.mxu1 %v9882_v33  ;;  %v9972_v48 = vld [vmem:[%s11144_s20 + $0x66c] ss:$16 sps:$4 sm:$0xff]   ;;  %v9967_v33 = vld [vmem:[%s11144_s20 + $0x660] ss:$16 sps:$4 sm:$0xff]  }
 0x4f1   : > { %4941 = vmatpush1.bf16.msra.mxu0 %v9877_v6  ;;  %4982 = vmatpush1.bf16.msra.mxu1 %v9880_v52  ;;  %v9970_v6 = vld [vmem:[%s11144_s20 + $0x668] ss:$16 sps:$4 sm:$0xff]   ;;  %v9975_v52 = vld [vmem:[%s11144_s20 + $0x644] ss:$16 sps:$4 sm:$0xff]  }
 0x4f2   : > { %4942 = vmatprep.subr.bf16.mxu0 %v9885_v22  ;;  %4983 = vmatprep.subr.bf16.mxu1 %v9888_v19  ;;  %v9978_v22 = vld [vmem:[%s11144_s20 + $0x64c] ss:$16 sps:$4 sm:$0xff]   ;;  %v9973_v19 = vld [vmem:[%s11144_s20 + $0x640] ss:$16 sps:$4 sm:$0xff]  }
 0x4f5   : > { %4943 = vmatpush1.bf16.msra.mxu0 %v9883_v24  ;;  %4984 = vmatpush1.bf16.msra.mxu1 %v9886_v62  ;;  %v9976_v24 = vld [vmem:[%s11144_s20 + $0x648] ss:$16 sps:$4 sm:$0xff]   ;;  %v9981_v62 = vld [vmem:[%s11144_s20 + $0x624] ss:$16 sps:$4 sm:$0xff]  }
 0x4f6   : > { %4944 = vmatprep.subr.bf16.mxu0 %v9891_v35  ;;  %4985 = vmatprep.subr.bf16.mxu1 %v9894_v23  ;;  %v9984_v35 = vld [vmem:[%s11144_s20 + $0x62c] ss:$16 sps:$4 sm:$0xff]   ;;  %v9979_v23 = vld [vmem:[%s11144_s20 + $0x620] ss:$16 sps:$4 sm:$0xff]  }
 0x4f9   : > { %4945 = vmatpush1.bf16.msra.mxu0 %v9889_v56  ;;  %4986 = vmatpush1.bf16.msra.mxu1 %v9892_v5  ;;  %v9982_v56 = vld [vmem:[%s11144_s20 + $0x628] ss:$16 sps:$4 sm:$0xff]   ;;  %v9987_v5 = vld [vmem:[%s11144_s20 + $0x604] ss:$16 sps:$4 sm:$0xff]  }
 0x4fa   : > { %4946 = vmatprep.subr.bf16.mxu0 %v9897_v61  ;;  %4987 = vmatprep.subr.bf16.mxu1 %v9900_v18  ;;  %v9990_v61 = vld [vmem:[%s11144_s20 + $0x60c] ss:$16 sps:$4 sm:$0xff]   ;;  %v9985_v18 = vld [vmem:[%s11144_s20 + $0x600] ss:$16 sps:$4 sm:$0xff]  }
 0x4fd   : > { %4947 = vmatpush2.bf16.msra.mxu0 %v9895_v9  ;;  %4988 = vmatpush2.bf16.msra.mxu1 %v9898_v29  ;;  %v9988_v9 = vld [vmem:[%s11144_s20 + $0x608] ss:$16 sps:$4 sm:$0xff]   ;;  %v9993_v29 = vld [vmem:[%s11144_s20 + $0x7e4] ss:$16 sps:$4 sm:$0xff]  }
 0x4fe   : > { %4948 = vmatprep.subr.bf16.mxu0 %v9903_v55  ;;  %4989 = vmatprep.subr.bf16.mxu1 %v9906_v44  ;;  %v9996_v55 = vld [vmem:[%s11144_s20 + $0x7ec] ss:$16 sps:$4 sm:$0xff]   ;;  %v9991_v44 = vld [vmem:[%s11144_s20 + $0x7e0] ss:$16 sps:$4 sm:$0xff]  }
 0x501   : > { %4949 = vmatpush2.bf16.msra.mxu0 %v9901_v47  ;;  %4990 = vmatpush2.bf16.msra.mxu1 %v9904_v31  ;;  %v9994_v47 = vld [vmem:[%s11144_s20 + $0x7e8] ss:$16 sps:$4 sm:$0xff]   ;;  %v9999_v31 = vld [vmem:[%s11144_s20 + $0x7c4] ss:$16 sps:$4 sm:$0xff]  }
 0x502   : > { %4950 = vmatprep.subr.bf16.mxu0 %v9909_v59  ;;  %4991 = vmatprep.subr.bf16.mxu1 %v9912_v28  ;;  %v10002_v59 = vld [vmem:[%s11144_s20 + $0x7cc] ss:$16 sps:$4 sm:$0xff]   ;;  %v9997_v28 = vld [vmem:[%s11144_s20 + $0x7c0] ss:$16 sps:$4 sm:$0xff]  }
 0x505   : > { %4951 = vmatpush2.bf16.msra.mxu0 %v9907_v27  ;;  %4992 = vmatpush2.bf16.msra.mxu1 %v9910_v21  ;;  %v10000_v27 = vld [vmem:[%s11144_s20 + $0x7c8] ss:$16 sps:$4 sm:$0xff]   ;;  %v10005_v21 = vld [vmem:[%s11144_s20 + $0x7a4] ss:$16 sps:$4 sm:$0xff]  }
 0x506   : > { %4952 = vmatprep.subr.bf16.mxu0 %v9915_v63  ;;  %4993 = vmatprep.subr.bf16.mxu1 %v9918_v58  ;;  %v10008_v63 = vld [vmem:[%s11144_s20 + $0x7ac] ss:$16 sps:$4 sm:$0xff]   ;;  %v10003_v58 = vld [vmem:[%s11144_s20 + $0x7a0] ss:$16 sps:$4 sm:$0xff]  }
 0x509   : > { %4953 = vmatpush2.bf16.msra.mxu0 %v9913_v30  ;;  %4994 = vmatpush2.bf16.msra.mxu1 %v9916_v57  ;;  %v10006_v30 = vld [vmem:[%s11144_s20 + $0x7a8] ss:$16 sps:$4 sm:$0xff]   ;;  %v10011_v57 = vld [vmem:[%s11144_s20 + $0x784] ss:$16 sps:$4 sm:$0xff]  }
 0x50a   : > { %4954 = vmatprep.subr.bf16.mxu0 %v9921_v2  ;;  %4995 = vmatprep.subr.bf16.mxu1 %v9924_v16  ;;  %v10014_v2 = vld [vmem:[%s11144_s20 + $0x78c] ss:$16 sps:$4 sm:$0xff]   ;;  %v10009_v16 = vld [vmem:[%s11144_s20 + $0x780] ss:$16 sps:$4 sm:$0xff]  }
 0x50d   : > { %4955 = vmatpush2.bf16.msra.mxu0 %v9919_v49  ;;  %4996 = vmatpush2.bf16.msra.mxu1 %v9922_v39  ;;  %v10012_v49 = vld [vmem:[%s11144_s20 + $0x788] ss:$16 sps:$4 sm:$0xff]   ;;  %v10017_v39 = vld [vmem:[%s11144_s20 + $0x764] ss:$16 sps:$4 sm:$0xff]  }
 0x50e   : > { %4956 = vmatprep.subr.bf16.mxu0 %v9927_v20  ;;  %4997 = vmatprep.subr.bf16.mxu1 %v9930_v38  ;;  %v10020_v20 = vld [vmem:[%s11144_s20 + $0x76c] ss:$16 sps:$4 sm:$0xff]   ;;  %v10015_v38 = vld [vmem:[%s11144_s20 + $0x760] ss:$16 sps:$4 sm:$0xff]  }
 0x511   : > { %4957 = vmatpush2.bf16.msra.mxu0 %v9925_v0  ;;  %4998 = vmatpush2.bf16.msra.mxu1 %v9928_v46  ;;  %v10018_v0 = vld [vmem:[%s11144_s20 + $0x768] ss:$16 sps:$4 sm:$0xff]   ;;  %v10023_v46 = vld [vmem:[%s11144_s20 + $0x744] ss:$16 sps:$4 sm:$0xff]  }
 0x512   : > { %4958 = vmatprep.subr.bf16.mxu0 %v9933_v3  ;;  %4999 = vmatprep.subr.bf16.mxu1 %v9936_v26  ;;  %v10026_v3 = vld [vmem:[%s11144_s20 + $0x74c] ss:$16 sps:$4 sm:$0xff]   ;;  %v10021_v26 = vld [vmem:[%s11144_s20 + $0x740] ss:$16 sps:$4 sm:$0xff]  }
 0x515   : > { %4959 = vmatpush2.bf16.msra.mxu0 %v9931_v41  ;;  %5000 = vmatpush2.bf16.msra.mxu1 %v9934_v13  ;;  %v10024_v41 = vld [vmem:[%s11144_s20 + $0x748] ss:$16 sps:$4 sm:$0xff]   ;;  %v10029_v13 = vld [vmem:[%s11144_s20 + $0x724] ss:$16 sps:$4 sm:$0xff]  }
 0x516   : > { %4960 = vmatprep.subr.bf16.mxu0 %v9939_v25  ;;  %5001 = vmatprep.subr.bf16.mxu1 %v9942_v43  ;;  %v10032_v25 = vld [vmem:[%s11144_s20 + $0x72c] ss:$16 sps:$4 sm:$0xff]   ;;  %v10027_v43 = vld [vmem:[%s11144_s20 + $0x720] ss:$16 sps:$4 sm:$0xff]  }
 0x519   : > { %4961 = vmatpush2.bf16.msra.mxu0 %v9937_v53  ;;  %5002 = vmatpush2.bf16.msra.mxu1 %v9940_v15  ;;  %v10030_v53 = vld [vmem:[%s11144_s20 + $0x728] ss:$16 sps:$4 sm:$0xff]   ;;  %v10035_v15 = vld [vmem:[%s11144_s20 + $0x704] ss:$16 sps:$4 sm:$0xff]  }
 0x51a   : > { %5413 = vmatprep.subr.bf16.mxu0 %v9945_v10  ;;  %5454 = vmatprep.subr.bf16.mxu1 %v9948_v54  ;;  %v10033_v10 = vld [vmem:[%s11144_s20 + $0x700] ss:$16 sps:$4 sm:$0xff]   ;;  %v10036_v54 = vld [vmem:[%s11144_s20 + $0x708] ss:$16 sps:$4 sm:$0xff]  }
 0x51c   : > { %4963 = vmatmul.mubr.bf16.vlgmr.msra.gmra.mxu0 %v12729_v36  ;;  %5004 = vmatmul.mubr.bf16.vlgmr.msra.gmra.mxu1 %v12729_v36 }
 0x51d   : > { %5414 = vmatpush1.bf16.msra.mxu0 %v9943_v4  ;;  %5455 = vmatpush1.bf16.msra.mxu1 %v9946_v7  ;;  %v10041_v4 = vld [vmem:[%s11144_s20 + $0x8e4] ss:$16 sps:$4 sm:$0xff]   ;;  %v10044_v7 = vld [vmem:[%s11144_s20 + $0x8ec] ss:$16 sps:$4 sm:$0xff]  }
 0x51e   : > { %5415 = vmatprep.subr.bf16.mxu0 %v9951_v34  ;;  %5456 = vmatprep.subr.bf16.mxu1 %v9954_v45  ;;  %v10039_v34 = vld [vmem:[%s11144_s20 + $0x8e0] ss:$16 sps:$4 sm:$0xff]   ;;  %v5089_v45 = vrot.slane %v12729_v36, 2 }
 0x51f   : > { %5445 = vmatprep.mubr.bf16.mxu0 %v5090_v60  ;;  %5486 = vmatprep.mubr.bf16.mxu1 %v5090_v60  ;;  %v10042_v60 = vld [vmem:[%s11144_s20 + $0x8e8] ss:$16 sps:$4 sm:$0xff]   ;;  %v10045_v36 = vld [vmem:[%s11144_s20 + $0x8c0] ss:$16 sps:$4 sm:$0xff]  }
 0x521   : > { %5416 = vmatpush1.bf16.msra.mxu0 %v9949_v40  ;;  %5457 = vmatpush1.bf16.msra.mxu1 %v9952_v12  ;;  %v3579_v40 = vld [vmem:[%s12561_s29 + $0x28] sm:$0xff] }
 0x522   : > { %5417 = vmatprep.subr.bf16.mxu0 %v9957_v50  ;;  %5458 = vmatprep.subr.bf16.mxu1 %v9960_v1  ;;  %v10047_v12 = vld [vmem:[%s11144_s20 + $0x8c4] ss:$16 sps:$4 sm:$0xff]   ;;  %v10050_v50 = vld [vmem:[%s11144_s20 + $0x8cc] ss:$16 sps:$4 sm:$0xff]   ;;  %v12804_v1 = vpack.c.bf16 %v3579_v40, %v3579_v40 }
 0x523   : > { %v10125_v40 = vld [vmem:[%s11144_s20 + $0x924] ss:$16 sps:$4 sm:$0xff]  }
 0x525   : > { %5418 = vmatpush1.bf16.msra.mxu0 %v9955_v42  ;;  %5459 = vmatpush1.bf16.msra.mxu1 %v9958_v14 }
 0x526   : > { %5419 = vmatprep.subr.bf16.mxu0 %v9963_v37  ;;  %5460 = vmatprep.subr.bf16.mxu1 %v9966_v8  ;;  %v10048_v37 = vld [vmem:[%s11144_s20 + $0x8c8] ss:$16 sps:$4 sm:$0xff]  }
 0x529   : > { %5420 = vmatpush1.bf16.msra.mxu0 %v9961_v17  ;;  %5461 = vmatpush1.bf16.msra.mxu1 %v9964_v32  ;;  %v10053_v32 = vld [vmem:[%s11144_s20 + $0x8a4] ss:$16 sps:$4 sm:$0xff]  }
 0x52a   : > { %5421 = vmatprep.subr.bf16.mxu0 %v9969_v51  ;;  %5462 = vmatprep.subr.bf16.mxu1 %v9972_v48  ;;  %v10056_v51 = vld [vmem:[%s11144_s20 + $0x8ac] ss:$16 sps:$4 sm:$0xff]  }
 0x52d   : > { %5422 = vmatpush1.bf16.msra.mxu0 %v9967_v33  ;;  %5463 = vmatpush1.bf16.msra.mxu1 %v9970_v6 }
 0x52e   : > { %5423 = vmatprep.subr.bf16.mxu0 %v9975_v52  ;;  %5464 = vmatprep.subr.bf16.mxu1 %v9978_v22  ;;  %v10051_v22 = vld [vmem:[%s11144_s20 + $0x8a0] ss:$16 sps:$4 sm:$0xff]  }
 0x531   : > { %5424 = vmatpush1.bf16.msra.mxu0 %v9973_v19  ;;  %5465 = vmatpush1.bf16.msra.mxu1 %v9976_v24  ;;  %v10054_v19 = vld [vmem:[%s11144_s20 + $0x8a8] ss:$16 sps:$4 sm:$0xff]  }
 0x532   : > { %5425 = vmatprep.subr.bf16.mxu0 %v9981_v62  ;;  %5466 = vmatprep.subr.bf16.mxu1 %v9984_v35  ;;  %v10059_v35 = vld [vmem:[%s11144_s20 + $0x884] ss:$16 sps:$4 sm:$0xff]  }
 0x535   : > { %5426 = vmatpush1.bf16.msra.mxu0 %v9979_v23  ;;  %5467 = vmatpush1.bf16.msra.mxu1 %v9982_v56  ;;  %v10062_v23 = vld [vmem:[%s11144_s20 + $0x88c] ss:$16 sps:$4 sm:$0xff]   ;;  %v10057_v56 = vld [vmem:[%s11144_s20 + $0x880] ss:$16 sps:$4 sm:$0xff]  }
 0x536   : > { %5427 = vmatprep.subr.bf16.mxu0 %v9987_v5  ;;  %5468 = vmatprep.subr.bf16.mxu1 %v9990_v61  ;;  %v10060_v5 = vld [vmem:[%s11144_s20 + $0x888] ss:$16 sps:$4 sm:$0xff]   ;;  %v10065_v61 = vld [vmem:[%s11144_s20 + $0x864] ss:$16 sps:$4 sm:$0xff]  }
 0x539   : > { %5428 = vmatpush1.bf16.msra.mxu0 %v9985_v18  ;;  %5469 = vmatpush1.bf16.msra.mxu1 %v9988_v9  ;;  %v10068_v18 = vld [vmem:[%s11144_s20 + $0x86c] ss:$16 sps:$4 sm:$0xff]   ;;  %v10063_v9 = vld [vmem:[%s11144_s20 + $0x860] ss:$16 sps:$4 sm:$0xff]  }
 0x53a   : > { %5429 = vmatprep.subr.bf16.mxu0 %v9993_v29  ;;  %5470 = vmatprep.subr.bf16.mxu1 %v9996_v55  ;;  %v10066_v29 = vld [vmem:[%s11144_s20 + $0x868] ss:$16 sps:$4 sm:$0xff]   ;;  %v10071_v55 = vld [vmem:[%s11144_s20 + $0x844] ss:$16 sps:$4 sm:$0xff]  }
 0x53d   : > { %5430 = vmatpush2.bf16.msra.mxu0 %v9991_v44  ;;  %5471 = vmatpush2.bf16.msra.mxu1 %v9994_v47  ;;  %v10074_v44 = vld [vmem:[%s11144_s20 + $0x84c] ss:$16 sps:$4 sm:$0xff]   ;;  %v10069_v47 = vld [vmem:[%s11144_s20 + $0x840] ss:$16 sps:$4 sm:$0xff]  }
 0x53e   : > { %5431 = vmatprep.subr.bf16.mxu0 %v9999_v31  ;;  %5472 = vmatprep.subr.bf16.mxu1 %v10002_v59  ;;  %v10072_v31 = vld [vmem:[%s11144_s20 + $0x848] ss:$16 sps:$4 sm:$0xff]   ;;  %v10077_v59 = vld [vmem:[%s11144_s20 + $0x824] ss:$16 sps:$4 sm:$0xff]  }
 0x541   : > { %5432 = vmatpush2.bf16.msra.mxu0 %v9997_v28  ;;  %5473 = vmatpush2.bf16.msra.mxu1 %v10000_v27  ;;  %v10080_v28 = vld [vmem:[%s11144_s20 + $0x82c] ss:$16 sps:$4 sm:$0xff]   ;;  %v10075_v27 = vld [vmem:[%s11144_s20 + $0x820] ss:$16 sps:$4 sm:$0xff]  }
 0x542   : > { %5433 = vmatprep.subr.bf16.mxu0 %v10005_v21  ;;  %5474 = vmatprep.subr.bf16.mxu1 %v10008_v63  ;;  %v10078_v21 = vld [vmem:[%s11144_s20 + $0x828] ss:$16 sps:$4 sm:$0xff]   ;;  %v10083_v63 = vld [vmem:[%s11144_s20 + $0x804] ss:$16 sps:$4 sm:$0xff]  }
 0x545   : > { %5434 = vmatpush2.bf16.msra.mxu0 %v10003_v58  ;;  %5475 = vmatpush2.bf16.msra.mxu1 %v10006_v30  ;;  %v10086_v58 = vld [vmem:[%s11144_s20 + $0x80c] ss:$16 sps:$4 sm:$0xff]   ;;  %v10081_v30 = vld [vmem:[%s11144_s20 + $0x800] ss:$16 sps:$4 sm:$0xff]  }
 0x546   : > { %5435 = vmatprep.subr.bf16.mxu0 %v10011_v57  ;;  %5476 = vmatprep.subr.bf16.mxu1 %v10014_v2  ;;  %v10084_v57 = vld [vmem:[%s11144_s20 + $0x808] ss:$16 sps:$4 sm:$0xff]   ;;  %v10089_v2 = vld [vmem:[%s11144_s20 + $0x9e4] ss:$16 sps:$4 sm:$0xff]  }
 0x549   : > { %5436 = vmatpush2.bf16.msra.mxu0 %v10009_v16  ;;  %5477 = vmatpush2.bf16.msra.mxu1 %v10012_v49  ;;  %v10092_v16 = vld [vmem:[%s11144_s20 + $0x9ec] ss:$16 sps:$4 sm:$0xff]   ;;  %v10087_v49 = vld [vmem:[%s11144_s20 + $0x9e0] ss:$16 sps:$4 sm:$0xff]  }
 0x54a   : > { %5437 = vmatprep.subr.bf16.mxu0 %v10017_v39  ;;  %5478 = vmatprep.subr.bf16.mxu1 %v10020_v20  ;;  %v10090_v39 = vld [vmem:[%s11144_s20 + $0x9e8] ss:$16 sps:$4 sm:$0xff]   ;;  %v10095_v20 = vld [vmem:[%s11144_s20 + $0x9c4] ss:$16 sps:$4 sm:$0xff]  }
 0x54d   : > { %5438 = vmatpush2.bf16.msra.mxu0 %v10015_v38  ;;  %5479 = vmatpush2.bf16.msra.mxu1 %v10018_v0  ;;  %v10098_v38 = vld [vmem:[%s11144_s20 + $0x9cc] ss:$16 sps:$4 sm:$0xff]   ;;  %v10093_v0 = vld [vmem:[%s11144_s20 + $0x9c0] ss:$16 sps:$4 sm:$0xff]  }
 0x54e   : > { %5439 = vmatprep.subr.bf16.mxu0 %v10023_v46  ;;  %5480 = vmatprep.subr.bf16.mxu1 %v10026_v3  ;;  %v10096_v46 = vld [vmem:[%s11144_s20 + $0x9c8] ss:$16 sps:$4 sm:$0xff]   ;;  %v10101_v3 = vld [vmem:[%s11144_s20 + $0x9a4] ss:$16 sps:$4 sm:$0xff]  }
 0x551   : > { %5440 = vmatpush2.bf16.msra.mxu0 %v10021_v26  ;;  %5481 = vmatpush2.bf16.msra.mxu1 %v10024_v41  ;;  %v10104_v26 = vld [vmem:[%s11144_s20 + $0x9ac] ss:$16 sps:$4 sm:$0xff]   ;;  %v10099_v41 = vld [vmem:[%s11144_s20 + $0x9a0] ss:$16 sps:$4 sm:$0xff]  }
 0x552   : > { %5441 = vmatprep.subr.bf16.mxu0 %v10029_v13  ;;  %5482 = vmatprep.subr.bf16.mxu1 %v10032_v25  ;;  %v10102_v13 = vld [vmem:[%s11144_s20 + $0x9a8] ss:$16 sps:$4 sm:$0xff]   ;;  %v10107_v25 = vld [vmem:[%s11144_s20 + $0x984] ss:$16 sps:$4 sm:$0xff]  }
 0x555   : > { %5442 = vmatpush2.bf16.msra.mxu0 %v10027_v43  ;;  %5483 = vmatpush2.bf16.msra.mxu1 %v10030_v53  ;;  %v10110_v43 = vld [vmem:[%s11144_s20 + $0x98c] ss:$16 sps:$4 sm:$0xff]   ;;  %v10105_v53 = vld [vmem:[%s11144_s20 + $0x980] ss:$16 sps:$4 sm:$0xff]  }
 0x556   : > { %5443 = vmatprep.subr.bf16.mxu0 %v10035_v15  ;;  %5484 = vmatprep.subr.bf16.mxu1 %v10038_v11  ;;  %v10108_v15 = vld [vmem:[%s11144_s20 + $0x988] ss:$16 sps:$4 sm:$0xff]   ;;  %v10113_v11 = vld [vmem:[%s11144_s20 + $0x964] ss:$16 sps:$4 sm:$0xff]  }
 0x559   : > { %5444 = vmatpush2.bf16.msra.mxu0 %v10033_v10  ;;  %5485 = vmatpush2.bf16.msra.mxu1 %v10036_v54  ;;  %v10116_v10 = vld [vmem:[%s11144_s20 + $0x96c] ss:$16 sps:$4 sm:$0xff]   ;;  %v10111_v54 = vld [vmem:[%s11144_s20 + $0x960] ss:$16 sps:$4 sm:$0xff]  }
 0x55a   : > { %5892 = vmatprep.subr.bf16.mxu0 %v10041_v4  ;;  %5933 = vmatprep.subr.bf16.mxu1 %v10044_v7  ;;  %v10114_v4 = vld [vmem:[%s11144_s20 + $0x968] ss:$16 sps:$4 sm:$0xff]   ;;  %v10119_v7 = vld [vmem:[%s11144_s20 + $0x944] ss:$16 sps:$4 sm:$0xff]  }
 0x55c   : > { %v12806_v42 = vpop.f32.mrf.mxu0  ;;  %v12808_v14 = vpop.f32.mrf.mxu1  ;;  %5446 = vmatmul.mubr.bf16.vlgmr.msra.gmra.mxu0 %v5089_v45  ;;  %5487 = vmatmul.mubr.bf16.vlgmr.msra.gmra.mxu1 %v5089_v45  ;;  %v10117_v45 = vld [vmem:[%s11144_s20 + $0x940] ss:$16 sps:$4 sm:$0xff]  }
 0x55d   : > { %5893 = vmatpush1.bf16.msra.mxu0 %v10039_v34  ;;  %5934 = vmatpush1.bf16.msra.mxu1 %v10042_v60  ;;  %v10122_v34 = vld [vmem:[%s11144_s20 + $0x94c] ss:$16 sps:$4 sm:$0xff]   ;;  %v10120_v60 = vld [vmem:[%s11144_s20 + $0x948] ss:$16 sps:$4 sm:$0xff]  }
 0x55e   : > { %v12812_v8 = vpop.f32.mrf.mxu0  ;;  %v12814_v17 = vpop.f32.mrf.mxu1  ;;  %5894 = vmatprep.subr.bf16.mxu0 %v10047_v12  ;;  %5935 = vmatprep.subr.bf16.mxu1 %v10050_v50  ;;  %v10128_v12 = vld [vmem:[%s11144_s20 + $0x92c] ss:$16 sps:$4 sm:$0xff]   ;;  %v10123_v50 = vld [vmem:[%s11144_s20 + $0x920] ss:$16 sps:$4 sm:$0xff]  }
 0x55f   : > { %v4054_v48 = vcombine.low %v12806_v42, %v12812_v8  ;;  %v4055_v33 = vcombine.low %v12808_v14, %v12814_v17  ;;  %5924 = vmatprep.mubr.bf16.mxu0 %v12804_v1  ;;  %5965 = vmatprep.mubr.bf16.mxu1 %v12804_v1  ;;  %v10147_v14 = vld [vmem:[%s11144_s20 + $0xaa0] ss:$16 sps:$4 sm:$0xff]   ;;  %v10150_v17 = vld [vmem:[%s11144_s20 + $0xaa8] ss:$16 sps:$4 sm:$0xff]  }
 0x560   : > { %v4006_v6 = vpop.f32.mrf.mxu0  ;;  %v4047_v52 = vpop.f32.mrf.mxu1 }
 0x561   : > { %5895 = vmatpush1.bf16.msra.mxu0 %v10045_v36  ;;  %5936 = vmatpush1.bf16.msra.mxu1 %v10048_v37  ;;  %v10126_v36 = vld [vmem:[%s11144_s20 + $0x928] ss:$16 sps:$4 sm:$0xff]   ;;  %v10131_v37 = vld [vmem:[%s11144_s20 + $0x904] ss:$16 sps:$4 sm:$0xff]   ;;  %v3578_v52 = vld [vmem:[%s12561_s29 + $0x20] sm:$0xff] }
 0x562   : > { %v4007_v24 = vpop.f32.mrf.mxu0  ;;  %v4048_v62 = vpop.f32.mrf.mxu1  ;;  %5896 = vmatprep.subr.bf16.mxu0 %v10053_v32  ;;  %5937 = vmatprep.subr.bf16.mxu1 %v10056_v51  ;;  %v10134_v32 = vld [vmem:[%s11144_s20 + $0x90c] ss:$16 sps:$4 sm:$0xff]   ;;  %v10129_v51 = vld [vmem:[%s11144_s20 + $0x900] ss:$16 sps:$4 sm:$0xff]   ;;  %v10132_v6 = vld [vmem:[%s11144_s20 + $0x908] ss:$16 sps:$4 sm:$0xff]  }
 0x563   : > { %v12881_v24 = vpack.c.bf16 %v3578_v52, %v3578_v52  ;;  %v10135_v62 = vld [vmem:[%s11144_s20 + $0xae0] ss:$16 sps:$4 sm:$0xff]   ;;  %v10206_v52 = vld [vmem:[%s11144_s20 + $0xb8c] ss:$16 sps:$4 sm:$0xff]  }
 0x565   : > { %5897 = vmatpush1.bf16.msra.mxu0 %v10051_v22  ;;  %5938 = vmatpush1.bf16.msra.mxu1 %v10054_v19  ;;  %v10137_v22 = vld [vmem:[%s11144_s20 + $0xae4] ss:$16 sps:$4 sm:$0xff]   ;;  %v10140_v19 = vld [vmem:[%s11144_s20 + $0xaec] ss:$16 sps:$4 sm:$0xff]  }
 0x566   : > { %5898 = vmatprep.subr.bf16.mxu0 %v10059_v35  ;;  %5939 = vmatprep.subr.bf16.mxu1 %v10062_v23  ;;  %v10138_v35 = vld [vmem:[%s11144_s20 + $0xae8] ss:$16 sps:$4 sm:$0xff]   ;;  %v10143_v23 = vld [vmem:[%s11144_s20 + $0xac4] ss:$16 sps:$4 sm:$0xff]  }
 0x569   : > { %5899 = vmatpush1.bf16.msra.mxu0 %v10057_v56  ;;  %5940 = vmatpush1.bf16.msra.mxu1 %v10060_v5  ;;  %v10146_v56 = vld [vmem:[%s11144_s20 + $0xacc] ss:$16 sps:$4 sm:$0xff]  }
 0x56a   : > { %5900 = vmatprep.subr.bf16.mxu0 %v10065_v61  ;;  %5941 = vmatprep.subr.bf16.mxu1 %v10068_v18  ;;  %v3580_v5 = vld [vmem:[#allocation3] sm:$0xff]  ;;  %v6052_v61 = vrot.slane %v12804_v1, 2  ;;  %v3581_v18 = vld [vmem:[#allocation3 + $0x8] sm:$0xff] }
 0x56b   : > { %v10149_v1 = vld [vmem:[%s11144_s20 + $0xaa4] ss:$16 sps:$4 sm:$0xff]  }
 0x56d   : > { %5901 = vmatpush1.bf16.msra.mxu0 %v10063_v9  ;;  %5942 = vmatpush1.bf16.msra.mxu1 %v10066_v29 }
 0x56e   : > { %5902 = vmatprep.subr.bf16.mxu0 %v10071_v55  ;;  %5943 = vmatprep.subr.bf16.mxu1 %v10074_v44  ;;  %v10141_v55 = vld [vmem:[%s11144_s20 + $0xac0] ss:$16 sps:$4 sm:$0xff]   ;;  %v10144_v44 = vld [vmem:[%s11144_s20 + $0xac8] ss:$16 sps:$4 sm:$0xff]  }
 0x571   : > { %5903 = vmatpush1.bf16.msra.mxu0 %v10069_v47  ;;  %5944 = vmatpush1.bf16.msra.mxu1 %v10072_v31  ;;  %v4058_v47 = vadd.f32 %v4054_v48, %v3580_v5  ;;  %v10215_v5 = vld [vmem:[%s11144_s20 + $0xb44] ss:$16 sps:$4 sm:$0xff]  }
 0x572   : > { %5904 = vmatprep.subr.bf16.mxu0 %v10077_v59  ;;  %5945 = vmatprep.subr.bf16.mxu1 %v10080_v28  ;;  %v10152_v28 = vld [vmem:[%s11144_s20 + $0xaac] ss:$16 sps:$4 sm:$0xff]  }
 0x575   : > { %5905 = vmatpush1.bf16.msra.mxu0 %v10075_v27  ;;  %5946 = vmatpush1.bf16.msra.mxu1 %v10078_v21  ;;  %v4059_v27 = vadd.f32 %v4055_v33, %v3581_v18  ;;  %v10213_v18 = vld [vmem:[%s11144_s20 + $0xb40] ss:$16 sps:$4 sm:$0xff]  }
 0x576   : > { %5906 = vmatprep.subr.bf16.mxu0 %v10083_v63  ;;  %5947 = vmatprep.subr.bf16.mxu1 %v10086_v58 }
 0x579   : > { %5907 = vmatpush1.bf16.msra.mxu0 %v10081_v30  ;;  %5948 = vmatpush1.bf16.msra.mxu1 %v10084_v57  ;;  %v10155_v57 = vld [vmem:[%s11144_s20 + $0xa84] ss:$16 sps:$4 sm:$0xff]  }
 0x57a   : > { %5908 = vmatprep.subr.bf16.mxu0 %v10089_v2  ;;  %5949 = vmatprep.subr.bf16.mxu1 %v10092_v16  ;;  %v10158_v2 = vld [vmem:[%s11144_s20 + $0xa8c] ss:$16 sps:$4 sm:$0xff]   ;;  %v10153_v16 = vld [vmem:[%s11144_s20 + $0xa80] ss:$16 sps:$4 sm:$0xff]  }
 0x57d   : > { %5909 = vmatpush2.bf16.msra.mxu0 %v10087_v49  ;;  %5950 = vmatpush2.bf16.msra.mxu1 %v10090_v39  ;;  %v10156_v49 = vld [vmem:[%s11144_s20 + $0xa88] ss:$16 sps:$4 sm:$0xff]   ;;  %v10161_v39 = vld [vmem:[%s11144_s20 + $0xa64] ss:$16 sps:$4 sm:$0xff]  }
 0x57e   : > { %5910 = vmatprep.subr.bf16.mxu0 %v10095_v20  ;;  %5951 = vmatprep.subr.bf16.mxu1 %v10098_v38  ;;  %v10164_v20 = vld [vmem:[%s11144_s20 + $0xa6c] ss:$16 sps:$4 sm:$0xff]   ;;  %v10159_v38 = vld [vmem:[%s11144_s20 + $0xa60] ss:$16 sps:$4 sm:$0xff]  }
 0x581   : > { %5911 = vmatpush2.bf16.msra.mxu0 %v10093_v0  ;;  %5952 = vmatpush2.bf16.msra.mxu1 %v10096_v46  ;;  %v10162_v0 = vld [vmem:[%s11144_s20 + $0xa68] ss:$16 sps:$4 sm:$0xff]   ;;  %v10167_v46 = vld [vmem:[%s11144_s20 + $0xa44] ss:$16 sps:$4 sm:$0xff]  }
 0x582   : > { %5912 = vmatprep.subr.bf16.mxu0 %v10101_v3  ;;  %5953 = vmatprep.subr.bf16.mxu1 %v10104_v26  ;;  %v10170_v3 = vld [vmem:[%s11144_s20 + $0xa4c] ss:$16 sps:$4 sm:$0xff]   ;;  %v10165_v26 = vld [vmem:[%s11144_s20 + $0xa40] ss:$16 sps:$4 sm:$0xff]  }
 0x585   : > { %5913 = vmatpush2.bf16.msra.mxu0 %v10099_v41  ;;  %5954 = vmatpush2.bf16.msra.mxu1 %v10102_v13  ;;  %v10168_v41 = vld [vmem:[%s11144_s20 + $0xa48] ss:$16 sps:$4 sm:$0xff]   ;;  %v10173_v13 = vld [vmem:[%s11144_s20 + $0xa24] ss:$16 sps:$4 sm:$0xff]  }
 0x586   : > { %5914 = vmatprep.subr.bf16.mxu0 %v10107_v25  ;;  %5955 = vmatprep.subr.bf16.mxu1 %v10110_v43  ;;  %v10176_v25 = vld [vmem:[%s11144_s20 + $0xa2c] ss:$16 sps:$4 sm:$0xff]   ;;  %v10171_v43 = vld [vmem:[%s11144_s20 + $0xa20] ss:$16 sps:$4 sm:$0xff]  }
 0x589   : > { %5915 = vmatpush2.bf16.msra.mxu0 %v10105_v53  ;;  %5956 = vmatpush2.bf16.msra.mxu1 %v10108_v15  ;;  %v10174_v53 = vld [vmem:[%s11144_s20 + $0xa28] ss:$16 sps:$4 sm:$0xff]   ;;  %v10179_v15 = vld [vmem:[%s11144_s20 + $0xa04] ss:$16 sps:$4 sm:$0xff]  }
 0x58a   : > { %5916 = vmatprep.subr.bf16.mxu0 %v10113_v11  ;;  %5957 = vmatprep.subr.bf16.mxu1 %v10116_v10  ;;  %v10182_v11 = vld [vmem:[%s11144_s20 + $0xa0c] ss:$16 sps:$4 sm:$0xff]   ;;  %v10177_v10 = vld [vmem:[%s11144_s20 + $0xa00] ss:$16 sps:$4 sm:$0xff]  }
 0x58d   : > { %5917 = vmatpush2.bf16.msra.mxu0 %v10111_v54  ;;  %5958 = vmatpush2.bf16.msra.mxu1 %v10114_v4  ;;  %v10180_v54 = vld [vmem:[%s11144_s20 + $0xa08] ss:$16 sps:$4 sm:$0xff]   ;;  %v10185_v4 = vld [vmem:[%s11144_s20 + $0xbe4] ss:$16 sps:$4 sm:$0xff]  }
 0x58e   : > { %5918 = vmatprep.subr.bf16.mxu0 %v10119_v7  ;;  %5959 = vmatprep.subr.bf16.mxu1 %v10122_v34  ;;  %v10188_v7 = vld [vmem:[%s11144_s20 + $0xbec] ss:$16 sps:$4 sm:$0xff]   ;;  %v10183_v34 = vld [vmem:[%s11144_s20 + $0xbe0] ss:$16 sps:$4 sm:$0xff]  }
 0x591   : > { %5919 = vmatpush2.bf16.msra.mxu0 %v10117_v45  ;;  %5960 = vmatpush2.bf16.msra.mxu1 %v10120_v60  ;;  %v10186_v45 = vld [vmem:[%s11144_s20 + $0xbe8] ss:$16 sps:$4 sm:$0xff]   ;;  %v10191_v60 = vld [vmem:[%s11144_s20 + $0xbc4] ss:$16 sps:$4 sm:$0xff]  }
 0x592   : > { %5920 = vmatprep.subr.bf16.mxu0 %v10125_v40  ;;  %5961 = vmatprep.subr.bf16.mxu1 %v10128_v12  ;;  %v10194_v40 = vld [vmem:[%s11144_s20 + $0xbcc] ss:$16 sps:$4 sm:$0xff]   ;;  %v10189_v12 = vld [vmem:[%s11144_s20 + $0xbc0] ss:$16 sps:$4 sm:$0xff]  }
 0x595   : > { %5921 = vmatpush2.bf16.msra.mxu0 %v10123_v50  ;;  %5962 = vmatpush2.bf16.msra.mxu1 %v10126_v36  ;;  %v10192_v50 = vld [vmem:[%s11144_s20 + $0xbc8] ss:$16 sps:$4 sm:$0xff]   ;;  %v10197_v36 = vld [vmem:[%s11144_s20 + $0xba4] ss:$16 sps:$4 sm:$0xff]  }
 0x596   : > { %5922 = vmatprep.subr.bf16.mxu0 %v10131_v37  ;;  %5963 = vmatprep.subr.bf16.mxu1 %v10134_v32  ;;  %v10200_v37 = vld [vmem:[%s11144_s20 + $0xbac] ss:$16 sps:$4 sm:$0xff]   ;;  %v10195_v32 = vld [vmem:[%s11144_s20 + $0xba0] ss:$16 sps:$4 sm:$0xff]  }
 0x599   : > { %5923 = vmatpush2.bf16.msra.mxu0 %v10129_v51  ;;  %5964 = vmatpush2.bf16.msra.mxu1 %v10132_v6  ;;  %v10198_v51 = vld [vmem:[%s11144_s20 + $0xba8] ss:$16 sps:$4 sm:$0xff]   ;;  %v10203_v6 = vld [vmem:[%s11144_s20 + $0xb84] ss:$16 sps:$4 sm:$0xff]  }
 0x59a   : > { %6375 = vmatprep.subr.bf16.mxu0 %v10137_v22  ;;  %6416 = vmatprep.subr.bf16.mxu1 %v10140_v19  ;;  %v10201_v22 = vld [vmem:[%s11144_s20 + $0xb80] ss:$16 sps:$4 sm:$0xff]   ;;  %v10204_v19 = vld [vmem:[%s11144_s20 + $0xb88] ss:$16 sps:$4 sm:$0xff]  }
 0x59c   : > { %v4485_v9 = vpop.f32.mrf.mxu0  ;;  %v4526_v29 = vpop.f32.mrf.mxu1  ;;  %5925 = vmatmul.mubr.bf16.vlgmr.msra.gmra.mxu0 %v12881_v24  ;;  %5966 = vmatmul.mubr.bf16.vlgmr.msra.gmra.mxu1 %v12881_v24 }
 0x59d   : > { %6376 = vmatpush1.bf16.msra.mxu0 %v10135_v62  ;;  %6417 = vmatpush1.bf16.msra.mxu1 %v10138_v35  ;;  %v10209_v62 = vld [vmem:[%s11144_s20 + $0xb64] ss:$16 sps:$4 sm:$0xff]   ;;  %v10212_v35 = vld [vmem:[%s11144_s20 + $0xb6c] ss:$16 sps:$4 sm:$0xff]  }
 0x59e   : > { %v4487_v31 = vpop.f32.mrf.mxu0  ;;  %v4528_v59 = vpop.f32.mrf.mxu1  ;;  %6377 = vmatprep.subr.bf16.mxu0 %v10143_v23  ;;  %6418 = vmatprep.subr.bf16.mxu1 %v10146_v56  ;;  %v10207_v23 = vld [vmem:[%s11144_s20 + $0xb60] ss:$16 sps:$4 sm:$0xff]   ;;  %v10210_v56 = vld [vmem:[%s11144_s20 + $0xb68] ss:$16 sps:$4 sm:$0xff]  }
 0x59f   : > { %v4537_v21 = vcombine.low %v4485_v9, %v4487_v31  ;;  %v4538_v63 = vcombine.low %v4526_v29, %v4528_v59  ;;  %6407 = vmatprep.mubr.bf16.mxu0 %v6052_v61  ;;  %6448 = vmatprep.mubr.bf16.mxu1 %v6052_v61  ;;  %v10218_v61 = vld [vmem:[%s11144_s20 + $0xb4c] ss:$16 sps:$4 sm:$0xff]   ;;  %v10216_v9 = vld [vmem:[%s11144_s20 + $0xb48] ss:$16 sps:$4 sm:$0xff]   ;;  %v10221_v29 = vld [vmem:[%s11144_s20 + $0xb24] ss:$16 sps:$4 sm:$0xff]  }
 0x5a0   : > { %v4489_v42 = vpop.f32.mrf.mxu0  ;;  %v4530_v8 = vpop.f32.mrf.mxu1  ;;  %v10227_v31 = vld [vmem:[%s11144_s20 + $0xb04] ss:$16 sps:$4 sm:$0xff]   ;;  %v10230_v59 = vld [vmem:[%s11144_s20 + $0xb0c] ss:$16 sps:$4 sm:$0xff]  }
 0x5a1   : > { %v12900_v48 = vadd.f32 %v4537_v21, %v4058_v47  ;;  %v12902_v58 = vadd.f32 %v4538_v63, %v4059_v27  ;;  %6378 = vmatpush1.bf16.msra.mxu0 %v10141_v55  ;;  %6419 = vmatpush1.bf16.msra.mxu1 %v10144_v44  ;;  %v10224_v55 = vld [vmem:[%s11144_s20 + $0xb2c] ss:$16 sps:$4 sm:$0xff]   ;;  %v10219_v44 = vld [vmem:[%s11144_s20 + $0xb20] ss:$16 sps:$4 sm:$0xff]   ;;  %v10222_v47 = vld [vmem:[%s11144_s20 + $0xb28] ss:$16 sps:$4 sm:$0xff]  }
 0x5a2   : > { %v4490_v33 = vpop.f32.mrf.mxu0  ;;  %v4531_v30 = vpop.f32.mrf.mxu1  ;;  %6379 = vmatprep.subr.bf16.mxu0 %v10149_v1  ;;  %6420 = vmatprep.subr.bf16.mxu1 %v10152_v28  ;;  %v10225_v1 = vld [vmem:[%s11144_s20 + $0xb00] ss:$16 sps:$4 sm:$0xff]   ;;  %v10228_v28 = vld [vmem:[%s11144_s20 + $0xb08] ss:$16 sps:$4 sm:$0xff]   ;;  %v6051_v27 = vrot.slane %v12881_v24, 2 }
 0x5a5   : > { %6380 = vmatpush1.bf16.msra.mxu0 %v10147_v14  ;;  %6421 = vmatpush1.bf16.msra.mxu1 %v10150_v17 }
 0x5a6   : > { %6381 = vmatprep.subr.bf16.mxu0 %v10155_v57  ;;  %6422 = vmatprep.subr.bf16.mxu1 %v10158_v2 }
 0x5a9   : > { %6382 = vmatpush1.bf16.msra.mxu0 %v10153_v16  ;;  %6423 = vmatpush1.bf16.msra.mxu1 %v10156_v49 }
 0x5aa   : > { %6383 = vmatprep.subr.bf16.mxu0 %v10161_v39  ;;  %6424 = vmatprep.subr.bf16.mxu1 %v10164_v20 }
 0x5ad   : > { %6384 = vmatpush1.bf16.msra.mxu0 %v10159_v38  ;;  %6425 = vmatpush1.bf16.msra.mxu1 %v10162_v0 }
 0x5ae   : > { %6385 = vmatprep.subr.bf16.mxu0 %v10167_v46  ;;  %6426 = vmatprep.subr.bf16.mxu1 %v10170_v3 }
 0x5b1   : > { %6386 = vmatpush1.bf16.msra.mxu0 %v10165_v26  ;;  %6427 = vmatpush1.bf16.msra.mxu1 %v10168_v41 }
 0x5b2   : > { %6387 = vmatprep.subr.bf16.mxu0 %v10173_v13  ;;  %6428 = vmatprep.subr.bf16.mxu1 %v10176_v25 }
 0x5b5   : > { %6388 = vmatpush1.bf16.msra.mxu0 %v10171_v43  ;;  %6429 = vmatpush1.bf16.msra.mxu1 %v10174_v53 }
 0x5b6   : > { %6389 = vmatprep.subr.bf16.mxu0 %v10179_v15  ;;  %6430 = vmatprep.subr.bf16.mxu1 %v10182_v11 }
 0x5b9   : > { %6390 = vmatpush1.bf16.msra.mxu0 %v10177_v10  ;;  %6431 = vmatpush1.bf16.msra.mxu1 %v10180_v54 }
 0x5ba   : > { %6391 = vmatprep.subr.bf16.mxu0 %v10185_v4  ;;  %6432 = vmatprep.subr.bf16.mxu1 %v10188_v7 }
 0x5bd   : > { %6392 = vmatpush2.bf16.msra.mxu0 %v10183_v34  ;;  %6433 = vmatpush2.bf16.msra.mxu1 %v10186_v45 }
 0x5be   : > { %6393 = vmatprep.subr.bf16.mxu0 %v10191_v60  ;;  %6434 = vmatprep.subr.bf16.mxu1 %v10194_v40 }
 0x5c1   : > { %6394 = vmatpush2.bf16.msra.mxu0 %v10189_v12  ;;  %6435 = vmatpush2.bf16.msra.mxu1 %v10192_v50 }
 0x5c2   : > { %6395 = vmatprep.subr.bf16.mxu0 %v10197_v36  ;;  %6436 = vmatprep.subr.bf16.mxu1 %v10200_v37 }
 0x5c5   : > { %6396 = vmatpush2.bf16.msra.mxu0 %v10195_v32  ;;  %6437 = vmatpush2.bf16.msra.mxu1 %v10198_v51 }
 0x5c6   : > { %6397 = vmatprep.subr.bf16.mxu0 %v10203_v6  ;;  %6438 = vmatprep.subr.bf16.mxu1 %v10206_v52 }
 0x5c9   : > { %6398 = vmatpush2.bf16.msra.mxu0 %v10201_v22  ;;  %6439 = vmatpush2.bf16.msra.mxu1 %v10204_v19 }
 0x5ca   : > { %6399 = vmatprep.subr.bf16.mxu0 %v10209_v62  ;;  %6440 = vmatprep.subr.bf16.mxu1 %v10212_v35 }
 0x5cd   : > { %6400 = vmatpush2.bf16.msra.mxu0 %v10207_v23  ;;  %6441 = vmatpush2.bf16.msra.mxu1 %v10210_v56 }
 0x5ce   : > { %6401 = vmatprep.subr.bf16.mxu0 %v10215_v5  ;;  %6442 = vmatprep.subr.bf16.mxu1 %v10218_v61 }
 0x5d1   : > { %6402 = vmatpush2.bf16.msra.mxu0 %v10213_v18  ;;  %6443 = vmatpush2.bf16.msra.mxu1 %v10216_v9 }
 0x5d2   : > { %6403 = vmatprep.subr.bf16.mxu0 %v10221_v29  ;;  %6444 = vmatprep.subr.bf16.mxu1 %v10224_v55 }
 0x5d5   : > { %6404 = vmatpush2.bf16.msra.mxu0 %v10219_v44  ;;  %6445 = vmatpush2.bf16.msra.mxu1 %v10222_v47 }
 0x5d6   : > { %6405 = vmatprep.subr.bf16.mxu0 %v10227_v31  ;;  %6446 = vmatprep.subr.bf16.mxu1 %v10230_v59 }
 0x5d9   : > { %6406 = vmatpush2.bf16.msra.mxu0 %v10225_v1  ;;  %6447 = vmatpush2.bf16.msra.mxu1 %v10228_v28 }
 0x5dc   : > { %v4964_v21 = vpop.f32.mrf.mxu0  ;;  %v5005_v63 = vpop.f32.mrf.mxu1  ;;  %6408 = vmatmul.mubr.bf16.vlgmr.msra.gmra.mxu0 %v6051_v27  ;;  %6449 = vmatmul.mubr.bf16.vlgmr.msra.gmra.mxu1 %v6051_v27 }
 0x5de   : > { %v4966_v42 = vpop.f32.mrf.mxu0  ;;  %v5007_v8 = vpop.f32.mrf.mxu1 }
 0x5df   : > { %v5016_v14 = vcombine.low %v4964_v21, %v4966_v42  ;;  %v5017_v17 = vcombine.low %v5005_v63, %v5007_v8 }
 0x5e0   : > { %v4968_v33 = vpop.f32.mrf.mxu0  ;;  %v5009_v30 = vpop.f32.mrf.mxu1 }
 0x5e1   : > { %v5020_v57 = vadd.f32 %v5016_v14, %v12900_v48  ;;  %v5021_v2 = vadd.f32 %v5017_v17, %v12902_v58 }
 0x5e2   : > { %v4969_v16 = vpop.f32.mrf.mxu0  ;;  %v5010_v49 = vpop.f32.mrf.mxu1 }
 0x61c   : > { %v5447_v39 = vpop.f32.mrf.mxu0  ;;  %v5488_v24 = vpop.f32.mrf.mxu1 }
 0x61e   : > { %v5449_v20 = vpop.f32.mrf.mxu0  ;;  %v5490_v38 = vpop.f32.mrf.mxu1 }
 0x61f   : > { %v5499_v0 = vcombine.low %v5447_v39, %v5449_v20  ;;  %v5500_v46 = vcombine.low %v5488_v24, %v5490_v38 }
 0x620   : > { %v5451_v3 = vpop.f32.mrf.mxu0  ;;  %v5492_v26 = vpop.f32.mrf.mxu1 }
 0x621   : > { %v5503_v41 = vadd.f32 %v5499_v0, %v5020_v57  ;;  %v5504_v13 = vadd.f32 %v5500_v46, %v5021_v2 }
 0x622   : > { %v5452_v25 = vpop.f32.mrf.mxu0  ;;  %v5493_v43 = vpop.f32.mrf.mxu1 }
 0x65c   : > { %v5926_v53 = vpop.f32.mrf.mxu0  ;;  %v5967_v15 = vpop.f32.mrf.mxu1 }
 0x65e   : > { %v5928_v11 = vpop.f32.mrf.mxu0  ;;  %v5969_v48 = vpop.f32.mrf.mxu1 }
 0x65f   : > { %v5978_v10 = vcombine.low %v5926_v53, %v5928_v11  ;;  %v5979_v58 = vcombine.low %v5967_v15, %v5969_v48 }
 0x660   : > { %v5930_v54 = vpop.f32.mrf.mxu0  ;;  %v5971_v4 = vpop.f32.mrf.mxu1 }
 0x661   : > { %v5982_v7 = vadd.f32 %v5978_v10, %v5503_v41  ;;  %v5983_v34 = vadd.f32 %v5979_v58, %v5504_v13 }
 0x662   : > { %v5931_v45 = vpop.f32.mrf.mxu0  ;;  %v5972_v60 = vpop.f32.mrf.mxu1 }
 0x69c   : > { %v6409_v40 = vpop.f32.mrf.mxu0  ;;  %v6450_v12 = vpop.f32.mrf.mxu1 }
 0x69e   : > { %v6411_v50 = vpop.f32.mrf.mxu0  ;;  %v6452_v36 = vpop.f32.mrf.mxu1 }
 0x69f   : > { %v6461_v37 = vcombine.low %v6409_v40, %v6411_v50  ;;  %v6462_v32 = vcombine.low %v6450_v12, %v6452_v36  ;;  %6472 = sbr.rel (%p8867_p13) target bundleno = 2233 (0x8b9), region = 128 }
 0x6a0   : > { %v6413_v51 = vpop.f32.mrf.mxu0  ;;  %v6454_v6 = vpop.f32.mrf.mxu1 }
 0x6a1   : > { %v6465_v52 = vadd.f32 %v6461_v37, %v5982_v7  ;;  %v6466_v22 = vadd.f32 %v6462_v32, %v5983_v34 }
 0x6a2   : > { %v6414_v19 = vpop.f32.mrf.mxu0  ;;  %v6455_v62 = vpop.f32.mrf.mxu1 }
 0x6a3   : > { %6467 = vst [vmem:[#allocation3] sm:$0xff] %v6465_v52  ;;  %6468 = vst [vmem:[#allocation3 + $0x8] sm:$0xff] %v6466_v22 }
 0x6a4   : > { %v10231_v35 = vld [vmem:[#allocation16 + $0xe4] ss:$16 sps:$4 sm:$0xff]   ;;  %v10235_v56 = vld [vmem:[#allocation16 + $0xe0] ss:$16 sps:$4 sm:$0xff]   ;;  %v6477_v41 = vlaneseq  ;;  %v6475_v50 = vld [vmem:[#allocation15] sm:$0xf] }
 0x6a5   : > { %v10233_v23 = vld [vmem:[#allocation16 + $0x2e4] ss:$16 sps:$4 sm:$0xff]   ;;  %7301 = vmatprep.subr.bf16.mxu0 %v10231_v35  ;;  %v10236_v5 = vld [vmem:[#allocation16 + $0x2e0] ss:$16 sps:$4 sm:$0xff]  }
 0x6a6   : > { %7342 = vmatprep.subr.bf16.mxu1 %v10233_v23  ;;  %v10237_v61 = vld [vmem:[#allocation16 + $0xc4] ss:$16 sps:$4 sm:$0xff]   ;;  %7302 = vmatpush1.bf16.msra.mxu0 %v10235_v56  ;;  %v10241_v9 = vld [vmem:[#allocation16 + $0xc0] ss:$16 sps:$4 sm:$0xff]   ;;  %v12962_v53 = vshrl.u32 %v6477_v41, 7 }
 0x6a7   : > { %7343 = vmatpush1.bf16.msra.mxu1 %v10236_v5  ;;  %v10239_v18 = vld [vmem:[#allocation16 + $0x2c4] ss:$16 sps:$4 sm:$0xff]   ;;  %7303 = vmatprep.subr.bf16.mxu0 %v10237_v61  ;;  %v10242_v29 = vld [vmem:[#allocation16 + $0x2c0] ss:$16 sps:$4 sm:$0xff]   ;;  %v10342_v41 = vld [vmem:[#allocation16 + $0x2a8] ss:$16 sps:$4 sm:$0xff]  }
 0x6a8   : > { %7344 = vmatprep.subr.bf16.mxu1 %v10239_v18  ;;  %v10243_v55 = vld [vmem:[#allocation16 + $0xa4] ss:$16 sps:$4 sm:$0xff]   ;;  %v10247_v47 = vld [vmem:[#allocation16 + $0xa0] ss:$16 sps:$4 sm:$0xff]   ;;  %v6479_v54 = vsub.s32 0, %v12962_v53  ;;  %v6483_v7 = vsub.s32 1, %v12962_v53 }
 0x6a9   : > { %v10245_v44 = vld [vmem:[#allocation16 + $0x2a4] ss:$16 sps:$4 sm:$0xff]   ;;  %v10248_v31 = vld [vmem:[#allocation16 + $0x2a0] ss:$16 sps:$4 sm:$0xff]   ;;  %v6487_v34 = vsub.s32 2, %v12962_v53  ;;  %v6491_v60 = vsub.s32 3, %v12962_v53 }
 0x6aa   : > { %7304 = vmatpush1.bf16.msra.mxu0 %v10241_v9  ;;  %v10249_v59 = vld [vmem:[#allocation16 + $0x84] ss:$16 sps:$4 sm:$0xff]   ;;  %v10253_v28 = vld [vmem:[#allocation16 + $0x80] ss:$16 sps:$4 sm:$0xff]   ;;  %v6480_v32 = vrot.slane %v6475_v50, %v6479_v54  ;;  %v6484_v51 = vrot.slane %v6475_v50, %v6483_v7  ;;  %v6473_v52 = vld [vmem:[#allocation3] sm:$0xff] }
 0x6ab   : > { %7345 = vmatpush1.bf16.msra.mxu1 %v10242_v29  ;;  %7305 = vmatprep.subr.bf16.mxu0 %v10243_v55  ;;  %v10251_v1 = vld [vmem:[#allocation16 + $0x284] ss:$16 sps:$4 sm:$0xff]   ;;  %v10254_v27 = vld [vmem:[#allocation16 + $0x280] ss:$16 sps:$4 sm:$0xff]   ;;  %v6488_v6 = vrot.slane %v6475_v50, %v6487_v34  ;;  %v6492_v22 = vrot.slane %v6475_v50, %v6491_v60  ;;  %v10365_v50 = vld [vmem:[#allocation16 + $0x2c] ss:$16 sps:$4 sm:$0xff]  }
 0x6ac   : > { %7346 = vmatprep.subr.bf16.mxu1 %v10245_v44  ;;  %v10255_v21 = vld [vmem:[#allocation16 + $0x64] ss:$16 sps:$4 sm:$0xff]   ;;  %v10259_v42 = vld [vmem:[#allocation16 + $0x60] ss:$16 sps:$4 sm:$0xff]   ;;  %v6493_v19 = vcombine.low %v6480_v32, %v6484_v51  ;;  %v10366_v32 = vld [vmem:[#allocation16 + $0x228] ss:$16 sps:$4 sm:$0xff]  }
 0x6ad   : > { %v10257_v63 = vld [vmem:[#allocation16 + $0x264] ss:$16 sps:$4 sm:$0xff]   ;;  %v10260_v8 = vld [vmem:[#allocation16 + $0x260] ss:$16 sps:$4 sm:$0xff]   ;;  %v6494_v23 = vcombine.low %v6488_v6, %v6492_v22  ;;  %v10371_v51 = vld [vmem:[#allocation16 + $0xc] ss:$16 sps:$4 sm:$0xff]  }
 0x6ae   : > { %7306 = vmatpush1.bf16.msra.mxu0 %v10247_v47  ;;  %v10261_v14 = vld [vmem:[#allocation16 + $0x44] ss:$16 sps:$4 sm:$0xff]   ;;  %v10265_v33 = vld [vmem:[#allocation16 + $0x40] ss:$16 sps:$4 sm:$0xff]   ;;  %v6497_v61 = vadd.f32 %v6493_v19, %v6473_v52  ;;  %v10374_v6 = vld [vmem:[#allocation16 + $0x20c] ss:$16 sps:$4 sm:$0xff]  }
 0x6af   : > { %7347 = vmatpush1.bf16.msra.mxu1 %v10248_v31  ;;  %7307 = vmatprep.subr.bf16.mxu0 %v10249_v59  ;;  %v10263_v17 = vld [vmem:[#allocation16 + $0x244] ss:$16 sps:$4 sm:$0xff]   ;;  %v10266_v30 = vld [vmem:[#allocation16 + $0x240] ss:$16 sps:$4 sm:$0xff]   ;;  %v10369_v52 = vld [vmem:[#allocation16 + $0x8] ss:$16 sps:$4 sm:$0xff]  }
 0x6b0   : > { %7348 = vmatprep.subr.bf16.mxu1 %v10251_v1  ;;  %v10267_v57 = vld [vmem:[#allocation16 + $0x24] ss:$16 sps:$4 sm:$0xff]   ;;  %v10271_v16 = vld [vmem:[#allocation16 + $0x20] ss:$16 sps:$4 sm:$0xff]   ;;  %v6499_v29 = vmax.f32 %v6497_v61, 0.0 }
 0x6b1   : > { %v10269_v2 = vld [vmem:[#allocation16 + $0x224] ss:$16 sps:$4 sm:$0xff]   ;;  %v10272_v49 = vld [vmem:[#allocation16 + $0x220] ss:$16 sps:$4 sm:$0xff]   ;;  %v10372_v22 = vld [vmem:[#allocation16 + $0x208] ss:$16 sps:$4 sm:$0xff]  }
 0x6b2   : > { %7308 = vmatpush1.bf16.msra.mxu0 %v10253_v28  ;;  %v10273_v39 = vld [vmem:[#allocation16 + $0x4] ss:$16 sps:$4 sm:$0xff]   ;;  %v10277_v20 = vld [vmem:[#allocation16] ss:$16 sps:$4 sm:$0xff]   ;;  %v6503_v59 = vcombine.high %v6499_v29, %v6499_v29  ;;  %v10377_v19 = vld [vmem:[#allocation16 + $0x1ec] ss:$16 sps:$4 sm:$0xff]  }
 0x6b3   : > { %7349 = vmatpush1.bf16.msra.mxu1 %v10254_v27  ;;  %7309 = vmatprep.subr.bf16.mxu0 %v10255_v21  ;;  %v10275_v24 = vld [vmem:[#allocation16 + $0x204] ss:$16 sps:$4 sm:$0xff]   ;;  %v10278_v38 = vld [vmem:[#allocation16 + $0x200] ss:$16 sps:$4 sm:$0xff]   ;;  %v10381_v61 = vld [vmem:[#allocation16 + $0x1c8] ss:$16 sps:$4 sm:$0xff]  }
 0x6b4   : > { %7350 = vmatprep.subr.bf16.mxu1 %v10257_v63  ;;  %v10279_v0 = vld [vmem:[#allocation16 + $0x1e4] ss:$16 sps:$4 sm:$0xff]   ;;  %v10283_v3 = vld [vmem:[#allocation16 + $0x1e0] ss:$16 sps:$4 sm:$0xff]   ;;  %v6508_v27 = vpack.c.bf16 %v6503_v59, %v6503_v59  ;;  %v10393_v59 = vld [vmem:[#allocation16 + $0x188] ss:$16 sps:$4 sm:$0xff]  }
 0x6b5   : > { %v10281_v46 = vld [vmem:[#allocation16 + $0x3e4] ss:$16 sps:$4 sm:$0xff]   ;;  %v10284_v26 = vld [vmem:[#allocation16 + $0x3e0] ss:$16 sps:$4 sm:$0xff]  }
 0x6b6   : > { %7310 = vmatpush1.bf16.msra.mxu0 %v10259_v42  ;;  %v10285_v13 = vld [vmem:[#allocation16 + $0x1c4] ss:$16 sps:$4 sm:$0xff]   ;;  %v10289_v43 = vld [vmem:[#allocation16 + $0x1c0] ss:$16 sps:$4 sm:$0xff]   ;;  %7333 = vmatprep.mubr.bf16.mxu0 %v6508_v27 }
 0x6b7   : > { %7351 = vmatpush1.bf16.msra.mxu1 %v10260_v8  ;;  %7311 = vmatprep.subr.bf16.mxu0 %v10261_v14  ;;  %v10287_v25 = vld [vmem:[#allocation16 + $0x3c4] ss:$16 sps:$4 sm:$0xff]   ;;  %v10290_v15 = vld [vmem:[#allocation16 + $0x3c0] ss:$16 sps:$4 sm:$0xff]  }
 0x6b8   : > { %7352 = vmatprep.subr.bf16.mxu1 %v10263_v17  ;;  %v10291_v11 = vld [vmem:[#allocation16 + $0x1a4] ss:$16 sps:$4 sm:$0xff]   ;;  %v10295_v10 = vld [vmem:[#allocation16 + $0x1a0] ss:$16 sps:$4 sm:$0xff]  }
 0x6b9   : > { %v10293_v48 = vld [vmem:[#allocation16 + $0x3a4] ss:$16 sps:$4 sm:$0xff]   ;;  %v10296_v58 = vld [vmem:[#allocation16 + $0x3a0] ss:$16 sps:$4 sm:$0xff]  }
 0x6ba   : > { %7312 = vmatpush1.bf16.msra.mxu0 %v10265_v33  ;;  %v10297_v4 = vld [vmem:[#allocation16 + $0x184] ss:$16 sps:$4 sm:$0xff]   ;;  %v10301_v40 = vld [vmem:[#allocation16 + $0x180] ss:$16 sps:$4 sm:$0xff]  }
 0x6bb   : > { %7353 = vmatpush1.bf16.msra.mxu1 %v10266_v30  ;;  %7313 = vmatprep.subr.bf16.mxu0 %v10267_v57  ;;  %v10299_v45 = vld [vmem:[#allocation16 + $0x384] ss:$16 sps:$4 sm:$0xff]   ;;  %v10302_v12 = vld [vmem:[#allocation16 + $0x380] ss:$16 sps:$4 sm:$0xff]   ;;  %v10329_v30 = vld [vmem:[#allocation16 + $0xec] ss:$16 sps:$4 sm:$0xff]  }
 0x6bc   : > { %7354 = vmatprep.subr.bf16.mxu1 %v10269_v2  ;;  %v10303_v36 = vld [vmem:[#allocation16 + $0x164] ss:$16 sps:$4 sm:$0xff]   ;;  %v10307_v35 = vld [vmem:[#allocation16 + $0x160] ss:$16 sps:$4 sm:$0xff]   ;;  %v10332_v57 = vld [vmem:[#allocation16 + $0x2ec] ss:$16 sps:$4 sm:$0xff]   ;;  %v12976_v2 = vpack.c.bf16 %v6499_v29, %v6499_v29 }
 0x6bd   : > { %v10305_v37 = vld [vmem:[#allocation16 + $0x364] ss:$16 sps:$4 sm:$0xff]   ;;  %v10308_v56 = vld [vmem:[#allocation16 + $0x360] ss:$16 sps:$4 sm:$0xff]   ;;  %v10392_v29 = vld [vmem:[#allocation16 + $0x3ac] ss:$16 sps:$4 sm:$0xff]  }
 0x6be   : > { %7314 = vmatpush1.bf16.msra.mxu0 %v10271_v16  ;;  %v6474_v62 = vld [vmem:[#allocation3 + $0x8] sm:$0xff] }
 0x6bf   : > { %7355 = vmatpush1.bf16.msra.mxu1 %v10272_v49  ;;  %7315 = vmatprep.subr.bf16.mxu0 %v10273_v39  ;;  %v10309_v5 = vld [vmem:[#allocation16 + $0x144] ss:$16 sps:$4 sm:$0xff]   ;;  %v6498_v9 = vadd.f32 %v6494_v23, %v6474_v62  ;;  %v10313_v55 = vld [vmem:[#allocation16 + $0x140] ss:$16 sps:$4 sm:$0xff]   ;;  %v10327_v49 = vld [vmem:[#allocation16 + $0xe8] ss:$16 sps:$4 sm:$0xff]  }
 0x6c0   : > { %7356 = vmatprep.subr.bf16.mxu1 %v10275_v24  ;;  %v10311_v18 = vld [vmem:[#allocation16 + $0x344] ss:$16 sps:$4 sm:$0xff]   ;;  %v10314_v47 = vld [vmem:[#allocation16 + $0x340] ss:$16 sps:$4 sm:$0xff]   ;;  %v10330_v39 = vld [vmem:[#allocation16 + $0x2e8] ss:$16 sps:$4 sm:$0xff]  }
 0x6c1   : > { %v6500_v44 = vmax.f32 %v6498_v9, 0.0  ;;  %v10315_v31 = vld [vmem:[#allocation16 + $0x124] ss:$16 sps:$4 sm:$0xff]   ;;  %v10319_v21 = vld [vmem:[#allocation16 + $0x120] ss:$16 sps:$4 sm:$0xff]  }
 0x6c2   : > { %7316 = vmatpush1.bf16.msra.mxu0 %v10277_v20  ;;  %v10317_v1 = vld [vmem:[#allocation16 + $0x324] ss:$16 sps:$4 sm:$0xff]   ;;  %v10320_v42 = vld [vmem:[#allocation16 + $0x320] ss:$16 sps:$4 sm:$0xff]   ;;  %v10335_v24 = vld [vmem:[#allocation16 + $0xcc] ss:$16 sps:$4 sm:$0xff]  }
 0x6c3   : > { %7357 = vmatpush1.bf16.msra.mxu1 %v10278_v38  ;;  %7317 = vmatprep.subr.bf16.mxu0 %v10279_v0  ;;  %v6504_v28 = vcombine.high %v6500_v44, %v6500_v44  ;;  %v10321_v8 = vld [vmem:[#allocation16 + $0x104] ss:$16 sps:$4 sm:$0xff]   ;;  %v10325_v17 = vld [vmem:[#allocation16 + $0x100] ss:$16 sps:$4 sm:$0xff]   ;;  %v12978_v16 = vpack.c.bf16 %v6500_v44, %v6500_v44  ;;  %v10338_v20 = vld [vmem:[#allocation16 + $0x2cc] ss:$16 sps:$4 sm:$0xff]  }
 0x6c4   : > { %7358 = vmatprep.subr.bf16.mxu1 %v10281_v46  ;;  %v10323_v14 = vld [vmem:[#allocation16 + $0x304] ss:$16 sps:$4 sm:$0xff]   ;;  %v10326_v33 = vld [vmem:[#allocation16 + $0x300] ss:$16 sps:$4 sm:$0xff]   ;;  %v10333_v38 = vld [vmem:[#allocation16 + $0xc8] ss:$16 sps:$4 sm:$0xff]  }
 0x6c5   : > { %v6510_v63 = vpack.c.bf16 %v6504_v28, %v6504_v28  ;;  %v10336_v0 = vld [vmem:[#allocation16 + $0x2c8] ss:$16 sps:$4 sm:$0xff]   ;;  %v10341_v46 = vld [vmem:[#allocation16 + $0xac] ss:$16 sps:$4 sm:$0xff]  }
 0x6c6   : > { %7318 = vmatpush2.bf16.msra.mxu0 %v10283_v3  ;;  %v10344_v3 = vld [vmem:[#allocation16 + $0x2ac] ss:$16 sps:$4 sm:$0xff]   ;;  %v10378_v23 = vld [vmem:[#allocation16 + $0x3e8] ss:$16 sps:$4 sm:$0xff]  }
 0x6c7   : > { %7359 = vmatpush2.bf16.msra.mxu1 %v10284_v26  ;;  %7319 = vmatprep.subr.bf16.mxu0 %v10285_v13  ;;  %v10339_v26 = vld [vmem:[#allocation16 + $0xa8] ss:$16 sps:$4 sm:$0xff]   ;;  %v10347_v13 = vld [vmem:[#allocation16 + $0x8c] ss:$16 sps:$4 sm:$0xff]  }
 0x6c8   : > { %7360 = vmatprep.subr.bf16.mxu1 %v10287_v25  ;;  %7374 = vmatprep.mubr.bf16.mxu1 %v6510_v63  ;;  %v10350_v25 = vld [vmem:[#allocation16 + $0x28c] ss:$16 sps:$4 sm:$0xff]   ;;  %v10390_v44 = vld [vmem:[#allocation16 + $0x3a8] ss:$16 sps:$4 sm:$0xff]  }
 0x6c9   : > { %v10380_v62 = vld [vmem:[#allocation16 + $0x3ec] ss:$16 sps:$4 sm:$0xff]  }
 0x6ca   : > { %7320 = vmatpush2.bf16.msra.mxu0 %v10289_v43  ;;  %v10345_v43 = vld [vmem:[#allocation16 + $0x88] ss:$16 sps:$4 sm:$0xff]   ;;  %v10389_v9 = vld [vmem:[#allocation16 + $0x1ac] ss:$16 sps:$4 sm:$0xff]  }
 0x6cb   : > { %7361 = vmatpush2.bf16.msra.mxu1 %v10290_v15  ;;  %7321 = vmatprep.subr.bf16.mxu0 %v10291_v11  ;;  %v10348_v15 = vld [vmem:[#allocation16 + $0x288] ss:$16 sps:$4 sm:$0xff]   ;;  %v10353_v11 = vld [vmem:[#allocation16 + $0x6c] ss:$16 sps:$4 sm:$0xff]  }
 0x6cc   : > { %7362 = vmatprep.subr.bf16.mxu1 %v10293_v48  ;;  %v10356_v48 = vld [vmem:[#allocation16 + $0x26c] ss:$16 sps:$4 sm:$0xff]  }
 0x6cd   : > { %v10401_v28 = vld [vmem:[#allocation16 + $0x16c] ss:$16 sps:$4 sm:$0xff]  }
 0x6ce   : > { %7322 = vmatpush2.bf16.msra.mxu0 %v10295_v10  ;;  %v10351_v10 = vld [vmem:[#allocation16 + $0x68] ss:$16 sps:$4 sm:$0xff]  }
 0x6cf   : > { %7363 = vmatpush2.bf16.msra.mxu1 %v10296_v58  ;;  %7323 = vmatprep.subr.bf16.mxu0 %v10297_v4  ;;  %v10354_v58 = vld [vmem:[#allocation16 + $0x268] ss:$16 sps:$4 sm:$0xff]   ;;  %v10359_v4 = vld [vmem:[#allocation16 + $0x4c] ss:$16 sps:$4 sm:$0xff]  }
 0x6d0   : > { %7364 = vmatprep.subr.bf16.mxu1 %v10299_v45  ;;  %v10362_v45 = vld [vmem:[#allocation16 + $0x24c] ss:$16 sps:$4 sm:$0xff]  }
 0x6d2   : > { %7324 = vmatpush2.bf16.msra.mxu0 %v10301_v40  ;;  %v10357_v40 = vld [vmem:[#allocation16 + $0x48] ss:$16 sps:$4 sm:$0xff]  }
 0x6d3   : > { %7365 = vmatpush2.bf16.msra.mxu1 %v10302_v12  ;;  %7325 = vmatprep.subr.bf16.mxu0 %v10303_v36  ;;  %v10360_v12 = vld [vmem:[#allocation16 + $0x248] ss:$16 sps:$4 sm:$0xff]   ;;  %v10368_v36 = vld [vmem:[#allocation16 + $0x22c] ss:$16 sps:$4 sm:$0xff]  }
 0x6d4   : > { %7366 = vmatprep.subr.bf16.mxu1 %v10305_v37  ;;  %v10363_v37 = vld [vmem:[#allocation16 + $0x28] ss:$16 sps:$4 sm:$0xff]  }
 0x6d6   : > { %7326 = vmatpush2.bf16.msra.mxu0 %v10307_v35  ;;  %v10375_v35 = vld [vmem:[#allocation16 + $0x1e8] ss:$16 sps:$4 sm:$0xff]  }
 0x6d7   : > { %7367 = vmatpush2.bf16.msra.mxu1 %v10308_v56  ;;  %7327 = vmatprep.subr.bf16.mxu0 %v10309_v5  ;;  %v10383_v56 = vld [vmem:[#allocation16 + $0x1cc] ss:$16 sps:$4 sm:$0xff]  }
 0x6d8   : > { %7368 = vmatprep.subr.bf16.mxu1 %v10311_v18  ;;  %v10386_v5 = vld [vmem:[#allocation16 + $0x3cc] ss:$16 sps:$4 sm:$0xff]   ;;  %v10384_v18 = vld [vmem:[#allocation16 + $0x3c8] ss:$16 sps:$4 sm:$0xff]  }
 0x6da   : > { %7328 = vmatpush2.bf16.msra.mxu0 %v10313_v55  ;;  %v10387_v55 = vld [vmem:[#allocation16 + $0x1a8] ss:$16 sps:$4 sm:$0xff]  }
 0x6db   : > { %7369 = vmatpush2.bf16.msra.mxu1 %v10314_v47  ;;  %7329 = vmatprep.subr.bf16.mxu0 %v10315_v31  ;;  %v10395_v47 = vld [vmem:[#allocation16 + $0x18c] ss:$16 sps:$4 sm:$0xff]  }
 0x6dc   : > { %7370 = vmatprep.subr.bf16.mxu1 %v10317_v1  ;;  %v10398_v31 = vld [vmem:[#allocation16 + $0x38c] ss:$16 sps:$4 sm:$0xff]   ;;  %v10396_v1 = vld [vmem:[#allocation16 + $0x388] ss:$16 sps:$4 sm:$0xff]  }
 0x6de   : > { %7330 = vmatpush2.bf16.msra.mxu0 %v10319_v21  ;;  %v10399_v21 = vld [vmem:[#allocation16 + $0x168] ss:$16 sps:$4 sm:$0xff]  }
 0x6df   : > { %7371 = vmatpush2.bf16.msra.mxu1 %v10320_v42  ;;  %7331 = vmatprep.subr.bf16.mxu0 %v10321_v8  ;;  %v10407_v42 = vld [vmem:[#allocation16 + $0x14c] ss:$16 sps:$4 sm:$0xff]  }
 0x6e0   : > { %7372 = vmatprep.subr.bf16.mxu1 %v10323_v14  ;;  %v10410_v8 = vld [vmem:[#allocation16 + $0x34c] ss:$16 sps:$4 sm:$0xff]   ;;  %v10405_v14 = vld [vmem:[#allocation16 + $0x148] ss:$16 sps:$4 sm:$0xff]  }
 0x6e2   : > { %7332 = vmatpush2.bf16.msra.mxu0 %v10325_v17  ;;  %v10408_v17 = vld [vmem:[#allocation16 + $0x348] ss:$16 sps:$4 sm:$0xff]  }
 0x6e3   : > { %7373 = vmatpush2.bf16.msra.mxu1 %v10326_v33  ;;  %7383 = vmatprep.subr.bf16.mxu0 %v10329_v30  ;;  %v10413_v33 = vld [vmem:[#allocation16 + $0x12c] ss:$16 sps:$4 sm:$0xff]  }
 0x6e4   : > { %7424 = vmatprep.subr.bf16.mxu1 %v10332_v57  ;;  %v10416_v30 = vld [vmem:[#allocation16 + $0x32c] ss:$16 sps:$4 sm:$0xff]   ;;  %v10411_v57 = vld [vmem:[#allocation16 + $0x128] ss:$16 sps:$4 sm:$0xff]  }
 0x6e5   : > { %7334 = vmatmul.mubr.bf16.vlgmr.msra.gmra.mxu0 %v12976_v2 }
 0x6e6   : > { %7375 = vmatmul.mubr.bf16.vlgmr.msra.gmra.mxu1 %v12978_v16  ;;  %7384 = vmatpush1.bf16.msra.mxu0 %v10327_v49  ;;  %v10414_v49 = vld [vmem:[#allocation16 + $0x328] ss:$16 sps:$4 sm:$0xff]  }
 0x6e7   : > { %7425 = vmatpush1.bf16.msra.mxu1 %v10330_v39  ;;  %7385 = vmatprep.subr.bf16.mxu0 %v10335_v24  ;;  %v10419_v39 = vld [vmem:[#allocation16 + $0x10c] ss:$16 sps:$4 sm:$0xff]  }
 0x6e8   : > { %7426 = vmatprep.subr.bf16.mxu1 %v10338_v20  ;;  %7415 = vmatprep.mubr.bf16.mxu0 %v6508_v27  ;;  %v10404_v27 = vld [vmem:[#allocation16 + $0x36c] ss:$16 sps:$4 sm:$0xff]   ;;  %v10417_v20 = vld [vmem:[#allocation16 + $0x108] ss:$16 sps:$4 sm:$0xff]  }
 0x6e9   : > { %7456 = vmatprep.mubr.bf16.mxu1 %v6510_v63  ;;  %v10402_v63 = vld [vmem:[#allocation16 + $0x368] ss:$16 sps:$4 sm:$0xff]   ;;  %v10422_v24 = vld [vmem:[#allocation16 + $0x30c] ss:$16 sps:$4 sm:$0xff]  }
 0x6ea   : > { %7386 = vmatpush1.bf16.msra.mxu0 %v10333_v38  ;;  %v10420_v38 = vld [vmem:[#allocation16 + $0x308] ss:$16 sps:$4 sm:$0xff]  }
 0x6eb   : > { %7427 = vmatpush1.bf16.msra.mxu1 %v10336_v0  ;;  %7387 = vmatprep.subr.bf16.mxu0 %v10341_v46  ;;  %v10423_v0 = vld [vmem:[#allocation18 + $0x78] sm:$0xff]  }
 0x6ec   : > { %7428 = vmatprep.subr.bf16.mxu1 %v10344_v3  ;;  %v10424_v46 = vld [vmem:[#allocation18 + $0x38] sm:$0xff]   ;;  %v10425_v3 = vld [vmem:[#allocation18 + $0x70] sm:$0xff]  }
 0x6ee   : > { %7388 = vmatpush1.bf16.msra.mxu0 %v10339_v26  ;;  %v10426_v26 = vld [vmem:[#allocation18 + $0x30] sm:$0xff]  }
 0x6ef   : > { %7429 = vmatpush1.bf16.msra.mxu1 %v10342_v41  ;;  %7389 = vmatprep.subr.bf16.mxu0 %v10347_v13  ;;  %v10427_v41 = vld [vmem:[#allocation18 + $0x68] sm:$0xff]  }
 0x6f0   : > { %7430 = vmatprep.subr.bf16.mxu1 %v10350_v25  ;;  %v10428_v13 = vld [vmem:[#allocation18 + $0x28] sm:$0xff]   ;;  %v10429_v25 = vld [vmem:[#allocation18 + $0x60] sm:$0xff]  }
 0x6f2   : > { %7390 = vmatpush1.bf16.msra.mxu0 %v10345_v43  ;;  %v10430_v43 = vld [vmem:[#allocation18 + $0x20] sm:$0xff]  }
 0x6f3   : > { %7431 = vmatpush1.bf16.msra.mxu1 %v10348_v15  ;;  %7391 = vmatprep.subr.bf16.mxu0 %v10353_v11  ;;  %v10431_v15 = vld [vmem:[#allocation18 + $0x58] sm:$0xff]  }
 0x6f4   : > { %7432 = vmatprep.subr.bf16.mxu1 %v10356_v48  ;;  %v10439_v11 = vld [vmem:[#allocation18 + $0xf8] sm:$0xff]  }
 0x6f5   : > { %v10440_v48 = vld [vmem:[#allocation18 + $0xb8] sm:$0xff]  }
 0x6f6   : > { %7392 = vmatpush1.bf16.msra.mxu0 %v10351_v10  ;;  %v10441_v10 = vld [vmem:[#allocation18 + $0xf0] sm:$0xff]  }
 0x6f7   : > { %7433 = vmatpush1.bf16.msra.mxu1 %v10354_v58  ;;  %7393 = vmatprep.subr.bf16.mxu0 %v10359_v4  ;;  %v10432_v58 = vld [vmem:[#allocation18 + $0x18] sm:$0xff]   ;;  %v10443_v4 = vld [vmem:[#allocation18 + $0xe8] sm:$0xff]  }
 0x6f8   : > { %7434 = vmatprep.subr.bf16.mxu1 %v10362_v45  ;;  %v10434_v45 = vld [vmem:[#allocation18 + $0x10] sm:$0xff]  }
 0x6fa   : > { %7394 = vmatpush1.bf16.msra.mxu0 %v10357_v40  ;;  %v10435_v40 = vld [vmem:[#allocation18 + $0x48] sm:$0xff]  }
 0x6fb   : > { %7435 = vmatpush1.bf16.msra.mxu1 %v10360_v12  ;;  %7395 = vmatprep.subr.bf16.mxu0 %v10365_v50  ;;  %v10444_v12 = vld [vmem:[#allocation18 + $0xa8] sm:$0xff]   ;;  %v10445_v50 = vld [vmem:[#allocation18 + $0xe0] sm:$0xff]  }
 0x6fc   : > { %7436 = vmatprep.subr.bf16.mxu1 %v10368_v36  ;;  %v10436_v36 = vld [vmem:[#allocation18 + $0x8] sm:$0xff]  }
 0x6fe   : > { %7396 = vmatpush1.bf16.msra.mxu0 %v10363_v37  ;;  %v10437_v37 = vld [vmem:[#allocation18 + $0x40] sm:$0xff]  }
 0x6ff   : > { %7437 = vmatpush1.bf16.msra.mxu1 %v10366_v32  ;;  %7397 = vmatprep.subr.bf16.mxu0 %v10371_v51  ;;  %v10446_v32 = vld [vmem:[#allocation18 + $0xa0] sm:$0xff]   ;;  %v10447_v51 = vld [vmem:[#allocation18 + $0xd8] sm:$0xff]  }
 0x700   : > { %7438 = vmatprep.subr.bf16.mxu1 %v10374_v6  ;;  %v10438_v6 = vld [vmem:[#allocation18] sm:$0xff]  }
 0x702   : > { %7398 = vmatpush1.bf16.msra.mxu0 %v10369_v52  ;;  %v10448_v52 = vld [vmem:[#allocation18 + $0x98] sm:$0xff]  }
 0x703   : > { %7439 = vmatpush1.bf16.msra.mxu1 %v10372_v22  ;;  %7399 = vmatprep.subr.bf16.mxu0 %v10377_v19  ;;  %v10449_v22 = vld [vmem:[#allocation18 + $0xd0] sm:$0xff]  }
 0x704   : > { %7440 = vmatprep.subr.bf16.mxu1 %v10380_v62  ;;  %v10450_v19 = vld [vmem:[#allocation18 + $0x90] sm:$0xff]   ;;  %v10451_v62 = vld [vmem:[#allocation18 + $0xc8] sm:$0xff]  }
 0x706   : > { %7400 = vmatpush2.bf16.msra.mxu0 %v10375_v35  ;;  %v10452_v35 = vld [vmem:[#allocation18 + $0x88] sm:$0xff]  }
 0x707   : > { %7441 = vmatpush2.bf16.msra.mxu1 %v10378_v23  ;;  %7401 = vmatprep.subr.bf16.mxu0 %v10383_v56  ;;  %v10453_v23 = vld [vmem:[#allocation18 + $0xc0] sm:$0xff]  }
 0x708   : > { %7442 = vmatprep.subr.bf16.mxu1 %v10386_v5  ;;  %v10454_v56 = vld [vmem:[#allocation18 + $0x80] sm:$0xff]   ;;  %v6639_v5 = vld [vmem:[#allocation17] sm:$0xf] }
 0x70a   : > { %7402 = vmatpush2.bf16.msra.mxu0 %v10381_v61  ;;  %v6644_v61 = vrot.slane %v6639_v5, %v6479_v54  ;;  %v6652_v54 = vrot.slane %v6639_v5, %v6487_v34 }
 0x70b   : > { %7443 = vmatpush2.bf16.msra.mxu1 %v10384_v18  ;;  %7403 = vmatprep.subr.bf16.mxu0 %v10389_v9  ;;  %v6648_v18 = vrot.slane %v6639_v5, %v6483_v7  ;;  %v6656_v7 = vrot.slane %v6639_v5, %v6491_v60 }
 0x70c   : > { %7444 = vmatprep.subr.bf16.mxu1 %v10392_v29 }
 0x70e   : > { %7404 = vmatpush2.bf16.msra.mxu0 %v10387_v55 }
 0x70f   : > { %7445 = vmatpush2.bf16.msra.mxu1 %v10390_v44  ;;  %7405 = vmatprep.subr.bf16.mxu0 %v10395_v47 }
 0x710   : > { %7446 = vmatprep.subr.bf16.mxu1 %v10398_v31 }
 0x712   : > { %7406 = vmatpush2.bf16.msra.mxu0 %v10393_v59 }
 0x713   : > { %7447 = vmatpush2.bf16.msra.mxu1 %v10396_v1  ;;  %7407 = vmatprep.subr.bf16.mxu0 %v10401_v28 }
 0x714   : > { %7448 = vmatprep.subr.bf16.mxu1 %v10404_v27 }
 0x716   : > { %7408 = vmatpush2.bf16.msra.mxu0 %v10399_v21 }
 0x717   : > { %7449 = vmatpush2.bf16.msra.mxu1 %v10402_v63  ;;  %7409 = vmatprep.subr.bf16.mxu0 %v10407_v42 }
 0x718   : > { %7450 = vmatprep.subr.bf16.mxu1 %v10410_v8 }
 0x71a   : > { %7410 = vmatpush2.bf16.msra.mxu0 %v10405_v14 }
 0x71b   : > { %7451 = vmatpush2.bf16.msra.mxu1 %v10408_v17  ;;  %7411 = vmatprep.subr.bf16.mxu0 %v10413_v33 }
 0x71c   : > { %7452 = vmatprep.subr.bf16.mxu1 %v10416_v30 }
 0x71e   : > { %7412 = vmatpush2.bf16.msra.mxu0 %v10411_v57 }
 0x71f   : > { %7453 = vmatpush2.bf16.msra.mxu1 %v10414_v49  ;;  %7413 = vmatprep.subr.bf16.mxu0 %v10419_v39 }
 0x720   : > { %7454 = vmatprep.subr.bf16.mxu1 %v10422_v24 }
 0x722   : > { %7414 = vmatpush2.bf16.msra.mxu0 %v10417_v20 }
 0x723   : > { %7455 = vmatpush2.bf16.msra.mxu1 %v10420_v38  ;;  %9083 = vmatprep.subr.bf16.mxu0 %v10423_v0 }
 0x724   : > { %9105 = vmatprep.subr.bf16.mxu1 %v10439_v11 }
 0x725   : > { %7416 = vmatmul.mubr.bf16.vlgmr.msra.gmra.mxu0 %v12976_v2  ;;  %v10433_v2 = vld [vmem:[#allocation18 + $0x50] sm:$0xff]  }
 0x726   : > { %7457 = vmatmul.mubr.bf16.vlgmr.msra.gmra.mxu1 %v12978_v16  ;;  %9084 = vmatpush3.bf16.msra.mxu0 %v10424_v46  ;;  %v10442_v16 = vld [vmem:[#allocation18 + $0xb0] sm:$0xff]  }
 0x727   : > { %9085 = vmatprep.subr.bf16.mxu0 %v10425_v3  ;;  %9106 = vmatpush3.bf16.msra.mxu1 %v10440_v48  ;;  %v8996_v48 = vld [vmem:[#allocation20] ss:$0 sm:$0xff] }
 0x728   : > { %9107 = vmatprep.subr.bf16.mxu1 %v10441_v10 }
 0x72a   : > { %9086 = vmatpush3.bf16.msra.mxu0 %v10426_v26 }
 0x72b   : > { %9087 = vmatprep.subr.bf16.mxu0 %v10427_v41  ;;  %9108 = vmatpush3.bf16.msra.mxu1 %v10442_v16 }
 0x72c   : > { %9109 = vmatprep.subr.bf16.mxu1 %v10443_v4 }
 0x72e   : > { %9088 = vmatpush3.bf16.msra.mxu0 %v10428_v13 }
 0x72f   : > { %9089 = vmatprep.subr.bf16.mxu0 %v10429_v25  ;;  %9110 = vmatpush3.bf16.msra.mxu1 %v10444_v12 }
 0x730   : > { %9111 = vmatprep.subr.bf16.mxu1 %v10445_v50 }
 0x732   : > { %9090 = vmatpush3.bf16.msra.mxu0 %v10430_v43 }
 0x733   : > { %9091 = vmatprep.subr.bf16.mxu0 %v10431_v15  ;;  %9112 = vmatpush3.bf16.msra.mxu1 %v10446_v32 }
 0x734   : > { %9113 = vmatprep.subr.bf16.mxu1 %v10447_v51 }
 0x736   : > { %9092 = vmatpush3.bf16.msra.mxu0 %v10432_v58 }
 0x737   : > { %9093 = vmatprep.subr.bf16.mxu0 %v10433_v2  ;;  %9114 = vmatpush3.bf16.msra.mxu1 %v10448_v52 }
 0x738   : > { %9115 = vmatprep.subr.bf16.mxu1 %v10449_v22 }
 0x73a   : > { %9094 = vmatpush3.bf16.msra.mxu0 %v10434_v45 }
 0x73b   : > { %9095 = vmatprep.subr.bf16.mxu0 %v10435_v40  ;;  %9116 = vmatpush3.bf16.msra.mxu1 %v10450_v19 }
 0x73c   : > { %9117 = vmatprep.subr.bf16.mxu1 %v10451_v62 }
 0x73e   : > { %9096 = vmatpush3.bf16.msra.mxu0 %v10436_v36 }
 0x73f   : > { %9097 = vmatprep.subr.bf16.mxu0 %v10437_v37  ;;  %9118 = vmatpush3.bf16.msra.mxu1 %v10452_v35 }
 0x740   : > { %9119 = vmatprep.subr.bf16.mxu1 %v10453_v23 }
 0x742   : > { %9098 = vmatpush3.bf16.msra.mxu0 %v10438_v6 }
 0x743   : > { %9120 = vmatpush3.bf16.msra.mxu1 %v10454_v56 }
 0x7a5   : > { %v7335_v9 = vpop.f32.mrf.mxu0 }
 0x7a6   : > { %v7376_v29 = vpop.f32.mrf.mxu1  ;;  %v7336_v55 = vadd.f32 %v7335_v9, %v6644_v61 }
 0x7a7   : > { %v7337_v44 = vpop.f32.mrf.mxu0 }
 0x7a8   : > { %v7378_v47 = vpop.f32.mrf.mxu1  ;;  %v7377_v31 = vadd.f32 %v7376_v29, %v7336_v55  ;;  %v7338_v59 = vadd.f32 %v7337_v44, %v6648_v18 }
 0x7a9   : > { %v7339_v1 = vpop.f32.mrf.mxu0 }
 0x7aa   : > { %v7380_v28 = vpop.f32.mrf.mxu1  ;;  %v7379_v27 = vadd.f32 %v7378_v47, %v7338_v59  ;;  %v7465_v21 = vmax.f32 %v7377_v31, 0.0 }
 0x7ab   : > { %v7340_v63 = vpop.f32.mrf.mxu0 }
 0x7ac   : > { %v7381_v42 = vpop.f32.mrf.mxu1  ;;  %v7466_v8 = vmax.f32 %v7379_v27, 0.0  ;;  %v7469_v17 = vpack.c.bf16 %v7465_v21, %v7465_v21 }
 0x7ae   : > { %v7470_v14 = vpack.c.bf16 %v7466_v8, %v7466_v8 }
 0x7b0   : > { %7768 = vmatprep.mubr.bf16.mxu0 %v7470_v14 }
 0x7b1   : > { %7769 = vmatmul.mubr.bf16.vlgmr.msra.gmra.mxu0 %v7469_v17 }
 0x7e5   : > { %v7417_v33 = vpop.f32.mrf.mxu0 }
 0x7e6   : > { %v7458_v30 = vpop.f32.mrf.mxu1  ;;  %v7418_v57 = vadd.f32 %v7417_v33, %v6652_v54 }
 0x7e7   : > { %v7419_v49 = vpop.f32.mrf.mxu0 }
 0x7e8   : > { %v7460_v39 = vpop.f32.mrf.mxu1  ;;  %v7459_v24 = vadd.f32 %v7458_v30, %v7418_v57  ;;  %v7420_v20 = vadd.f32 %v7419_v49, %v6656_v7 }
 0x7e9   : > { %v7421_v38 = vpop.f32.mrf.mxu0 }
 0x7ea   : > { %v7462_v0 = vpop.f32.mrf.mxu1  ;;  %v7461_v46 = vadd.f32 %v7460_v39, %v7420_v20  ;;  %v7467_v3 = vmax.f32 %v7459_v24, 0.0 }
 0x7eb   : > { %v7422_v26 = vpop.f32.mrf.mxu0 }
 0x7ec   : > { %v7463_v41 = vpop.f32.mrf.mxu1  ;;  %v7468_v13 = vmax.f32 %v7461_v46, 0.0  ;;  %v7471_v43 = vpack.c.bf16 %v7467_v3, %v7467_v3 }
 0x7ee   : > { %v7472_v25 = vpack.c.bf16 %v7468_v13, %v7468_v13 }
 0x7f0   : > { %7808 = vmatprep.mubr.bf16.mxu1 %v7472_v25 }
 0x7f1   : > { %7809 = vmatmul.mubr.bf16.vlgmr.msra.gmra.mxu1 %v7471_v43 }
 0x871   : > { %v9099_v53 = vpop.f32.mrf.mxu0 }
 0x873   : > { %v9100_v34 = vpop.f32.mrf.mxu0 }
 0x874   : > { %v9101_v11 = vadd.f32 %v9100_v34, %v9099_v53 }
 0x875   : > { %v9102_v60 = vpop.f32.mrf.mxu0 }
 0x876   : > { %v7771_v2 = vadd.f32 %v9101_v11, %v8996_v48 }
 0x877   : > { %v9103_v15 = vpop.f32.mrf.mxu0 }
 0x8b1   : > { %v9121_v10 = vpop.f32.mrf.mxu1 }
 0x8b3   : > { %v9122_v58 = vpop.f32.mrf.mxu1 }
 0x8b4   : > { %v9123_v16 = vadd.f32 %v9122_v58, %v9121_v10 }
 0x8b5   : > { %v9124_v4 = vpop.f32.mrf.mxu1 }
 0x8b6   : > { %v7811_v45 = vadd.f32 %v9123_v16, %v7771_v2 }
 0x8b7   : > { %v9125_v40 = vpop.f32.mrf.mxu1 }
 0x8b8   : > { %7816 = vst [vmem:[%s13021_s13] sm:$0xf] %v7811_v45 }
 0x8b9 PF: > { %p25_p6 = scmp.ge.s32.totalorder %s11066_s21, 7   ;;  %s13152_s25 = smov %s10827_s26 }
 0x8ba   : > { %s13153_s26 = smov %s10831_s27  ;;  %s13154_s27 = smov %s11077_s2 }
 0x8bb   : > { %s13155_s28 = smov %s11066_s21  ;;  %27 = sbr.rel (!%p25_p6) target bundleno = 10 (0xa), region = 175 }
 0x8c0   :  { %7828 = vsyncpa [#allocation5], 1 }
 0x8c1   :  { %7830 = vsyncpa [#allocation5 + $0x1], 1 }
 0x8c2   :  { %7831 = vsyncpa [#allocation7], 1 }
 0x8c3   :  { %7832 = vsyncpa [#allocation10], 1 }
 0x8c4   :  { %7833 = vsyncpa [#allocation13], 1 }
 0x8c5   :  { %7834 = vsyncpa [#allocation19], 1 }

</bundles_post_ra>
